<compile_context>
chip_gen: v7x
topology: tpu7x:2x2x1
jax: 0.10.0
libtpu: 0.0.40
codegen_flags: <defaults>
</compile_context>

<pallas_src>
import math

import jax
import jax.numpy as jnp
from jax.experimental import pallas as pl
from jax.experimental.pallas import tpu as pltpu


# ---------------------------------------------------------------------------
# Kernel: one LSTM direction over one batch tile (pixels on lanes).
#   x_ref : (T, in_dim, TB)        bf16 time-major input tile
#   w_ref : (4*hid, in_dim+hid)    bf16, [W_ih | W_hh] (PyTorch layout, concat on K)
#   b_ref : (4*hid, 1)             f32,  bias_ih + bias_hh
#   o_ref : (T, hid, TB)           f32 hidden states for every timestep
# Gate order follows PyTorch: rows [i | f | g | o].
# ---------------------------------------------------------------------------
def _lstm_kernel(x_ref, w_ref, b_ref, o_ref):
    T, in_dim, TB = x_ref.shape
    four_hid = w_ref.shape[0]
    hid = four_hid // 4

    # Lane sub-tiles of 128 so elementwise work on sub-tile s overlaps the MXU
    # drain of sub-tile s+1 inside the latency-bound recurrence.
    SUB = 128 if TB % 128 == 0 else TB
    n_sub = TB // SUB

    # Hoist loop-invariant loads / broadcasts out of the serial time loop.
    w = w_ref[...]                                              # (4*hid, K) bf16
    b = jnp.broadcast_to(b_ref[...], (four_hid, SUB))           # lane broadcast, once

    h0 = jnp.zeros((hid, TB), jnp.float32)
    c0 = jnp.zeros((hid, TB), jnp.float32)

    def step(t, carry):
        h_prev, c_prev = carry
        # [x_t ; h_{t-1}] : (in_dim+hid, TB), sublane concat at multiple-of-16 rows.
        xh = jnp.concatenate([x_ref[t], h_prev.astype(jnp.bfloat16)], axis=0)

        # Phase 1: push all sub-tile matmuls to the MXU (f32 accumulation).
        gates = [
            jnp.dot(w, xh[:, s * SUB:(s + 1) * SUB],
                    preferred_element_type=jnp.float32) + b
            for s in range(n_sub)
        ]
        # Phase 2: gate nonlinearities + state update per sub-tile (f32, VPU/EUP).
        hs, cs = [], []
        for s in range(n_sub):
            g = gates[s]
            i_g = jax.nn.sigmoid(g[0 * hid:1 * hid, :])   # sublane slices: free
            f_g = jax.nn.sigmoid(g[1 * hid:2 * hid, :])
            g_g = jnp.tanh(g[2 * hid:3 * hid, :])
            o_g = jax.nn.sigmoid(g[3 * hid:4 * hid, :])
            c = f_g * c_prev[:, s * SUB:(s + 1) * SUB] + i_g * g_g
            hs.append(o_g * jnp.tanh(c))
            cs.append(c)
        h_new = hs[0] if n_sub == 1 else jnp.concatenate(hs, axis=-1)
        c_new = cs[0] if n_sub == 1 else jnp.concatenate(cs, axis=-1)

        o_ref[t] = h_new                                    # lane-dense (hid, TB) store
        return (h_new, c_new)

    # Partial unroll: keeps LLO scheduler visibility without exploding live ranges.
    jax.lax.fori_loop(0, T, step, (h0, c0), unroll=min(T, 8))


def _pick_tile(P, T, in_dim, hid, budget_bytes=12 * 1024 * 1024):
    """Pick a lane-dense batch tile (multiple of 128, 128..256 wide), preferring
    >= 2 grid steps (v7x megacore) and a VMEM footprint that fits every chip's
    default scoped limit."""
    def fits(tb):
        x_blk = T * in_dim * tb * 2          # bf16 input block
        o_blk = T * hid * tb * 4             # f32 output block
        return 2 * (x_blk + o_blk) <= budget_bytes   # double-buffered pipeline

    for tb in (256, 128):
        if P % tb == 0 and P // tb >= 2 and fits(tb):
            return tb
    for tb in (256, 128):
        if P % tb == 0 and fits(tb):
            return tb
    cap = min(P, 256)
    for tb in range(cap - cap % 8, 7, -8):   # fallback: any multiple-of-8 divisor
        if P % tb == 0 and fits(tb):
            return tb
    return P  # full extent (always BlockSpec-legal); defeats pipelining/megacore


def _lstm_scan(xt, w_cat, bias):
    """Run one LSTM direction.
      xt    : (T, in_dim, P) bf16, time-major, pixels on lanes
      w_cat : (4*hid, in_dim+hid) bf16
      bias  : (4*hid, 1) f32
    Returns hidden states (T, hid, P) f32."""
    T, in_dim, P = xt.shape
    hid = w_cat.shape[0] // 4
    TB = _pick_tile(P, T, in_dim, hid)

    return pl.pallas_call(
        _lstm_kernel,
        out_shape=jax.ShapeDtypeStruct((T, hid, P), jnp.float32),
        grid=(P // TB,),
        in_specs=[
            pl.BlockSpec((T, in_dim, TB), lambda i: (0, 0, i)),
            pl.BlockSpec((4 * hid, in_dim + hid), lambda i: (0, 0)),  # VMEM-resident
            pl.BlockSpec((4 * hid, 1), lambda i: (0, 0)),             # VMEM-resident
        ],
        out_specs=pl.BlockSpec((T, hid, TB), lambda i: (0, 0, i)),
        compiler_params=pltpu.CompilerParams(dimension_semantics=("parallel",)),
    )(xt, w_cat, bias)


# ---------------------------------------------------------------------------
# Full LSTM_block forward.
#   x      : (B, T, n, H, W)
#   params : list of per-layer dicts with PyTorch-layout weights
#            {"w_ih": (4*hid, in), "w_hh": (4*hid, hid), "b_ih": (4*hid,), "b_hh": (4*hid,)}
#            plus "*_r" entries for the reverse direction when bidirectional.
# Returns (B, T, n, H, W), same as the PyTorch module.
# ---------------------------------------------------------------------------
def lstm_block_forward(x, params):
    B, T, n, H, W = x.shape
    P = B * H * W

    # (B,T,n,H,W) -> (T, n, B*H*W); sequence index = b*(H*W) + h*W + w, matching
    # PyTorch's flatten(-2,-1).permute(0,3,1,2).flatten(0,1) ordering.
    # TODO(synk): fuse this transpose into the input DMA via allow_input_fusion.
    h = jnp.transpose(x, (1, 2, 0, 3, 4)).reshape(T, n, P)

    for lp in params:
        w_cat = jnp.concatenate([lp["w_ih"], lp["w_hh"]], axis=1).astype(jnp.bfloat16)
        bias = (lp["b_ih"] + lp["b_hh"]).reshape(-1, 1).astype(jnp.float32)
        fwd = _lstm_scan(h.astype(jnp.bfloat16), w_cat, bias)
        if "w_ih_r" in lp:  # bidirectional: reverse direction = time flip + same kernel
            w_cat_r = jnp.concatenate([lp["w_ih_r"], lp["w_hh_r"]], axis=1).astype(jnp.bfloat16)
            bias_r = (lp["b_ih_r"] + lp["b_hh_r"]).reshape(-1, 1).astype(jnp.float32)
            bwd = _lstm_scan(jnp.flip(h, axis=0).astype(jnp.bfloat16), w_cat_r, bias_r)
            h = jnp.concatenate([fwd, jnp.flip(bwd, axis=0)], axis=1)
        else:
            h = fwd

    hid_total = h.shape[1]
    y = h.reshape(T, hid_total, B, H, W)
    return jnp.transpose(y, (2, 0, 1, 3, 4))      # -> (B, T, n, H, W)


# ---------------------------------------------------------------------------
# Pure-JAX f32 reference (mirrors PyTorch nn.LSTM) for validation.
# ---------------------------------------------------------------------------
def _lstm_reference(x, params):
    B, T, n, H, W = x.shape
    P = B * H * W
    h = jnp.transpose(x, (1, 0, 3, 4, 2)).reshape(T, P, n)   # (T, P, n)

    def run_dir(seq, w_ih, w_hh, b):
        hid = w_hh.shape[1]

        def step(carry, x_t):
            h_prev, c_prev = carry
            g = x_t @ w_ih.T + h_prev @ w_hh.T + b
            i = jax.nn.sigmoid(g[:, :hid])
            f = jax.nn.sigmoid(g[:, hid:2 * hid])
            gg = jnp.tanh(g[:, 2 * hid:3 * hid])
            o = jax.nn.sigmoid(g[:, 3 * hid:])
            c = f * c_prev + i * gg
            hh = o * jnp.tanh(c)
            return (hh, c), hh

        init = (jnp.zeros((seq.shape[1], hid), jnp.float32),
                jnp.zeros((seq.shape[1], hid), jnp.float32))
        _, out = jax.lax.scan(step, init, seq)
        return out

    for lp in params:
        b = lp["b_ih"] + lp["b_hh"]
        fwd = run_dir(h, lp["w_ih"], lp["w_hh"], b)
        if "w_ih_r" in lp:
            b_r = lp["b_ih_r"] + lp["b_hh_r"]
            bwd = run_dir(h[::-1], lp["w_ih_r"], lp["w_hh_r"], b_r)
            h = jnp.concatenate([fwd, bwd[::-1]], axis=-1)
        else:
            h = fwd
    y = h.reshape(T, B, H, W, -1)
    return jnp.transpose(y, (1, 0, 4, 2, 3))


def init_params(key, n, bidirectional=False, num_layers=1):
    """Synthetic parameters with PyTorch nn.LSTM shapes / init U(-1/sqrt(hid), 1/sqrt(hid))."""
    hid = n if not bidirectional else n // 2
    bound = 1.0 / math.sqrt(hid)
    keys = iter(jax.random.split(key, num_layers * 8))

    def u(shape):
        return jax.random.uniform(next(keys), shape, jnp.float32, -bound, bound)

    params = []
    for layer in range(num_layers):
        in_dim = n if layer == 0 else hid * (2 if bidirectional else 1)
        lp = {"w_ih": u((4 * hid, in_dim)), "w_hh": u((4 * hid, hid)),
              "b_ih": u((4 * hid,)), "b_hh": u((4 * hid,))}
        if bidirectional:
            lp.update({"w_ih_r": u((4 * hid, in_dim)), "w_hh_r": u((4 * hid, hid)),
                       "b_ih_r": u((4 * hid,)), "b_hh_r": u((4 * hid,))})
        params.append(lp)
    return params


if __name__ == "__main__":
    # (B, T, n, H, W): the LSTM sees B*H*W = 512 sequences of length T=8, feature n=32.
    # P=512 gives TB=256 and a 2-step grid (both v7x TensorCores busy).
    B, T, n, H, W = 2, 8, 32, 16, 16

    key = jax.random.PRNGKey(0)
    kx, kp = jax.random.split(key)
    x = jax.random.normal(kx, (B, T, n, H, W), jnp.float32)
    params = init_params(kp, n)  # default module config: unidirectional, num_layers=1

    out = jax.jit(lstm_block_forward)(x, params)
    out = jax.block_until_ready(out)
    assert out.shape == (B, T, n, H, W), out.shape
    assert bool(jnp.all(jnp.isfinite(out)))

    # Validate against a pure-f32 JAX reference (kernel uses bf16 matmul operands,
    # f32 accumulation/elementwise, so allow a small tolerance).
    ref = jax.block_until_ready(jax.jit(_lstm_reference)(x, params))
    err = float(jnp.max(jnp.abs(out - ref)))
    assert err < 1e-1, f"max abs error vs f32 reference: {err}"
    print("KERNEL_OK")
</pallas_src>

<mosaic_0001>
module attributes {stable_mosaic.version = 11 : i64} {
  func.func @_lstm_kernel(%arg0: i32, %arg1: memref<8x32x256xbf16, #tpu.memory_space<vmem>>, %arg2: memref<128x64xbf16, #tpu.memory_space<vmem>>, %arg3: memref<128x1xf32, #tpu.memory_space<vmem>>, %arg4: memref<8x32x256xf32, #tpu.memory_space<vmem>>) attributes {dimension_semantics = [#tpu.dimension_semantics<parallel>], iteration_bounds = array<i64: 2>, scalar_prefetch = 0 : i64, scratch_operands = 0 : i64, tpu.core_type = #tpu.core_type<tc>, window_params = [{transform_indices = @transform_0, window_bounds = array<i64: 8, 32, 256>}, {pipeline_mode = #tpu.pipeline_mode<synchronous>, transform_indices = @transform_1, window_bounds = array<i64: 128, 64>}, {pipeline_mode = #tpu.pipeline_mode<synchronous>, transform_indices = @transform_2, window_bounds = array<i64: 128, 1>}, {transform_indices = @transform_3, window_bounds = array<i64: 8, 32, 256>}]} {
    %c0 = arith.constant 0 : index
    %c0_0 = arith.constant 0 : index
    %0 = vector.load %arg2[%c0, %c0_0] : memref<128x64xbf16, #tpu.memory_space<vmem>>, vector<128x64xbf16>
    %c0_1 = arith.constant 0 : index
    %c0_2 = arith.constant 0 : index
    %1 = vector.load %arg3[%c0_1, %c0_2] : memref<128x1xf32, #tpu.memory_space<vmem>>, vector<128x1xf32>
    %2 = vector.shape_cast %1 : vector<128x1xf32> to vector<128x1xf32>
    %3 = vector.broadcast %2 : vector<128x1xf32> to vector<128x128xf32>
    %cst = arith.constant 0.000000e+00 : f32
    %4 = vector.broadcast %cst : f32 to vector<32x256xf32>
    %cst_3 = arith.constant 0.000000e+00 : f32
    %5 = vector.broadcast %cst_3 : f32 to vector<32x256xf32>
    %c0_i32 = arith.constant 0 : i32
    %6 = arith.index_cast %c0_i32 : i32 to index
    %c0_4 = arith.constant 0 : index
    %c0_5 = arith.constant 0 : index
    %7 = vector.load %arg1[%6, %c0_4, %c0_5] : memref<8x32x256xbf16, #tpu.memory_space<vmem>>, vector<1x32x256xbf16>
    %8 = vector.shape_cast %7 : vector<1x32x256xbf16> to vector<32x256xbf16>
    %9 = arith.truncf %4 : vector<32x256xf32> to vector<32x256xbf16>
    %10 = tpu.concatenate %8, %9 in 0 : vector<32x256xbf16>, vector<32x256xbf16> -> vector<64x256xbf16>
    %11 = vector.extract_strided_slice %10 {offsets = [0, 0], sizes = [64, 128], strides = [1, 1]} : vector<64x256xbf16> to vector<64x128xbf16>
    %cst_6 = arith.constant dense<0.000000e+00> : vector<128x128xf32>
    %12 = tpu.matmul %0, %11, %cst_6 {dimension_numbers = #tpu.dot_dimension_numbers<[1], [0], [0], [1], [0, 0, 1, 1], [], []>} : vector<128x64xbf16>, vector<64x128xbf16>, vector<128x128xf32> -> vector<128x128xf32>
    %13 = arith.addf %12, %3 : vector<128x128xf32>
    %14 = vector.extract_strided_slice %10 {offsets = [0, 128], sizes = [64, 128], strides = [1, 1]} : vector<64x256xbf16> to vector<64x128xbf16>
    %cst_7 = arith.constant dense<0.000000e+00> : vector<128x128xf32>
    %15 = tpu.matmul %0, %14, %cst_7 {dimension_numbers = #tpu.dot_dimension_numbers<[1], [0], [0], [1], [0, 0, 1, 1], [], []>} : vector<128x64xbf16>, vector<64x128xbf16>, vector<128x128xf32> -> vector<128x128xf32>
    %16 = arith.addf %15, %3 : vector<128x128xf32>
    %17 = vector.extract_strided_slice %13 {offsets = [0, 0], sizes = [32, 128], strides = [1, 1]} : vector<128x128xf32> to vector<32x128xf32>
    %18 = arith.negf %17 : vector<32x128xf32>
    %19 = math.exp %18 : vector<32x128xf32>
    %cst_8 = arith.constant 1.000000e+00 : f32
    %20 = vector.broadcast %cst_8 : f32 to vector<32x128xf32>
    %21 = arith.addf %20, %19 : vector<32x128xf32>
    %22 = arith.divf %20, %21 : vector<32x128xf32>
    %23 = vector.extract_strided_slice %13 {offsets = [32, 0], sizes = [32, 128], strides = [1, 1]} : vector<128x128xf32> to vector<32x128xf32>
    %24 = arith.negf %23 : vector<32x128xf32>
    %25 = math.exp %24 : vector<32x128xf32>
    %cst_9 = arith.constant 1.000000e+00 : f32
    %26 = vector.broadcast %cst_9 : f32 to vector<32x128xf32>
    %27 = arith.addf %26, %25 : vector<32x128xf32>
    %28 = arith.divf %26, %27 : vector<32x128xf32>
    %29 = vector.extract_strided_slice %13 {offsets = [64, 0], sizes = [32, 128], strides = [1, 1]} : vector<128x128xf32> to vector<32x128xf32>
    %30 = math.tanh %29 : vector<32x128xf32>
    %31 = vector.extract_strided_slice %13 {offsets = [96, 0], sizes = [32, 128], strides = [1, 1]} : vector<128x128xf32> to vector<32x128xf32>
    %32 = arith.negf %31 : vector<32x128xf32>
    %33 = math.exp %32 : vector<32x128xf32>
    %cst_10 = arith.constant 1.000000e+00 : f32
    %34 = vector.broadcast %cst_10 : f32 to vector<32x128xf32>
    %35 = arith.addf %34, %33 : vector<32x128xf32>
    %36 = arith.divf %34, %35 : vector<32x128xf32>
    %37 = vector.extract_strided_slice %5 {offsets = [0, 0], sizes = [32, 128], strides = [1, 1]} : vector<32x256xf32> to vector<32x128xf32>
    %38 = arith.mulf %28, %37 : vector<32x128xf32>
    %39 = arith.mulf %22, %30 : vector<32x128xf32>
    %40 = arith.addf %38, %39 : vector<32x128xf32>
    %41 = math.tanh %40 : vector<32x128xf32>
    %42 = arith.mulf %36, %41 : vector<32x128xf32>
    %43 = vector.extract_strided_slice %16 {offsets = [0, 0], sizes = [32, 128], strides = [1, 1]} : vector<128x128xf32> to vector<32x128xf32>
    %44 = arith.negf %43 : vector<32x128xf32>
    %45 = math.exp %44 : vector<32x128xf32>
    %cst_11 = arith.constant 1.000000e+00 : f32
    %46 = vector.broadcast %cst_11 : f32 to vector<32x128xf32>
    %47 = arith.addf %46, %45 : vector<32x128xf32>
    %48 = arith.divf %46, %47 : vector<32x128xf32>
    %49 = vector.extract_strided_slice %16 {offsets = [32, 0], sizes = [32, 128], strides = [1, 1]} : vector<128x128xf32> to vector<32x128xf32>
    %50 = arith.negf %49 : vector<32x128xf32>
    %51 = math.exp %50 : vector<32x128xf32>
    %cst_12 = arith.constant 1.000000e+00 : f32
    %52 = vector.broadcast %cst_12 : f32 to vector<32x128xf32>
    %53 = arith.addf %52, %51 : vector<32x128xf32>
    %54 = arith.divf %52, %53 : vector<32x128xf32>
    %55 = vector.extract_strided_slice %16 {offsets = [64, 0], sizes = [32, 128], strides = [1, 1]} : vector<128x128xf32> to vector<32x128xf32>
    %56 = math.tanh %55 : vector<32x128xf32>
    %57 = vector.extract_strided_slice %16 {offsets = [96, 0], sizes = [32, 128], strides = [1, 1]} : vector<128x128xf32> to vector<32x128xf32>
    %58 = arith.negf %57 : vector<32x128xf32>
    %59 = math.exp %58 : vector<32x128xf32>
    %cst_13 = arith.constant 1.000000e+00 : f32
    %60 = vector.broadcast %cst_13 : f32 to vector<32x128xf32>
    %61 = arith.addf %60, %59 : vector<32x128xf32>
    %62 = arith.divf %60, %61 : vector<32x128xf32>
    %63 = vector.extract_strided_slice %5 {offsets = [0, 128], sizes = [32, 128], strides = [1, 1]} : vector<32x256xf32> to vector<32x128xf32>
    %64 = arith.mulf %54, %63 : vector<32x128xf32>
    %65 = arith.mulf %48, %56 : vector<32x128xf32>
    %66 = arith.addf %64, %65 : vector<32x128xf32>
    %67 = math.tanh %66 : vector<32x128xf32>
    %68 = arith.mulf %62, %67 : vector<32x128xf32>
    %69 = tpu.concatenate %42, %68 in 1 : vector<32x128xf32>, vector<32x128xf32> -> vector<32x256xf32>
    %70 = tpu.concatenate %40, %66 in 1 : vector<32x128xf32>, vector<32x128xf32> -> vector<32x256xf32>
    %71 = arith.index_cast %c0_i32 : i32 to index
    %c0_14 = arith.constant 0 : index
    %c0_15 = arith.constant 0 : index
    %72 = vector.load %arg4[%71, %c0_14, %c0_15] : memref<8x32x256xf32, #tpu.memory_space<vmem>>, vector<1x32x256xf32>
    %73 = vector.shape_cast %72 : vector<1x32x256xf32> to vector<32x256xf32>
    %74 = vector.shape_cast %69 : vector<32x256xf32> to vector<1x32x256xf32>
    tpu.vector_store %arg4[%71, %c0_14, %c0_15], %74 {strides = array<i32>} : memref<8x32x256xf32, #tpu.memory_space<vmem>>, vector<1x32x256xf32>,
    %c1_i32 = arith.constant 1 : i32
    %75 = arith.index_cast %c1_i32 : i32 to index
    %c0_16 = arith.constant 0 : index
    %c0_17 = arith.constant 0 : index
    %76 = vector.load %arg1[%75, %c0_16, %c0_17] : memref<8x32x256xbf16, #tpu.memory_space<vmem>>, vector<1x32x256xbf16>
    %77 = vector.shape_cast %76 : vector<1x32x256xbf16> to vector<32x256xbf16>
    %78 = arith.truncf %69 : vector<32x256xf32> to vector<32x256xbf16>
    %79 = tpu.concatenate %77, %78 in 0 : vector<32x256xbf16>, vector<32x256xbf16> -> vector<64x256xbf16>
    %80 = vector.extract_strided_slice %79 {offsets = [0, 0], sizes = [64, 128], strides = [1, 1]} : vector<64x256xbf16> to vector<64x128xbf16>
    %cst_18 = arith.constant dense<0.000000e+00> : vector<128x128xf32>
    %81 = tpu.matmul %0, %80, %cst_18 {dimension_numbers = #tpu.dot_dimension_numbers<[1], [0], [0], [1], [0, 0, 1, 1], [], []>} : vector<128x64xbf16>, vector<64x128xbf16>, vector<128x128xf32> -> vector<128x128xf32>
    %82 = arith.addf %81, %3 : vector<128x128xf32>
    %83 = vector.extract_strided_slice %79 {offsets = [0, 128], sizes = [64, 128], strides = [1, 1]} : vector<64x256xbf16> to vector<64x128xbf16>
    %cst_19 = arith.constant dense<0.000000e+00> : vector<128x128xf32>
    %84 = tpu.matmul %0, %83, %cst_19 {dimension_numbers = #tpu.dot_dimension_numbers<[1], [0], [0], [1], [0, 0, 1, 1], [], []>} : vector<128x64xbf16>, vector<64x128xbf16>, vector<128x128xf32> -> vector<128x128xf32>
    %85 = arith.addf %84, %3 : vector<128x128xf32>
    %86 = vector.extract_strided_slice %82 {offsets = [0, 0], sizes = [32, 128], strides = [1, 1]} : vector<128x128xf32> to vector<32x128xf32>
    %87 = arith.negf %86 : vector<32x128xf32>
    %88 = math.exp %87 : vector<32x128xf32>
    %cst_20 = arith.constant 1.000000e+00 : f32
    %89 = vector.broadcast %cst_20 : f32 to vector<32x128xf32>
    %90 = arith.addf %89, %88 : vector<32x128xf32>
    %91 = arith.divf %89, %90 : vector<32x128xf32>
    %92 = vector.extract_strided_slice %82 {offsets = [32, 0], sizes = [32, 128], strides = [1, 1]} : vector<128x128xf32> to vector<32x128xf32>
    %93 = arith.negf %92 : vector<32x128xf32>
    %94 = math.exp %93 : vector<32x128xf32>
    %cst_21 = arith.constant 1.000000e+00 : f32
    %95 = vector.broadcast %cst_21 : f32 to vector<32x128xf32>
    %96 = arith.addf %95, %94 : vector<32x128xf32>
    %97 = arith.divf %95, %96 : vector<32x128xf32>
    %98 = vector.extract_strided_slice %82 {offsets = [64, 0], sizes = [32, 128], strides = [1, 1]} : vector<128x128xf32> to vector<32x128xf32>
    %99 = math.tanh %98 : vector<32x128xf32>
    %100 = vector.extract_strided_slice %82 {offsets = [96, 0], sizes = [32, 128], strides = [1, 1]} : vector<128x128xf32> to vector<32x128xf32>
    %101 = arith.negf %100 : vector<32x128xf32>
    %102 = math.exp %101 : vector<32x128xf32>
    %cst_22 = arith.constant 1.000000e+00 : f32
    %103 = vector.broadcast %cst_22 : f32 to vector<32x128xf32>
    %104 = arith.addf %103, %102 : vector<32x128xf32>
    %105 = arith.divf %103, %104 : vector<32x128xf32>
    %106 = vector.extract_strided_slice %70 {offsets = [0, 0], sizes = [32, 128], strides = [1, 1]} : vector<32x256xf32> to vector<32x128xf32>
    %107 = arith.mulf %97, %106 : vector<32x128xf32>
    %108 = arith.mulf %91, %99 : vector<32x128xf32>
    %109 = arith.addf %107, %108 : vector<32x128xf32>
    %110 = math.tanh %109 : vector<32x128xf32>
    %111 = arith.mulf %105, %110 : vector<32x128xf32>
    %112 = vector.extract_strided_slice %85 {offsets = [0, 0], sizes = [32, 128], strides = [1, 1]} : vector<128x128xf32> to vector<32x128xf32>
    %113 = arith.negf %112 : vector<32x128xf32>
    %114 = math.exp %113 : vector<32x128xf32>
    %cst_23 = arith.constant 1.000000e+00 : f32
    %115 = vector.broadcast %cst_23 : f32 to vector<32x128xf32>
    %116 = arith.addf %115, %114 : vector<32x128xf32>
    %117 = arith.divf %115, %116 : vector<32x128xf32>
    %118 = vector.extract_strided_slice %85 {offsets = [32, 0], sizes = [32, 128], strides = [1, 1]} : vector<128x128xf32> to vector<32x128xf32>
    %119 = arith.negf %118 : vector<32x128xf32>
    %120 = math.exp %119 : vector<32x128xf32>
    %cst_24 = arith.constant 1.000000e+00 : f32
    %121 = vector.broadcast %cst_24 : f32 to vector<32x128xf32>
    %122 = arith.addf %121, %120 : vector<32x128xf32>
    %123 = arith.divf %121, %122 : vector<32x128xf32>
    %124 = vector.extract_strided_slice %85 {offsets = [64, 0], sizes = [32, 128], strides = [1, 1]} : vector<128x128xf32> to vector<32x128xf32>
    %125 = math.tanh %124 : vector<32x128xf32>
    %126 = vector.extract_strided_slice %85 {offsets = [96, 0], sizes = [32, 128], strides = [1, 1]} : vector<128x128xf32> to vector<32x128xf32>
    %127 = arith.negf %126 : vector<32x128xf32>
    %128 = math.exp %127 : vector<32x128xf32>
    %cst_25 = arith.constant 1.000000e+00 : f32
    %129 = vector.broadcast %cst_25 : f32 to vector<32x128xf32>
    %130 = arith.addf %129, %128 : vector<32x128xf32>
    %131 = arith.divf %129, %130 : vector<32x128xf32>
    %132 = vector.extract_strided_slice %70 {offsets = [0, 128], sizes = [32, 128], strides = [1, 1]} : vector<32x256xf32> to vector<32x128xf32>
    %133 = arith.mulf %123, %132 : vector<32x128xf32>
    %134 = arith.mulf %117, %125 : vector<32x128xf32>
    %135 = arith.addf %133, %134 : vector<32x128xf32>
    %136 = math.tanh %135 : vector<32x128xf32>
    %137 = arith.mulf %131, %136 : vector<32x128xf32>
    %138 = tpu.concatenate %111, %137 in 1 : vector<32x128xf32>, vector<32x128xf32> -> vector<32x256xf32>
    %139 = tpu.concatenate %109, %135 in 1 : vector<32x128xf32>, vector<32x128xf32> -> vector<32x256xf32>
    %140 = arith.index_cast %c1_i32 : i32 to index
    %c0_26 = arith.constant 0 : index
    %c0_27 = arith.constant 0 : index
    %141 = vector.load %arg4[%140, %c0_26, %c0_27] : memref<8x32x256xf32, #tpu.memory_space<vmem>>, vector<1x32x256xf32>
    %142 = vector.shape_cast %141 : vector<1x32x256xf32> to vector<32x256xf32>
    %143 = vector.shape_cast %138 : vector<32x256xf32> to vector<1x32x256xf32>
    tpu.vector_store %arg4[%140, %c0_26, %c0_27], %143 {strides = array<i32>} : memref<8x32x256xf32, #tpu.memory_space<vmem>>, vector<1x32x256xf32>,
    %c2_i32 = arith.constant 2 : i32
    %144 = arith.index_cast %c2_i32 : i32 to index
    %c0_28 = arith.constant 0 : index
    %c0_29 = arith.constant 0 : index
    %145 = vector.load %arg1[%144, %c0_28, %c0_29] : memref<8x32x256xbf16, #tpu.memory_space<vmem>>, vector<1x32x256xbf16>
    %146 = vector.shape_cast %145 : vector<1x32x256xbf16> to vector<32x256xbf16>
    %147 = arith.truncf %138 : vector<32x256xf32> to vector<32x256xbf16>
    %148 = tpu.concatenate %146, %147 in 0 : vector<32x256xbf16>, vector<32x256xbf16> -> vector<64x256xbf16>
    %149 = vector.extract_strided_slice %148 {offsets = [0, 0], sizes = [64, 128], strides = [1, 1]} : vector<64x256xbf16> to vector<64x128xbf16>
    %cst_30 = arith.constant dense<0.000000e+00> : vector<128x128xf32>
    %150 = tpu.matmul %0, %149, %cst_30 {dimension_numbers = #tpu.dot_dimension_numbers<[1], [0], [0], [1], [0, 0, 1, 1], [], []>} : vector<128x64xbf16>, vector<64x128xbf16>, vector<128x128xf32> -> vector<128x128xf32>
    %151 = arith.addf %150, %3 : vector<128x128xf32>
    %152 = vector.extract_strided_slice %148 {offsets = [0, 128], sizes = [64, 128], strides = [1, 1]} : vector<64x256xbf16> to vector<64x128xbf16>
    %cst_31 = arith.constant dense<0.000000e+00> : vector<128x128xf32>
    %153 = tpu.matmul %0, %152, %cst_31 {dimension_numbers = #tpu.dot_dimension_numbers<[1], [0], [0], [1], [0, 0, 1, 1], [], []>} : vector<128x64xbf16>, vector<64x128xbf16>, vector<128x128xf32> -> vector<128x128xf32>
    %154 = arith.addf %153, %3 : vector<128x128xf32>
    %155 = vector.extract_strided_slice %151 {offsets = [0, 0], sizes = [32, 128], strides = [1, 1]} : vector<128x128xf32> to vector<32x128xf32>
    %156 = arith.negf %155 : vector<32x128xf32>
    %157 = math.exp %156 : vector<32x128xf32>
    %cst_32 = arith.constant 1.000000e+00 : f32
    %158 = vector.broadcast %cst_32 : f32 to vector<32x128xf32>
    %159 = arith.addf %158, %157 : vector<32x128xf32>
    %160 = arith.divf %158, %159 : vector<32x128xf32>
    %161 = vector.extract_strided_slice %151 {offsets = [32, 0], sizes = [32, 128], strides = [1, 1]} : vector<128x128xf32> to vector<32x128xf32>
    %162 = arith.negf %161 : vector<32x128xf32>
    %163 = math.exp %162 : vector<32x128xf32>
    %cst_33 = arith.constant 1.000000e+00 : f32
    %164 = vector.broadcast %cst_33 : f32 to vector<32x128xf32>
    %165 = arith.addf %164, %163 : vector<32x128xf32>
    %166 = arith.divf %164, %165 : vector<32x128xf32>
    %167 = vector.extract_strided_slice %151 {offsets = [64, 0], sizes = [32, 128], strides = [1, 1]} : vector<128x128xf32> to vector<32x128xf32>
    %168 = math.tanh %167 : vector<32x128xf32>
    %169 = vector.extract_strided_slice %151 {offsets = [96, 0], sizes = [32, 128], strides = [1, 1]} : vector<128x128xf32> to vector<32x128xf32>
    %170 = arith.negf %169 : vector<32x128xf32>
    %171 = math.exp %170 : vector<32x128xf32>
    %cst_34 = arith.constant 1.000000e+00 : f32
    %172 = vector.broadcast %cst_34 : f32 to vector<32x128xf32>
    %173 = arith.addf %172, %171 : vector<32x128xf32>
    %174 = arith.divf %172, %173 : vector<32x128xf32>
    %175 = vector.extract_strided_slice %139 {offsets = [0, 0], sizes = [32, 128], strides = [1, 1]} : vector<32x256xf32> to vector<32x128xf32>
    %176 = arith.mulf %166, %175 : vector<32x128xf32>
    %177 = arith.mulf %160, %168 : vector<32x128xf32>
    %178 = arith.addf %176, %177 : vector<32x128xf32>
    %179 = math.tanh %178 : vector<32x128xf32>
    %180 = arith.mulf %174, %179 : vector<32x128xf32>
    %181 = vector.extract_strided_slice %154 {offsets = [0, 0], sizes = [32, 128], strides = [1, 1]} : vector<128x128xf32> to vector<32x128xf32>
    %182 = arith.negf %181 : vector<32x128xf32>
    %183 = math.exp %182 : vector<32x128xf32>
    %cst_35 = arith.constant 1.000000e+00 : f32
    %184 = vector.broadcast %cst_35 : f32 to vector<32x128xf32>
    %185 = arith.addf %184, %183 : vector<32x128xf32>
    %186 = arith.divf %184, %185 : vector<32x128xf32>
    %187 = vector.extract_strided_slice %154 {offsets = [32, 0], sizes = [32, 128], strides = [1, 1]} : vector<128x128xf32> to vector<32x128xf32>
    %188 = arith.negf %187 : vector<32x128xf32>
    %189 = math.exp %188 : vector<32x128xf32>
    %cst_36 = arith.constant 1.000000e+00 : f32
    %190 = vector.broadcast %cst_36 : f32 to vector<32x128xf32>
    %191 = arith.addf %190, %189 : vector<32x128xf32>
    %192 = arith.divf %190, %191 : vector<32x128xf32>
    %193 = vector.extract_strided_slice %154 {offsets = [64, 0], sizes = [32, 128], strides = [1, 1]} : vector<128x128xf32> to vector<32x128xf32>
    %194 = math.tanh %193 : vector<32x128xf32>
    %195 = vector.extract_strided_slice %154 {offsets = [96, 0], sizes = [32, 128], strides = [1, 1]} : vector<128x128xf32> to vector<32x128xf32>
    %196 = arith.negf %195 : vector<32x128xf32>
    %197 = math.exp %196 : vector<32x128xf32>
    %cst_37 = arith.constant 1.000000e+00 : f32
    %198 = vector.broadcast %cst_37 : f32 to vector<32x128xf32>
    %199 = arith.addf %198, %197 : vector<32x128xf32>
    %200 = arith.divf %198, %199 : vector<32x128xf32>
    %201 = vector.extract_strided_slice %139 {offsets = [0, 128], sizes = [32, 128], strides = [1, 1]} : vector<32x256xf32> to vector<32x128xf32>
    %202 = arith.mulf %192, %201 : vector<32x128xf32>
    %203 = arith.mulf %186, %194 : vector<32x128xf32>
    %204 = arith.addf %202, %203 : vector<32x128xf32>
    %205 = math.tanh %204 : vector<32x128xf32>
    %206 = arith.mulf %200, %205 : vector<32x128xf32>
    %207 = tpu.concatenate %180, %206 in 1 : vector<32x128xf32>, vector<32x128xf32> -> vector<32x256xf32>
    %208 = tpu.concatenate %178, %204 in 1 : vector<32x128xf32>, vector<32x128xf32> -> vector<32x256xf32>
    %209 = arith.index_cast %c2_i32 : i32 to index
    %c0_38 = arith.constant 0 : index
    %c0_39 = arith.constant 0 : index
    %210 = vector.load %arg4[%209, %c0_38, %c0_39] : memref<8x32x256xf32, #tpu.memory_space<vmem>>, vector<1x32x256xf32>
    %211 = vector.shape_cast %210 : vector<1x32x256xf32> to vector<32x256xf32>
    %212 = vector.shape_cast %207 : vector<32x256xf32> to vector<1x32x256xf32>
    tpu.vector_store %arg4[%209, %c0_38, %c0_39], %212 {strides = array<i32>} : memref<8x32x256xf32, #tpu.memory_space<vmem>>, vector<1x32x256xf32>,
    %c3_i32 = arith.constant 3 : i32
    %213 = arith.index_cast %c3_i32 : i32 to index
    %c0_40 = arith.constant 0 : index
    %c0_41 = arith.constant 0 : index
    %214 = vector.load %arg1[%213, %c0_40, %c0_41] : memref<8x32x256xbf16, #tpu.memory_space<vmem>>, vector<1x32x256xbf16>
    %215 = vector.shape_cast %214 : vector<1x32x256xbf16> to vector<32x256xbf16>
    %216 = arith.truncf %207 : vector<32x256xf32> to vector<32x256xbf16>
    %217 = tpu.concatenate %215, %216 in 0 : vector<32x256xbf16>, vector<32x256xbf16> -> vector<64x256xbf16>
    %218 = vector.extract_strided_slice %217 {offsets = [0, 0], sizes = [64, 128], strides = [1, 1]} : vector<64x256xbf16> to vector<64x128xbf16>
    %cst_42 = arith.constant dense<0.000000e+00> : vector<128x128xf32>
    %219 = tpu.matmul %0, %218, %cst_42 {dimension_numbers = #tpu.dot_dimension_numbers<[1], [0], [0], [1], [0, 0, 1, 1], [], []>} : vector<128x64xbf16>, vector<64x128xbf16>, vector<128x128xf32> -> vector<128x128xf32>
    %220 = arith.addf %219, %3 : vector<128x128xf32>
    %221 = vector.extract_strided_slice %217 {offsets = [0, 128], sizes = [64, 128], strides = [1, 1]} : vector<64x256xbf16> to vector<64x128xbf16>
    %cst_43 = arith.constant dense<0.000000e+00> : vector<128x128xf32>
    %222 = tpu.matmul %0, %221, %cst_43 {dimension_numbers = #tpu.dot_dimension_numbers<[1], [0], [0], [1], [0, 0, 1, 1], [], []>} : vector<128x64xbf16>, vector<64x128xbf16>, vector<128x128xf32> -> vector<128x128xf32>
    %223 = arith.addf %222, %3 : vector<128x128xf32>
    %224 = vector.extract_strided_slice %220 {offsets = [0, 0], sizes = [32, 128], strides = [1, 1]} : vector<128x128xf32> to vector<32x128xf32>
    %225 = arith.negf %224 : vector<32x128xf32>
    %226 = math.exp %225 : vector<32x128xf32>
    %cst_44 = arith.constant 1.000000e+00 : f32
    %227 = vector.broadcast %cst_44 : f32 to vector<32x128xf32>
    %228 = arith.addf %227, %226 : vector<32x128xf32>
    %229 = arith.divf %227, %228 : vector<32x128xf32>
    %230 = vector.extract_strided_slice %220 {offsets = [32, 0], sizes = [32, 128], strides = [1, 1]} : vector<128x128xf32> to vector<32x128xf32>
    %231 = arith.negf %230 : vector<32x128xf32>
    %232 = math.exp %231 : vector<32x128xf32>
    %cst_45 = arith.constant 1.000000e+00 : f32
    %233 = vector.broadcast %cst_45 : f32 to vector<32x128xf32>
    %234 = arith.addf %233, %232 : vector<32x128xf32>
    %235 = arith.divf %233, %234 : vector<32x128xf32>
    %236 = vector.extract_strided_slice %220 {offsets = [64, 0], sizes = [32, 128], strides = [1, 1]} : vector<128x128xf32> to vector<32x128xf32>
    %237 = math.tanh %236 : vector<32x128xf32>
    %238 = vector.extract_strided_slice %220 {offsets = [96, 0], sizes = [32, 128], strides = [1, 1]} : vector<128x128xf32> to vector<32x128xf32>
    %239 = arith.negf %238 : vector<32x128xf32>
    %240 = math.exp %239 : vector<32x128xf32>
    %cst_46 = arith.constant 1.000000e+00 : f32
    %241 = vector.broadcast %cst_46 : f32 to vector<32x128xf32>
    %242 = arith.addf %241, %240 : vector<32x128xf32>
    %243 = arith.divf %241, %242 : vector<32x128xf32>
    %244 = vector.extract_strided_slice %208 {offsets = [0, 0], sizes = [32, 128], strides = [1, 1]} : vector<32x256xf32> to vector<32x128xf32>
    %245 = arith.mulf %235, %244 : vector<32x128xf32>
    %246 = arith.mulf %229, %237 : vector<32x128xf32>
    %247 = arith.addf %245, %246 : vector<32x128xf32>
    %248 = math.tanh %247 : vector<32x128xf32>
    %249 = arith.mulf %243, %248 : vector<32x128xf32>
    %250 = vector.extract_strided_slice %223 {offsets = [0, 0], sizes = [32, 128], strides = [1, 1]} : vector<128x128xf32> to vector<32x128xf32>
    %251 = arith.negf %250 : vector<32x128xf32>
    %252 = math.exp %251 : vector<32x128xf32>
    %cst_47 = arith.constant 1.000000e+00 : f32
    %253 = vector.broadcast %cst_47 : f32 to vector<32x128xf32>
    %254 = arith.addf %253, %252 : vector<32x128xf32>
    %255 = arith.divf %253, %254 : vector<32x128xf32>
    %256 = vector.extract_strided_slice %223 {offsets = [32, 0], sizes = [32, 128], strides = [1, 1]} : vector<128x128xf32> to vector<32x128xf32>
    %257 = arith.negf %256 : vector<32x128xf32>
    %258 = math.exp %257 : vector<32x128xf32>
    %cst_48 = arith.constant 1.000000e+00 : f32
    %259 = vector.broadcast %cst_48 : f32 to vector<32x128xf32>
    %260 = arith.addf %259, %258 : vector<32x128xf32>
    %261 = arith.divf %259, %260 : vector<32x128xf32>
    %262 = vector.extract_strided_slice %223 {offsets = [64, 0], sizes = [32, 128], strides = [1, 1]} : vector<128x128xf32> to vector<32x128xf32>
    %263 = math.tanh %262 : vector<32x128xf32>
    %264 = vector.extract_strided_slice %223 {offsets = [96, 0], sizes = [32, 128], strides = [1, 1]} : vector<128x128xf32> to vector<32x128xf32>
    %265 = arith.negf %264 : vector<32x128xf32>
    %266 = math.exp %265 : vector<32x128xf32>
    %cst_49 = arith.constant 1.000000e+00 : f32
    %267 = vector.broadcast %cst_49 : f32 to vector<32x128xf32>
    %268 = arith.addf %267, %266 : vector<32x128xf32>
    %269 = arith.divf %267, %268 : vector<32x128xf32>
    %270 = vector.extract_strided_slice %208 {offsets = [0, 128], sizes = [32, 128], strides = [1, 1]} : vector<32x256xf32> to vector<32x128xf32>
    %271 = arith.mulf %261, %270 : vector<32x128xf32>
    %272 = arith.mulf %255, %263 : vector<32x128xf32>
    %273 = arith.addf %271, %272 : vector<32x128xf32>
    %274 = math.tanh %273 : vector<32x128xf32>
    %275 = arith.mulf %269, %274 : vector<32x128xf32>
    %276 = tpu.concatenate %249, %275 in 1 : vector<32x128xf32>, vector<32x128xf32> -> vector<32x256xf32>
    %277 = tpu.concatenate %247, %273 in 1 : vector<32x128xf32>, vector<32x128xf32> -> vector<32x256xf32>
    %278 = arith.index_cast %c3_i32 : i32 to index
    %c0_50 = arith.constant 0 : index
    %c0_51 = arith.constant 0 : index
    %279 = vector.load %arg4[%278, %c0_50, %c0_51] : memref<8x32x256xf32, #tpu.memory_space<vmem>>, vector<1x32x256xf32>
    %280 = vector.shape_cast %279 : vector<1x32x256xf32> to vector<32x256xf32>
    %281 = vector.shape_cast %276 : vector<32x256xf32> to vector<1x32x256xf32>
    tpu.vector_store %arg4[%278, %c0_50, %c0_51], %281 {strides = array<i32>} : memref<8x32x256xf32, #tpu.memory_space<vmem>>, vector<1x32x256xf32>,
    %c4_i32 = arith.constant 4 : i32
    %282 = arith.index_cast %c4_i32 : i32 to index
    %c0_52 = arith.constant 0 : index
    %c0_53 = arith.constant 0 : index
    %283 = vector.load %arg1[%282, %c0_52, %c0_53] : memref<8x32x256xbf16, #tpu.memory_space<vmem>>, vector<1x32x256xbf16>
    %284 = vector.shape_cast %283 : vector<1x32x256xbf16> to vector<32x256xbf16>
    %285 = arith.truncf %276 : vector<32x256xf32> to vector<32x256xbf16>
    %286 = tpu.concatenate %284, %285 in 0 : vector<32x256xbf16>, vector<32x256xbf16> -> vector<64x256xbf16>
    %287 = vector.extract_strided_slice %286 {offsets = [0, 0], sizes = [64, 128], strides = [1, 1]} : vector<64x256xbf16> to vector<64x128xbf16>
    %cst_54 = arith.constant dense<0.000000e+00> : vector<128x128xf32>
    %288 = tpu.matmul %0, %287, %cst_54 {dimension_numbers = #tpu.dot_dimension_numbers<[1], [0], [0], [1], [0, 0, 1, 1], [], []>} : vector<128x64xbf16>, vector<64x128xbf16>, vector<128x128xf32> -> vector<128x128xf32>
    %289 = arith.addf %288, %3 : vector<128x128xf32>
    %290 = vector.extract_strided_slice %286 {offsets = [0, 128], sizes = [64, 128], strides = [1, 1]} : vector<64x256xbf16> to vector<64x128xbf16>
    %cst_55 = arith.constant dense<0.000000e+00> : vector<128x128xf32>
    %291 = tpu.matmul %0, %290, %cst_55 {dimension_numbers = #tpu.dot_dimension_numbers<[1], [0], [0], [1], [0, 0, 1, 1], [], []>} : vector<128x64xbf16>, vector<64x128xbf16>, vector<128x128xf32> -> vector<128x128xf32>
    %292 = arith.addf %291, %3 : vector<128x128xf32>
    %293 = vector.extract_strided_slice %289 {offsets = [0, 0], sizes = [32, 128], strides = [1, 1]} : vector<128x128xf32> to vector<32x128xf32>
    %294 = arith.negf %293 : vector<32x128xf32>
    %295 = math.exp %294 : vector<32x128xf32>
    %cst_56 = arith.constant 1.000000e+00 : f32
    %296 = vector.broadcast %cst_56 : f32 to vector<32x128xf32>
    %297 = arith.addf %296, %295 : vector<32x128xf32>
    %298 = arith.divf %296, %297 : vector<32x128xf32>
    %299 = vector.extract_strided_slice %289 {offsets = [32, 0], sizes = [32, 128], strides = [1, 1]} : vector<128x128xf32> to vector<32x128xf32>
    %300 = arith.negf %299 : vector<32x128xf32>
    %301 = math.exp %300 : vector<32x128xf32>
    %cst_57 = arith.constant 1.000000e+00 : f32
    %302 = vector.broadcast %cst_57 : f32 to vector<32x128xf32>
    %303 = arith.addf %302, %301 : vector<32x128xf32>
    %304 = arith.divf %302, %303 : vector<32x128xf32>
    %305 = vector.extract_strided_slice %289 {offsets = [64, 0], sizes = [32, 128], strides = [1, 1]} : vector<128x128xf32> to vector<32x128xf32>
    %306 = math.tanh %305 : vector<32x128xf32>
    %307 = vector.extract_strided_slice %289 {offsets = [96, 0], sizes = [32, 128], strides = [1, 1]} : vector<128x128xf32> to vector<32x128xf32>
    %308 = arith.negf %307 : vector<32x128xf32>
    %309 = math.exp %308 : vector<32x128xf32>
    %cst_58 = arith.constant 1.000000e+00 : f32
    %310 = vector.broadcast %cst_58 : f32 to vector<32x128xf32>
    %311 = arith.addf %310, %309 : vector<32x128xf32>
    %312 = arith.divf %310, %311 : vector<32x128xf32>
    %313 = vector.extract_strided_slice %277 {offsets = [0, 0], sizes = [32, 128], strides = [1, 1]} : vector<32x256xf32> to vector<32x128xf32>
    %314 = arith.mulf %304, %313 : vector<32x128xf32>
    %315 = arith.mulf %298, %306 : vector<32x128xf32>
    %316 = arith.addf %314, %315 : vector<32x128xf32>
    %317 = math.tanh %316 : vector<32x128xf32>
    %318 = arith.mulf %312, %317 : vector<32x128xf32>
    %319 = vector.extract_strided_slice %292 {offsets = [0, 0], sizes = [32, 128], strides = [1, 1]} : vector<128x128xf32> to vector<32x128xf32>
    %320 = arith.negf %319 : vector<32x128xf32>
    %321 = math.exp %320 : vector<32x128xf32>
    %cst_59 = arith.constant 1.000000e+00 : f32
    %322 = vector.broadcast %cst_59 : f32 to vector<32x128xf32>
    %323 = arith.addf %322, %321 : vector<32x128xf32>
    %324 = arith.divf %322, %323 : vector<32x128xf32>
    %325 = vector.extract_strided_slice %292 {offsets = [32, 0], sizes = [32, 128], strides = [1, 1]} : vector<128x128xf32> to vector<32x128xf32>
    %326 = arith.negf %325 : vector<32x128xf32>
    %327 = math.exp %326 : vector<32x128xf32>
    %cst_60 = arith.constant 1.000000e+00 : f32
    %328 = vector.broadcast %cst_60 : f32 to vector<32x128xf32>
    %329 = arith.addf %328, %327 : vector<32x128xf32>
    %330 = arith.divf %328, %329 : vector<32x128xf32>
    %331 = vector.extract_strided_slice %292 {offsets = [64, 0], sizes = [32, 128], strides = [1, 1]} : vector<128x128xf32> to vector<32x128xf32>
    %332 = math.tanh %331 : vector<32x128xf32>
    %333 = vector.extract_strided_slice %292 {offsets = [96, 0], sizes = [32, 128], strides = [1, 1]} : vector<128x128xf32> to vector<32x128xf32>
    %334 = arith.negf %333 : vector<32x128xf32>
    %335 = math.exp %334 : vector<32x128xf32>
    %cst_61 = arith.constant 1.000000e+00 : f32
    %336 = vector.broadcast %cst_61 : f32 to vector<32x128xf32>
    %337 = arith.addf %336, %335 : vector<32x128xf32>
    %338 = arith.divf %336, %337 : vector<32x128xf32>
    %339 = vector.extract_strided_slice %277 {offsets = [0, 128], sizes = [32, 128], strides = [1, 1]} : vector<32x256xf32> to vector<32x128xf32>
    %340 = arith.mulf %330, %339 : vector<32x128xf32>
    %341 = arith.mulf %324, %332 : vector<32x128xf32>
    %342 = arith.addf %340, %341 : vector<32x128xf32>
    %343 = math.tanh %342 : vector<32x128xf32>
    %344 = arith.mulf %338, %343 : vector<32x128xf32>
    %345 = tpu.concatenate %318, %344 in 1 : vector<32x128xf32>, vector<32x128xf32> -> vector<32x256xf32>
    %346 = tpu.concatenate %316, %342 in 1 : vector<32x128xf32>, vector<32x128xf32> -> vector<32x256xf32>
    %347 = arith.index_cast %c4_i32 : i32 to index
    %c0_62 = arith.constant 0 : index
    %c0_63 = arith.constant 0 : index
    %348 = vector.load %arg4[%347, %c0_62, %c0_63] : memref<8x32x256xf32, #tpu.memory_space<vmem>>, vector<1x32x256xf32>
    %349 = vector.shape_cast %348 : vector<1x32x256xf32> to vector<32x256xf32>
    %350 = vector.shape_cast %345 : vector<32x256xf32> to vector<1x32x256xf32>
    tpu.vector_store %arg4[%347, %c0_62, %c0_63], %350 {strides = array<i32>} : memref<8x32x256xf32, #tpu.memory_space<vmem>>, vector<1x32x256xf32>,
    %c5_i32 = arith.constant 5 : i32
    %351 = arith.index_cast %c5_i32 : i32 to index
    %c0_64 = arith.constant 0 : index
    %c0_65 = arith.constant 0 : index
    %352 = vector.load %arg1[%351, %c0_64, %c0_65] : memref<8x32x256xbf16, #tpu.memory_space<vmem>>, vector<1x32x256xbf16>
    %353 = vector.shape_cast %352 : vector<1x32x256xbf16> to vector<32x256xbf16>
    %354 = arith.truncf %345 : vector<32x256xf32> to vector<32x256xbf16>
    %355 = tpu.concatenate %353, %354 in 0 : vector<32x256xbf16>, vector<32x256xbf16> -> vector<64x256xbf16>
    %356 = vector.extract_strided_slice %355 {offsets = [0, 0], sizes = [64, 128], strides = [1, 1]} : vector<64x256xbf16> to vector<64x128xbf16>
    %cst_66 = arith.constant dense<0.000000e+00> : vector<128x128xf32>
    %357 = tpu.matmul %0, %356, %cst_66 {dimension_numbers = #tpu.dot_dimension_numbers<[1], [0], [0], [1], [0, 0, 1, 1], [], []>} : vector<128x64xbf16>, vector<64x128xbf16>, vector<128x128xf32> -> vector<128x128xf32>
    %358 = arith.addf %357, %3 : vector<128x128xf32>
    %359 = vector.extract_strided_slice %355 {offsets = [0, 128], sizes = [64, 128], strides = [1, 1]} : vector<64x256xbf16> to vector<64x128xbf16>
    %cst_67 = arith.constant dense<0.000000e+00> : vector<128x128xf32>
    %360 = tpu.matmul %0, %359, %cst_67 {dimension_numbers = #tpu.dot_dimension_numbers<[1], [0], [0], [1], [0, 0, 1, 1], [], []>} : vector<128x64xbf16>, vector<64x128xbf16>, vector<128x128xf32> -> vector<128x128xf32>
    %361 = arith.addf %360, %3 : vector<128x128xf32>
    %362 = vector.extract_strided_slice %358 {offsets = [0, 0], sizes = [32, 128], strides = [1, 1]} : vector<128x128xf32> to vector<32x128xf32>
    %363 = arith.negf %362 : vector<32x128xf32>
    %364 = math.exp %363 : vector<32x128xf32>
    %cst_68 = arith.constant 1.000000e+00 : f32
    %365 = vector.broadcast %cst_68 : f32 to vector<32x128xf32>
    %366 = arith.addf %365, %364 : vector<32x128xf32>
    %367 = arith.divf %365, %366 : vector<32x128xf32>
    %368 = vector.extract_strided_slice %358 {offsets = [32, 0], sizes = [32, 128], strides = [1, 1]} : vector<128x128xf32> to vector<32x128xf32>
    %369 = arith.negf %368 : vector<32x128xf32>
    %370 = math.exp %369 : vector<32x128xf32>
    %cst_69 = arith.constant 1.000000e+00 : f32
    %371 = vector.broadcast %cst_69 : f32 to vector<32x128xf32>
    %372 = arith.addf %371, %370 : vector<32x128xf32>
    %373 = arith.divf %371, %372 : vector<32x128xf32>
    %374 = vector.extract_strided_slice %358 {offsets = [64, 0], sizes = [32, 128], strides = [1, 1]} : vector<128x128xf32> to vector<32x128xf32>
    %375 = math.tanh %374 : vector<32x128xf32>
    %376 = vector.extract_strided_slice %358 {offsets = [96, 0], sizes = [32, 128], strides = [1, 1]} : vector<128x128xf32> to vector<32x128xf32>
    %377 = arith.negf %376 : vector<32x128xf32>
    %378 = math.exp %377 : vector<32x128xf32>
    %cst_70 = arith.constant 1.000000e+00 : f32
    %379 = vector.broadcast %cst_70 : f32 to vector<32x128xf32>
    %380 = arith.addf %379, %378 : vector<32x128xf32>
    %381 = arith.divf %379, %380 : vector<32x128xf32>
    %382 = vector.extract_strided_slice %346 {offsets = [0, 0], sizes = [32, 128], strides = [1, 1]} : vector<32x256xf32> to vector<32x128xf32>
    %383 = arith.mulf %373, %382 : vector<32x128xf32>
    %384 = arith.mulf %367, %375 : vector<32x128xf32>
    %385 = arith.addf %383, %384 : vector<32x128xf32>
    %386 = math.tanh %385 : vector<32x128xf32>
    %387 = arith.mulf %381, %386 : vector<32x128xf32>
    %388 = vector.extract_strided_slice %361 {offsets = [0, 0], sizes = [32, 128], strides = [1, 1]} : vector<128x128xf32> to vector<32x128xf32>
    %389 = arith.negf %388 : vector<32x128xf32>
    %390 = math.exp %389 : vector<32x128xf32>
    %cst_71 = arith.constant 1.000000e+00 : f32
    %391 = vector.broadcast %cst_71 : f32 to vector<32x128xf32>
    %392 = arith.addf %391, %390 : vector<32x128xf32>
    %393 = arith.divf %391, %392 : vector<32x128xf32>
    %394 = vector.extract_strided_slice %361 {offsets = [32, 0], sizes = [32, 128], strides = [1, 1]} : vector<128x128xf32> to vector<32x128xf32>
    %395 = arith.negf %394 : vector<32x128xf32>
    %396 = math.exp %395 : vector<32x128xf32>
    %cst_72 = arith.constant 1.000000e+00 : f32
    %397 = vector.broadcast %cst_72 : f32 to vector<32x128xf32>
    %398 = arith.addf %397, %396 : vector<32x128xf32>
    %399 = arith.divf %397, %398 : vector<32x128xf32>
    %400 = vector.extract_strided_slice %361 {offsets = [64, 0], sizes = [32, 128], strides = [1, 1]} : vector<128x128xf32> to vector<32x128xf32>
    %401 = math.tanh %400 : vector<32x128xf32>
    %402 = vector.extract_strided_slice %361 {offsets = [96, 0], sizes = [32, 128], strides = [1, 1]} : vector<128x128xf32> to vector<32x128xf32>
    %403 = arith.negf %402 : vector<32x128xf32>
    %404 = math.exp %403 : vector<32x128xf32>
    %cst_73 = arith.constant 1.000000e+00 : f32
    %405 = vector.broadcast %cst_73 : f32 to vector<32x128xf32>
    %406 = arith.addf %405, %404 : vector<32x128xf32>
    %407 = arith.divf %405, %406 : vector<32x128xf32>
    %408 = vector.extract_strided_slice %346 {offsets = [0, 128], sizes = [32, 128], strides = [1, 1]} : vector<32x256xf32> to vector<32x128xf32>
    %409 = arith.mulf %399, %408 : vector<32x128xf32>
    %410 = arith.mulf %393, %401 : vector<32x128xf32>
    %411 = arith.addf %409, %410 : vector<32x128xf32>
    %412 = math.tanh %411 : vector<32x128xf32>
    %413 = arith.mulf %407, %412 : vector<32x128xf32>
    %414 = tpu.concatenate %387, %413 in 1 : vector<32x128xf32>, vector<32x128xf32> -> vector<32x256xf32>
    %415 = tpu.concatenate %385, %411 in 1 : vector<32x128xf32>, vector<32x128xf32> -> vector<32x256xf32>
    %416 = arith.index_cast %c5_i32 : i32 to index
    %c0_74 = arith.constant 0 : index
    %c0_75 = arith.constant 0 : index
    %417 = vector.load %arg4[%416, %c0_74, %c0_75] : memref<8x32x256xf32, #tpu.memory_space<vmem>>, vector<1x32x256xf32>
    %418 = vector.shape_cast %417 : vector<1x32x256xf32> to vector<32x256xf32>
    %419 = vector.shape_cast %414 : vector<32x256xf32> to vector<1x32x256xf32>
    tpu.vector_store %arg4[%416, %c0_74, %c0_75], %419 {strides = array<i32>} : memref<8x32x256xf32, #tpu.memory_space<vmem>>, vector<1x32x256xf32>,
    %c6_i32 = arith.constant 6 : i32
    %420 = arith.index_cast %c6_i32 : i32 to index
    %c0_76 = arith.constant 0 : index
    %c0_77 = arith.constant 0 : index
    %421 = vector.load %arg1[%420, %c0_76, %c0_77] : memref<8x32x256xbf16, #tpu.memory_space<vmem>>, vector<1x32x256xbf16>
    %422 = vector.shape_cast %421 : vector<1x32x256xbf16> to vector<32x256xbf16>
    %423 = arith.truncf %414 : vector<32x256xf32> to vector<32x256xbf16>
    %424 = tpu.concatenate %422, %423 in 0 : vector<32x256xbf16>, vector<32x256xbf16> -> vector<64x256xbf16>
    %425 = vector.extract_strided_slice %424 {offsets = [0, 0], sizes = [64, 128], strides = [1, 1]} : vector<64x256xbf16> to vector<64x128xbf16>
    %cst_78 = arith.constant dense<0.000000e+00> : vector<128x128xf32>
    %426 = tpu.matmul %0, %425, %cst_78 {dimension_numbers = #tpu.dot_dimension_numbers<[1], [0], [0], [1], [0, 0, 1, 1], [], []>} : vector<128x64xbf16>, vector<64x128xbf16>, vector<128x128xf32> -> vector<128x128xf32>
    %427 = arith.addf %426, %3 : vector<128x128xf32>
    %428 = vector.extract_strided_slice %424 {offsets = [0, 128], sizes = [64, 128], strides = [1, 1]} : vector<64x256xbf16> to vector<64x128xbf16>
    %cst_79 = arith.constant dense<0.000000e+00> : vector<128x128xf32>
    %429 = tpu.matmul %0, %428, %cst_79 {dimension_numbers = #tpu.dot_dimension_numbers<[1], [0], [0], [1], [0, 0, 1, 1], [], []>} : vector<128x64xbf16>, vector<64x128xbf16>, vector<128x128xf32> -> vector<128x128xf32>
    %430 = arith.addf %429, %3 : vector<128x128xf32>
    %431 = vector.extract_strided_slice %427 {offsets = [0, 0], sizes = [32, 128], strides = [1, 1]} : vector<128x128xf32> to vector<32x128xf32>
    %432 = arith.negf %431 : vector<32x128xf32>
    %433 = math.exp %432 : vector<32x128xf32>
    %cst_80 = arith.constant 1.000000e+00 : f32
    %434 = vector.broadcast %cst_80 : f32 to vector<32x128xf32>
    %435 = arith.addf %434, %433 : vector<32x128xf32>
    %436 = arith.divf %434, %435 : vector<32x128xf32>
    %437 = vector.extract_strided_slice %427 {offsets = [32, 0], sizes = [32, 128], strides = [1, 1]} : vector<128x128xf32> to vector<32x128xf32>
    %438 = arith.negf %437 : vector<32x128xf32>
    %439 = math.exp %438 : vector<32x128xf32>
    %cst_81 = arith.constant 1.000000e+00 : f32
    %440 = vector.broadcast %cst_81 : f32 to vector<32x128xf32>
    %441 = arith.addf %440, %439 : vector<32x128xf32>
    %442 = arith.divf %440, %441 : vector<32x128xf32>
    %443 = vector.extract_strided_slice %427 {offsets = [64, 0], sizes = [32, 128], strides = [1, 1]} : vector<128x128xf32> to vector<32x128xf32>
    %444 = math.tanh %443 : vector<32x128xf32>
    %445 = vector.extract_strided_slice %427 {offsets = [96, 0], sizes = [32, 128], strides = [1, 1]} : vector<128x128xf32> to vector<32x128xf32>
    %446 = arith.negf %445 : vector<32x128xf32>
    %447 = math.exp %446 : vector<32x128xf32>
    %cst_82 = arith.constant 1.000000e+00 : f32
    %448 = vector.broadcast %cst_82 : f32 to vector<32x128xf32>
    %449 = arith.addf %448, %447 : vector<32x128xf32>
    %450 = arith.divf %448, %449 : vector<32x128xf32>
    %451 = vector.extract_strided_slice %415 {offsets = [0, 0], sizes = [32, 128], strides = [1, 1]} : vector<32x256xf32> to vector<32x128xf32>
    %452 = arith.mulf %442, %451 : vector<32x128xf32>
    %453 = arith.mulf %436, %444 : vector<32x128xf32>
    %454 = arith.addf %452, %453 : vector<32x128xf32>
    %455 = math.tanh %454 : vector<32x128xf32>
    %456 = arith.mulf %450, %455 : vector<32x128xf32>
    %457 = vector.extract_strided_slice %430 {offsets = [0, 0], sizes = [32, 128], strides = [1, 1]} : vector<128x128xf32> to vector<32x128xf32>
    %458 = arith.negf %457 : vector<32x128xf32>
    %459 = math.exp %458 : vector<32x128xf32>
    %cst_83 = arith.constant 1.000000e+00 : f32
    %460 = vector.broadcast %cst_83 : f32 to vector<32x128xf32>
    %461 = arith.addf %460, %459 : vector<32x128xf32>
    %462 = arith.divf %460, %461 : vector<32x128xf32>
    %463 = vector.extract_strided_slice %430 {offsets = [32, 0], sizes = [32, 128], strides = [1, 1]} : vector<128x128xf32> to vector<32x128xf32>
    %464 = arith.negf %463 : vector<32x128xf32>
    %465 = math.exp %464 : vector<32x128xf32>
    %cst_84 = arith.constant 1.000000e+00 : f32
    %466 = vector.broadcast %cst_84 : f32 to vector<32x128xf32>
    %467 = arith.addf %466, %465 : vector<32x128xf32>
    %468 = arith.divf %466, %467 : vector<32x128xf32>
    %469 = vector.extract_strided_slice %430 {offsets = [64, 0], sizes = [32, 128], strides = [1, 1]} : vector<128x128xf32> to vector<32x128xf32>
    %470 = math.tanh %469 : vector<32x128xf32>
    %471 = vector.extract_strided_slice %430 {offsets = [96, 0], sizes = [32, 128], strides = [1, 1]} : vector<128x128xf32> to vector<32x128xf32>
    %472 = arith.negf %471 : vector<32x128xf32>
    %473 = math.exp %472 : vector<32x128xf32>
    %cst_85 = arith.constant 1.000000e+00 : f32
    %474 = vector.broadcast %cst_85 : f32 to vector<32x128xf32>
    %475 = arith.addf %474, %473 : vector<32x128xf32>
    %476 = arith.divf %474, %475 : vector<32x128xf32>
    %477 = vector.extract_strided_slice %415 {offsets = [0, 128], sizes = [32, 128], strides = [1, 1]} : vector<32x256xf32> to vector<32x128xf32>
    %478 = arith.mulf %468, %477 : vector<32x128xf32>
    %479 = arith.mulf %462, %470 : vector<32x128xf32>
    %480 = arith.addf %478, %479 : vector<32x128xf32>
    %481 = math.tanh %480 : vector<32x128xf32>
    %482 = arith.mulf %476, %481 : vector<32x128xf32>
    %483 = tpu.concatenate %456, %482 in 1 : vector<32x128xf32>, vector<32x128xf32> -> vector<32x256xf32>
    %484 = tpu.concatenate %454, %480 in 1 : vector<32x128xf32>, vector<32x128xf32> -> vector<32x256xf32>
    %485 = arith.index_cast %c6_i32 : i32 to index
    %c0_86 = arith.constant 0 : index
    %c0_87 = arith.constant 0 : index
    %486 = vector.load %arg4[%485, %c0_86, %c0_87] : memref<8x32x256xf32, #tpu.memory_space<vmem>>, vector<1x32x256xf32>
    %487 = vector.shape_cast %486 : vector<1x32x256xf32> to vector<32x256xf32>
    %488 = vector.shape_cast %483 : vector<32x256xf32> to vector<1x32x256xf32>
    tpu.vector_store %arg4[%485, %c0_86, %c0_87], %488 {strides = array<i32>} : memref<8x32x256xf32, #tpu.memory_space<vmem>>, vector<1x32x256xf32>,
    %c7_i32 = arith.constant 7 : i32
    %489 = arith.index_cast %c7_i32 : i32 to index
    %c0_88 = arith.constant 0 : index
    %c0_89 = arith.constant 0 : index
    %490 = vector.load %arg1[%489, %c0_88, %c0_89] : memref<8x32x256xbf16, #tpu.memory_space<vmem>>, vector<1x32x256xbf16>
    %491 = vector.shape_cast %490 : vector<1x32x256xbf16> to vector<32x256xbf16>
    %492 = arith.truncf %483 : vector<32x256xf32> to vector<32x256xbf16>
    %493 = tpu.concatenate %491, %492 in 0 : vector<32x256xbf16>, vector<32x256xbf16> -> vector<64x256xbf16>
    %494 = vector.extract_strided_slice %493 {offsets = [0, 0], sizes = [64, 128], strides = [1, 1]} : vector<64x256xbf16> to vector<64x128xbf16>
    %cst_90 = arith.constant dense<0.000000e+00> : vector<128x128xf32>
    %495 = tpu.matmul %0, %494, %cst_90 {dimension_numbers = #tpu.dot_dimension_numbers<[1], [0], [0], [1], [0, 0, 1, 1], [], []>} : vector<128x64xbf16>, vector<64x128xbf16>, vector<128x128xf32> -> vector<128x128xf32>
    %496 = arith.addf %495, %3 : vector<128x128xf32>
    %497 = vector.extract_strided_slice %493 {offsets = [0, 128], sizes = [64, 128], strides = [1, 1]} : vector<64x256xbf16> to vector<64x128xbf16>
    %cst_91 = arith.constant dense<0.000000e+00> : vector<128x128xf32>
    %498 = tpu.matmul %0, %497, %cst_91 {dimension_numbers = #tpu.dot_dimension_numbers<[1], [0], [0], [1], [0, 0, 1, 1], [], []>} : vector<128x64xbf16>, vector<64x128xbf16>, vector<128x128xf32> -> vector<128x128xf32>
    %499 = arith.addf %498, %3 : vector<128x128xf32>
    %500 = vector.extract_strided_slice %496 {offsets = [0, 0], sizes = [32, 128], strides = [1, 1]} : vector<128x128xf32> to vector<32x128xf32>
    %501 = arith.negf %500 : vector<32x128xf32>
    %502 = math.exp %501 : vector<32x128xf32>
    %cst_92 = arith.constant 1.000000e+00 : f32
    %503 = vector.broadcast %cst_92 : f32 to vector<32x128xf32>
    %504 = arith.addf %503, %502 : vector<32x128xf32>
    %505 = arith.divf %503, %504 : vector<32x128xf32>
    %506 = vector.extract_strided_slice %496 {offsets = [32, 0], sizes = [32, 128], strides = [1, 1]} : vector<128x128xf32> to vector<32x128xf32>
    %507 = arith.negf %506 : vector<32x128xf32>
    %508 = math.exp %507 : vector<32x128xf32>
    %cst_93 = arith.constant 1.000000e+00 : f32
    %509 = vector.broadcast %cst_93 : f32 to vector<32x128xf32>
    %510 = arith.addf %509, %508 : vector<32x128xf32>
    %511 = arith.divf %509, %510 : vector<32x128xf32>
    %512 = vector.extract_strided_slice %496 {offsets = [64, 0], sizes = [32, 128], strides = [1, 1]} : vector<128x128xf32> to vector<32x128xf32>
    %513 = math.tanh %512 : vector<32x128xf32>
    %514 = vector.extract_strided_slice %496 {offsets = [96, 0], sizes = [32, 128], strides = [1, 1]} : vector<128x128xf32> to vector<32x128xf32>
    %515 = arith.negf %514 : vector<32x128xf32>
    %516 = math.exp %515 : vector<32x128xf32>
    %cst_94 = arith.constant 1.000000e+00 : f32
    %517 = vector.broadcast %cst_94 : f32 to vector<32x128xf32>
    %518 = arith.addf %517, %516 : vector<32x128xf32>
    %519 = arith.divf %517, %518 : vector<32x128xf32>
    %520 = vector.extract_strided_slice %484 {offsets = [0, 0], sizes = [32, 128], strides = [1, 1]} : vector<32x256xf32> to vector<32x128xf32>
    %521 = arith.mulf %511, %520 : vector<32x128xf32>
    %522 = arith.mulf %505, %513 : vector<32x128xf32>
    %523 = arith.addf %521, %522 : vector<32x128xf32>
    %524 = math.tanh %523 : vector<32x128xf32>
    %525 = arith.mulf %519, %524 : vector<32x128xf32>
    %526 = vector.extract_strided_slice %499 {offsets = [0, 0], sizes = [32, 128], strides = [1, 1]} : vector<128x128xf32> to vector<32x128xf32>
    %527 = arith.negf %526 : vector<32x128xf32>
    %528 = math.exp %527 : vector<32x128xf32>
    %cst_95 = arith.constant 1.000000e+00 : f32
    %529 = vector.broadcast %cst_95 : f32 to vector<32x128xf32>
    %530 = arith.addf %529, %528 : vector<32x128xf32>
    %531 = arith.divf %529, %530 : vector<32x128xf32>
    %532 = vector.extract_strided_slice %499 {offsets = [32, 0], sizes = [32, 128], strides = [1, 1]} : vector<128x128xf32> to vector<32x128xf32>
    %533 = arith.negf %532 : vector<32x128xf32>
    %534 = math.exp %533 : vector<32x128xf32>
    %cst_96 = arith.constant 1.000000e+00 : f32
    %535 = vector.broadcast %cst_96 : f32 to vector<32x128xf32>
    %536 = arith.addf %535, %534 : vector<32x128xf32>
    %537 = arith.divf %535, %536 : vector<32x128xf32>
    %538 = vector.extract_strided_slice %499 {offsets = [64, 0], sizes = [32, 128], strides = [1, 1]} : vector<128x128xf32> to vector<32x128xf32>
    %539 = math.tanh %538 : vector<32x128xf32>
    %540 = vector.extract_strided_slice %499 {offsets = [96, 0], sizes = [32, 128], strides = [1, 1]} : vector<128x128xf32> to vector<32x128xf32>
    %541 = arith.negf %540 : vector<32x128xf32>
    %542 = math.exp %541 : vector<32x128xf32>
    %cst_97 = arith.constant 1.000000e+00 : f32
    %543 = vector.broadcast %cst_97 : f32 to vector<32x128xf32>
    %544 = arith.addf %543, %542 : vector<32x128xf32>
    %545 = arith.divf %543, %544 : vector<32x128xf32>
    %546 = vector.extract_strided_slice %484 {offsets = [0, 128], sizes = [32, 128], strides = [1, 1]} : vector<32x256xf32> to vector<32x128xf32>
    %547 = arith.mulf %537, %546 : vector<32x128xf32>
    %548 = arith.mulf %531, %539 : vector<32x128xf32>
    %549 = arith.addf %547, %548 : vector<32x128xf32>
    %550 = math.tanh %549 : vector<32x128xf32>
    %551 = arith.mulf %545, %550 : vector<32x128xf32>
    %552 = tpu.concatenate %525, %551 in 1 : vector<32x128xf32>, vector<32x128xf32> -> vector<32x256xf32>
    %553 = tpu.concatenate %523, %549 in 1 : vector<32x128xf32>, vector<32x128xf32> -> vector<32x256xf32>
    %554 = arith.index_cast %c7_i32 : i32 to index
    %c0_98 = arith.constant 0 : index
    %c0_99 = arith.constant 0 : index
    %555 = vector.load %arg4[%554, %c0_98, %c0_99] : memref<8x32x256xf32, #tpu.memory_space<vmem>>, vector<1x32x256xf32>
    %556 = vector.shape_cast %555 : vector<1x32x256xf32> to vector<32x256xf32>
    %557 = vector.shape_cast %552 : vector<32x256xf32> to vector<1x32x256xf32>
    tpu.vector_store %arg4[%554, %c0_98, %c0_99], %557 {strides = array<i32>} : memref<8x32x256xf32, #tpu.memory_space<vmem>>, vector<1x32x256xf32>,
    %c8_i32 = arith.constant 8 : i32
    return
  }
  func.func @transform_0(%arg0: i32) -> (i32, i32, i32) {
    %c0_i32 = arith.constant 0 : i32
    %c0_i32_0 = arith.constant 0 : i32
    %c0_i32_1 = arith.constant 0 : i32
    return %c0_i32, %c0_i32_0, %arg0 : i32, i32, i32
  }
  func.func @transform_1(%arg0: i32) -> (i32, i32) {
    %c0_i32 = arith.constant 0 : i32
    %c0_i32_0 = arith.constant 0 : i32
    %c0_i32_1 = arith.constant 0 : i32
    return %c0_i32, %c0_i32_0 : i32, i32
  }
  func.func @transform_2(%arg0: i32) -> (i32, i32) {
    %c0_i32 = arith.constant 0 : i32
    %c0_i32_0 = arith.constant 0 : i32
    %c0_i32_1 = arith.constant 0 : i32
    return %c0_i32, %c0_i32_0 : i32, i32
  }
  func.func @transform_3(%arg0: i32) -> (i32, i32, i32) {
    %c0_i32 = arith.constant 0 : i32
    %c0_i32_0 = arith.constant 0 : i32
    %c0_i32_1 = arith.constant 0 : i32
    return %c0_i32, %c0_i32_0, %arg0 : i32, i32, i32
  }
}

</mosaic_0001>

<bundles_post_ra>
// kernel: lstm_block_forward.1
= control target key start
LH: loop header
LB: loop body
LE: loop exit
PB: predicated region body
PF: predicated region fallthrough
CT: control target
= control target key end

     0   :  { %s6300_s12 = smov 0   ;;  %s6302_s13 = smov 0   ;;  %s7979_s0 = inlined_call_operand.vmem [shape: bf16[8,32,512], index: 0, kind: input, shape index: {}]   ;;  %s7980_s1 = inlined_call_operand.vmem [shape: bf16[128,64], index: 1, kind: input, shape index: {}]   ;;  %s7981_s2 = inlined_call_operand.vmem [shape: f32[128,1], index: 2, kind: input, shape index: {}]   ;;  %s7982_s3 = inlined_call_operand.vmem [shape: f32[8,32,512], index: 3, kind: output, shape index: {}]  }
   0x1   :  { %s6304_s14 = smov 0  }
   0x2 LB: > { %s4099_s15 = sadd.s32 4294967295, %s6277_s14   ;;  %s6317_s16 = sadd.s32 1, %s6277_s14   ;;  %s6277_s14 = sphi %s6304_s14, %s8010_s14   ;;  %s6273_s13 = sphi %s6302_s13, %s8009_s13   ;;  %s6269_s12 = sphi %s6300_s12, %s8008_s12  }
   0x3   : > { %s17_s17 = ssub.s32 %s6277_s14, %s6317_s16  ;;  %s20_s18 = sadd.s32 1, %s6273_s13 }
   0x4   : > { %p18_p0 = scmp.eq.s32.totalorder %s17_s17, 0  ;;  %p27_p1 = scmp.ne.s32.totalorder %s6273_s13, %s6269_s12 }
   0x5   : > { %p28_p2 = scmp.eq.s32.totalorder %s6277_s14, 0  ;;  %p99_p3 = scmp.eq.s32.totalorder %s4099_s15, 1 }
   0x6   : > { %s6328_s19 = scalar_select %p18_p0, %s6273_s13, %s20_s18  }
   0x7   : > { %p29_p4 = por %p28_p2, %p27_p1  ;;  %p6330_p5 = por %p99_p3, %p27_p1 }
   0x8   : > { %p4102_p6 = scmp.ge.s32.totalorder %s6277_s14, 2 }
   0xa   : > { %127 = sbr.rel (%p4102_p6) target bundleno = 37 (0x25), region = 24 }
  0x11   : > { %130 = sbr.rel (!%p29_p4) target bundleno = 37 (0x25), region = 28  ;;  %s132_s21 = sand.u32 (%p29_p4), 1, %s6273_s13  }
  0x12   : > { %s4558_s22 = sshll.u32 (%p29_p4), %s6277_s14, 3  ;;  %s4103_s23 = sshll.u32 (%p29_p4), %s132_s21, 8 }
  0x13   : > { %s6340_s26 = scalar_lea.vmem (%p29_p4), %s7979_s0, %s4558_s22  ;;  %s6345_s27 = scalar_lea.vmem (%p29_p4), [#allocation2], %s4103_s23 }
  0x14   : > { %v227_v0 = vld [vmem:[%s6340_s26] sm:$0xff] (%p29_p4)  ;;  %v229_v1 = vld [vmem:[%s6340_s26 + $0x10] sm:$0xff] (%p29_p4) }
  0x15   : > { %v231_v2 = vld [vmem:[%s6340_s26 + $0x20] sm:$0xff] (%p29_p4)  ;;  %228 = vst [vmem:[%s6345_s27] sm:$0xff] (%p29_p4), %v227_v0  ;;  %230 = vst [vmem:[%s6345_s27 + $0x8] sm:$0xff] (%p29_p4), %v229_v1  ;;  %v233_v3 = vld [vmem:[%s6340_s26 + $0x30] sm:$0xff] (%p29_p4) }
  0x16   : > { %232 = vst [vmem:[%s6345_s27 + $0x10] sm:$0xff] (%p29_p4), %v231_v2  ;;  %v235_v4 = vld [vmem:[%s6340_s26 + $0x40] sm:$0xff] (%p29_p4)  ;;  %v237_v5 = vld [vmem:[%s6340_s26 + $0x50] sm:$0xff] (%p29_p4)  ;;  %234 = vst [vmem:[%s6345_s27 + $0x18] sm:$0xff] (%p29_p4), %v233_v3 }
  0x17   : > { %236 = vst [vmem:[%s6345_s27 + $0x20] sm:$0xff] (%p29_p4), %v235_v4  ;;  %238 = vst [vmem:[%s6345_s27 + $0x28] sm:$0xff] (%p29_p4), %v237_v5  ;;  %v239_v6 = vld [vmem:[%s6340_s26 + $0x60] sm:$0xff] (%p29_p4)  ;;  %v241_v7 = vld [vmem:[%s6340_s26 + $0x70] sm:$0xff] (%p29_p4) }
  0x18   : > { %v243_v8 = vld [vmem:[%s6340_s26 + $0x80] sm:$0xff]  ;;  %240 = vst [vmem:[%s6345_s27 + $0x30] sm:$0xff] %v239_v6  ;;  %242 = vst [vmem:[%s6345_s27 + $0x38] sm:$0xff] %v241_v7  ;;  %v245_v9 = vld [vmem:[%s6340_s26 + $0x90] sm:$0xff] }
  0x19   : > { %244 = vst [vmem:[%s6345_s27 + $0x40] sm:$0xff] %v243_v8  ;;  %v247_v10 = vld [vmem:[%s6340_s26 + $0xa0] sm:$0xff]  ;;  %v249_v11 = vld [vmem:[%s6340_s26 + $0xb0] sm:$0xff]  ;;  %246 = vst [vmem:[%s6345_s27 + $0x48] sm:$0xff] %v245_v9 }
  0x1a   : > { %248 = vst [vmem:[%s6345_s27 + $0x50] sm:$0xff] %v247_v10  ;;  %250 = vst [vmem:[%s6345_s27 + $0x58] sm:$0xff] %v249_v11  ;;  %v251_v12 = vld [vmem:[%s6340_s26 + $0xc0] sm:$0xff]  ;;  %v253_v13 = vld [vmem:[%s6340_s26 + $0xd0] sm:$0xff] }
  0x1b   : > { %v255_v14 = vld [vmem:[%s6340_s26 + $0xe0] sm:$0xff]  ;;  %252 = vst [vmem:[%s6345_s27 + $0x60] sm:$0xff] %v251_v12  ;;  %254 = vst [vmem:[%s6345_s27 + $0x68] sm:$0xff] %v253_v13  ;;  %v257_v15 = vld [vmem:[%s6340_s26 + $0xf0] sm:$0xff] }
  0x1c   : > { %256 = vst [vmem:[%s6345_s27 + $0x70] sm:$0xff] %v255_v14  ;;  %v259_v16 = vld [vmem:[%s6340_s26 + $0x100] sm:$0xff]  ;;  %v261_v17 = vld [vmem:[%s6340_s26 + $0x110] sm:$0xff]  ;;  %258 = vst [vmem:[%s6345_s27 + $0x78] sm:$0xff] %v257_v15 }
  0x1d   : > { %260 = vst [vmem:[%s6345_s27 + $0x80] sm:$0xff] %v259_v16  ;;  %262 = vst [vmem:[%s6345_s27 + $0x88] sm:$0xff] %v261_v17  ;;  %v263_v18 = vld [vmem:[%s6340_s26 + $0x120] sm:$0xff]  ;;  %v265_v19 = vld [vmem:[%s6340_s26 + $0x130] sm:$0xff] }
  0x1e   : > { %v267_v20 = vld [vmem:[%s6340_s26 + $0x140] sm:$0xff]  ;;  %264 = vst [vmem:[%s6345_s27 + $0x90] sm:$0xff] %v263_v18  ;;  %266 = vst [vmem:[%s6345_s27 + $0x98] sm:$0xff] %v265_v19  ;;  %v269_v21 = vld [vmem:[%s6340_s26 + $0x150] sm:$0xff] }
  0x1f   : > { %268 = vst [vmem:[%s6345_s27 + $0xa0] sm:$0xff] %v267_v20  ;;  %v271_v22 = vld [vmem:[%s6340_s26 + $0x160] sm:$0xff]  ;;  %v273_v23 = vld [vmem:[%s6340_s26 + $0x170] sm:$0xff]  ;;  %270 = vst [vmem:[%s6345_s27 + $0xa8] sm:$0xff] %v269_v21 }
  0x20   : > { %272 = vst [vmem:[%s6345_s27 + $0xb0] sm:$0xff] %v271_v22  ;;  %274 = vst [vmem:[%s6345_s27 + $0xb8] sm:$0xff] %v273_v23  ;;  %v275_v24 = vld [vmem:[%s6340_s26 + $0x180] sm:$0xff]  ;;  %v277_v25 = vld [vmem:[%s6340_s26 + $0x190] sm:$0xff] }
  0x21   : > { %v279_v26 = vld [vmem:[%s6340_s26 + $0x1a0] sm:$0xff]  ;;  %276 = vst [vmem:[%s6345_s27 + $0xc0] sm:$0xff] %v275_v24  ;;  %278 = vst [vmem:[%s6345_s27 + $0xc8] sm:$0xff] %v277_v25  ;;  %v281_v27 = vld [vmem:[%s6340_s26 + $0x1b0] sm:$0xff] }
  0x22   : > { %280 = vst [vmem:[%s6345_s27 + $0xd0] sm:$0xff] %v279_v26  ;;  %v283_v28 = vld [vmem:[%s6340_s26 + $0x1c0] sm:$0xff]  ;;  %v285_v29 = vld [vmem:[%s6340_s26 + $0x1d0] sm:$0xff]  ;;  %282 = vst [vmem:[%s6345_s27 + $0xd8] sm:$0xff] %v281_v27 }
  0x23   : > { %284 = vst [vmem:[%s6345_s27 + $0xe0] sm:$0xff] %v283_v28  ;;  %286 = vst [vmem:[%s6345_s27 + $0xe8] sm:$0xff] %v285_v29  ;;  %v287_v30 = vld [vmem:[%s6340_s26 + $0x1e0] sm:$0xff]  ;;  %v289_v31 = vld [vmem:[%s6340_s26 + $0x1f0] sm:$0xff] }
  0x24   : > { %288 = vst [vmem:[%s6345_s27 + $0xf0] sm:$0xff] %v287_v30  ;;  %290 = vst [vmem:[%s6345_s27 + $0xf8] sm:$0xff] %v289_v31 }
  0x25 PF: > { %p4106_p7 = scmp.ge.s32.totalorder %s6277_s14, 1  ;;  %p295_p8 = scmp.lt.s32.totalorder %s6277_s14, 3 }
  0x27   : > { %p296_p9 = pnand %p4106_p7, %p295_p8 }
  0x29   : > { %299 = sbr.rel (%p296_p9) target bundleno = 2524 (0x9dc), region = 66 }
  0x30   : > { %s302_s28 = sand.u32 1, %s6269_s12   ;;  %v6414_v32 = vld [vmem:[%s7980_s1] sm:$0xff]   ;;  %vm503_vm0 = vcmask 523264   ;;  %v6279_v35 = vmov 0   ;;  %v6431_v38 = vld [vmem:[%s7980_s1 + $0x8] sm:$0xff]   ;;  %v6436_v39 = vld [vmem:[%s7980_s1 + $0x10] sm:$0xff]  }
  0x31   : > { %s4107_s4 = sshll.u32 %s302_s28, 8  ;;  %4752 = vmatprep.mubr.msk.bf16.mxu0 %vm503_vm0, %v6414_v32  ;;  %4772 = vmatprep.mubr.msk.bf16.mxu1 %vm503_vm0, %v6414_v32  ;;  %v347_v40 = vld [vmem:[%s7981_s2 + $0x20] sm:$0xff]  ;;  %v348_v42 = vld [vmem:[%s7981_s2 + $0x28] sm:$0xff]  ;;  %v6461_v44 = vld [vmem:[%s7980_s1 + $0x18] sm:$0xff]   ;;  %s4108_s23 = sshll.u32 %s302_s28, 9 }
  0x32   : > { %s6422_s5 = scalar_lea.vmem [#allocation2], %s4107_s4  ;;  %5150 = vset.pattern.permute.xlu1 %v6279_v35  ;;  %5149 = vset.pattern.permute.xlu0 %v6279_v35  ;;  %v343_v41 = vld [vmem:[%s7981_s2] sm:$0xff]  ;;  %v344_v43 = vld [vmem:[%s7981_s2 + $0x8] sm:$0xff]  ;;  %v346_v46 = vld [vmem:[%s7981_s2 + $0x18] sm:$0xff]  ;;  %s6695_s12 = scalar_lea.vmem [#allocation3], %s4108_s23 }
  0x33   : > { %v5151_v33 = vld [vmem:[%s6422_s5] ss:$8 sps:$4 sm:$0xff]   ;;  %v5153_v34 = vld [vmem:[%s6422_s5 + $0x4] ss:$8 sps:$4 sm:$0xff]   ;;  %v5154_v36 = vld [vmem:[%s6422_s5 + $0x10] ss:$8 sps:$4 sm:$0xff]   ;;  %381 = vperm.xlu1 %5150, %v347_v40   ;;  %361 = vperm.xlu0 %5149, %v343_v41  }
  0x34   : > { %4748 = vmatprep.subr.bf16.mxu0 %v5151_v33  ;;  %v5156_v37 = vld [vmem:[%s6422_s5 + $0x14] ss:$8 sps:$4 sm:$0xff]   ;;  %4768 = vmatprep.subr.bf16.mxu1 %v5153_v34  ;;  %v6466_v45 = vld [vmem:[%s7980_s1 + $0x20] sm:$0xff]   ;;  %v6491_v50 = vld [vmem:[%s7980_s1 + $0x28] sm:$0xff]  }
  0x35   : > { %4749 = vmatpush3.bf16.msra.mxu0 %v5151_v33  ;;  %4769 = vmatpush3.bf16.msra.mxu1 %v5153_v34  ;;  %v345_v47 = vld [vmem:[%s7981_s2 + $0x10] sm:$0xff]  ;;  %v350_v48 = vld [vmem:[%s7981_s2 + $0x38] sm:$0xff]  ;;  %v352_v51 = vld [vmem:[%s7981_s2 + $0x48] sm:$0xff] }
  0x36   : > { %4750 = vmatprep.subr.bf16.mxu0 %v5154_v36  ;;  %4770 = vmatprep.subr.bf16.mxu1 %v5156_v37  ;;  %v349_v49 = vld [vmem:[%s7981_s2 + $0x30] sm:$0xff]  ;;  %v351_v52 = vld [vmem:[%s7981_s2 + $0x40] sm:$0xff]  ;;  %v356_v54 = vld [vmem:[%s7981_s2 + $0x68] sm:$0xff] }
  0x37   : > { %386 = vperm.xlu1 %5150, %v348_v42   ;;  %366 = vperm.xlu0 %5149, %v344_v43   ;;  %v6502_v53 = vld [vmem:[%s7980_s1 + $0x30] sm:$0xff]   ;;  %v355_v55 = vld [vmem:[%s7981_s2 + $0x60] sm:$0xff]  ;;  %v6521_v56 = vld [vmem:[%s7980_s1 + $0x38] sm:$0xff]  }
  0x38   : > { %v354_v57 = vld [vmem:[%s7981_s2 + $0x58] sm:$0xff]  ;;  %v353_v58 = vld [vmem:[%s7981_s2 + $0x50] sm:$0xff]  ;;  %v5165_v61 = vld [vmem:[%s6422_s5 + $0x20] ss:$8 sps:$4 sm:$0xff]  }
  0x39   : > { %4751 = vmatpush3.bf16.msra.mxu0 %v5154_v36  ;;  %4771 = vmatpush3.bf16.msra.mxu1 %v5156_v37  ;;  %v358_v59 = vld [vmem:[%s7981_s2 + $0x78] sm:$0xff]  ;;  %v357_v60 = vld [vmem:[%s7981_s2 + $0x70] sm:$0xff]  ;;  %v5167_v62 = vld [vmem:[%s6422_s5 + $0x24] ss:$8 sps:$4 sm:$0xff]  }
  0x3a   : > { %v5168_v63 = vld [vmem:[%s6422_s5 + $0x30] ss:$8 sps:$4 sm:$0xff]   ;;  %v5170_v0 = vld [vmem:[%s6422_s5 + $0x34] ss:$8 sps:$4 sm:$0xff]   ;;  %4788 = vmatprep.subr.bf16.mxu0 %v5165_v61  ;;  %4812 = vmatprep.subr.bf16.mxu1 %v5167_v62 }
  0x3b   : > { %376 = vperm.xlu1 %5150, %v346_v46   ;;  %371 = vperm.xlu0 %5149, %v345_v47  }
  0x3c   : > { %4753 = vmatmul.mubr.msk.bf16.vlgmr.msra.gmra.mrb[0].mxu0 %vm503_vm0, %v6431_v38  ;;  %4773 = vmatmul.mubr.msk.bf16.vlgmr.msra.gmra.mrb[0].mxu1 %vm503_vm0, %v6431_v38 }
  0x3d   : > { %4756 = vmatprep.mubr.msk.bf16.mxu0 %vm503_vm0, %v6436_v39  ;;  %4776 = vmatprep.mubr.msk.bf16.mxu1 %vm503_vm0, %v6436_v39 }
  0x3e   : > { %4789 = vmatpush3.bf16.msra.mxu0 %v5165_v61  ;;  %4813 = vmatpush3.bf16.msra.mxu1 %v5167_v62 }
  0x3f   : > { %396 = vperm.xlu1 %5150, %v350_v48   ;;  %391 = vperm.xlu0 %5149, %v349_v49  }
  0x40   : > { %4790 = vmatprep.subr.bf16.mxu0 %v5168_v63  ;;  %4814 = vmatprep.subr.bf16.mxu1 %v5170_v0 }
  0x42   : > { %4791 = vmatpush3.bf16.msra.mxu0 %v5168_v63  ;;  %4815 = vmatpush3.bf16.msra.mxu1 %v5170_v0 }
  0x43   : > { %406 = vperm.xlu1 %5150, %v352_v51   ;;  %401 = vperm.xlu0 %5149, %v351_v52  }
  0x44   : > { %4757 = vmatmul.mubr.msk.bf16.gmra.mrb[4].mxu0 %vm503_vm0, %v6461_v44  ;;  %4777 = vmatmul.mubr.msk.bf16.gmra.mrb[4].mxu1 %vm503_vm0, %v6461_v44 }
  0x45   : > { %4760 = vmatprep.mubr.msk.bf16.mxu0 %vm503_vm0, %v6466_v45  ;;  %4780 = vmatprep.mubr.msk.bf16.mxu1 %vm503_vm0, %v6466_v45 }
  0x47   : > { %426 = vperm.xlu1 %5150, %v356_v54   ;;  %421 = vperm.xlu0 %5149, %v355_v55  }
  0x4b   : > { %416 = vperm.xlu1 %5150, %v354_v57   ;;  %411 = vperm.xlu0 %5149, %v353_v58  }
  0x4c   : > { %4761 = vmatmul.mubr.msk.bf16.gmra.mrb[8].mxu0 %vm503_vm0, %v6491_v50  ;;  %4781 = vmatmul.mubr.msk.bf16.gmra.mrb[8].mxu1 %vm503_vm0, %v6491_v50 }
  0x4d   : > { %4764 = vmatprep.mubr.msk.bf16.mxu0 %vm503_vm0, %v6502_v53  ;;  %4784 = vmatprep.mubr.msk.bf16.mxu1 %vm503_vm0, %v6502_v53 }
  0x4f   : > { %436 = vperm.xlu1 %5150, %v358_v59   ;;  %431 = vperm.xlu0 %5149, %v357_v60  }
  0x54   : > { %4765 = vmatmul.mubr.msk.bf16.gmra.mrb[12].mxu0 %vm503_vm0, %v6521_v56  ;;  %4785 = vmatmul.mubr.msk.bf16.gmra.mrb[12].mxu1 %vm503_vm0, %v6521_v56 }
  0x55   : > { %4796 = vmatprep.mubr.msk.bf16.mxu0 %vm503_vm0, %v6414_v32  ;;  %4820 = vmatprep.mubr.msk.bf16.mxu1 %vm503_vm0, %v6414_v32 }
  0xb2   : > { %v6547_v1 = vpop.permute.xlu0 %361  ;;  %v6549_v2 = vpop.permute.xlu1 %381 }
  0xb6   : > { %v6551_v3 = vpop.permute.xlu0 %366  ;;  %v6553_v4 = vpop.permute.xlu1 %386 }
  0xba   : > { %v6555_v5 = vpop.permute.xlu0 %371  ;;  %v6557_v6 = vpop.permute.xlu1 %376 }
  0xbe   : > { %v6559_v7 = vpop.permute.xlu0 %391  ;;  %v6569_v30 = vpop.permute.xlu1 %396 }
  0xc2   : > { %v6571_v33 = vpop.permute.xlu0 %401  ;;  %v6578_v61 = vpop.permute.xlu1 %406 }
  0xc3   : > { %7996 = vst [vmem:[#allocation4_spill] sm:$0xff] %v6571_v33  ;;  %7997 = vst [vmem:[#allocation5_spill] sm:$0xff] %v6578_v61 }
  0xc6   : > { %v6580_v63 = vpop.permute.xlu0 %421 }
  0xc7   : > { %7998 = vst [vmem:[#allocation6_spill] sm:$0xff] %v6580_v63 }
 0x10f   : > { %v4754_v8 = vpop.f32.mrb[0].mxu0  ;;  %v4774_v10 = vpop.f32.mrb[0].mxu1 }
 0x110   : > { %v571_v9 = vadd.f32 %v4754_v8, %v6555_v5  ;;  %v562_v11 = vpop.f32.mrb[1].mxu0  ;;  %v668_v12 = vadd.f32 %v4774_v10, %v6555_v5  ;;  %v659_v14 = vpop.f32.mrb[1].mxu1 }
 0x111   : > { %v563_v13 = vadd.f32 %v562_v11, %v6547_v1  ;;  %v4755_v15 = vpop.f32.mrb[2].mxu0  ;;  %v660_v17 = vadd.f32 %v659_v14, %v6547_v1  ;;  %v4775_v19 = vpop.f32.mrb[2].mxu1 }
 0x112   : > { %v4139_v16 = vmul.f32 -1.442695, %v571_v9  ;;  %v574_v18 = vadd.f32 %v4755_v15, %v6557_v6  ;;  %v565_v20 = vpop.f32.mrb[3].mxu0  ;;  %v4151_v21 = vmul.f32 -1.442695, %v668_v12  ;;  %v671_v23 = vadd.f32 %v4775_v19, %v6557_v6  ;;  %v662_v25 = vpop.f32.mrb[3].mxu1 }
 0x113   : > { %v4137_v22 = vmul.f32 -1.442695, %v563_v13  ;;  %v566_v24 = vadd.f32 %v565_v20, %v6551_v3  ;;  %v4149_v26 = vmul.f32 -1.442695, %v660_v17  ;;  %v663_v28 = vadd.f32 %v662_v25, %v6551_v3 }
 0x114   : > { %5207 = vpow2.f32 %v4139_v16  ;;  %v4140_v27 = vmul.f32 -1.442695, %v574_v18  ;;  %v4152_v29 = vmul.f32 -1.442695, %v671_v23 }
 0x115   : > { %5209 = vpow2.f32 %v4151_v21  ;;  %v4138_v31 = vmul.f32 -1.442695, %v566_v24  ;;  %v4150_v34 = vmul.f32 -1.442695, %v663_v28 }
 0x116   : > { %5211 = vpow2.f32 %v4137_v22 }
 0x117   : > { %5213 = vpow2.f32 %v4149_v26  ;;  %v4758_v35 = vpop.f32.mrb[4].mxu0  ;;  %v4778_v37 = vpop.f32.mrb[4].mxu1 }
 0x118   : > { %5215 = vpow2.f32 %v4140_v27  ;;  %v587_v36 = vadd.f32 %v4758_v35, %v6559_v7  ;;  %v578_v40 = vpop.f32.mrb[5].mxu0  ;;  %v684_v41 = vadd.f32 %v4778_v37, %v6559_v7  ;;  %v675_v43 = vpop.f32.mrb[5].mxu1 }
 0x119   : > { %5217 = vpow2.f32 %v4152_v29  ;;  %v579_v42 = vadd.f32 %v578_v40, %v6549_v2  ;;  %v4759_v46 = vpop.f32.mrb[6].mxu0  ;;  %v676_v48 = vadd.f32 %v675_v43, %v6549_v2  ;;  %v4779_v51 = vpop.f32.mrb[6].mxu1 }
 0x11a   : > { %5219 = vpow2.f32 %v4138_v31  ;;  %v4143_v47 = vmul.f32 -1.442695, %v587_v36  ;;  %v590_v49 = vadd.f32 %v4759_v46, %v6569_v30  ;;  %v581_v52 = vpop.f32.mrb[7].mxu0  ;;  %v4155_v54 = vmul.f32 -1.442695, %v684_v41  ;;  %v678_v57 = vpop.f32.mrb[7].mxu1 }
 0x11b   : > { %5221 = vpow2.f32 %v4150_v34  ;;  %v4141_v55 = vmul.f32 -1.442695, %v579_v42  ;;  %v4153_v58 = vmul.f32 -1.442695, %v676_v48  ;;  %v6598_v29 = vpop.permute.xlu1 %426  ;;  %v687_v34 = vadd.f32 %v4779_v51, %v6569_v30  ;;  %v6601_v36 = vpop.permute.xlu0 %411 }
 0x11c   : > { %5223 = vpow2.f32 %v4143_v47  ;;  %v4144_v59 = vmul.f32 -1.442695, %v590_v49  ;;  %v582_v40 = vadd.f32 %v581_v52, %v6553_v4  ;;  %v679_v46 = vadd.f32 %v678_v57, %v6553_v4 }
 0x11d   : > { %5225 = vpow2.f32 %v4155_v54 }
 0x11e   : > { %v5208_v60 = vpop.eup %5207  ;;  %5227 = vpow2.f32 %v4141_v55 }
 0x11f   : > { %v5210_v62 = vpop.eup %5209  ;;  %v736_v0 = vadd.f32 1.0, %v5208_v60  ;;  %5229 = vpow2.f32 %v4153_v58  ;;  %v6582_v8 = vpop.f32.mrb[8].mxu0  ;;  %v4156_v60 = vmul.f32 -1.442695, %v687_v34 }
 0x120   : > { %v5212_v9 = vpop.eup %5211  ;;  %v832_v10 = vadd.f32 1.0, %v5210_v62  ;;  %5231 = vpow2.f32 %v4144_v59  ;;  %v6584_v11 = vpop.f32.mrb[8].mxu1 }
 0x121   : > { %v6586_v12 = vpop.f32.mrb[9].mxu0  ;;  %v5214_v13 = vpop.eup %5213  ;;  %5233 = vrcp.f32 %v736_v0  ;;  %v734_v14 = vadd.f32 1.0, %v5212_v9  ;;  %v4142_v9 = vmul.f32 -1.442695, %v582_v40 }
 0x122   : > { %v6588_v15 = vpop.f32.mrb[9].mxu1  ;;  %v6590_v16 = vpop.f32.mrb[10].mxu0  ;;  %5235 = vrcp.f32 %v832_v10  ;;  %v830_v18 = vadd.f32 1.0, %v5214_v13 }
 0x123   : > { %v5216_v17 = vpop.eup %5215  ;;  %v6592_v19 = vpop.f32.mrb[10].mxu1  ;;  %5237 = vrcp.f32 %v734_v14  ;;  %v4154_v14 = vmul.f32 -1.442695, %v679_v46 }
 0x124   : > { %v6594_v20 = vpop.f32.mrb[11].mxu0  ;;  %v5218_v21 = vpop.eup %5217  ;;  %v737_v22 = vadd.f32 1.0, %v5216_v17  ;;  %5239 = vrcp.f32 %v830_v18  ;;  %v603_v18 = vadd.f32 %v6582_v8, %v6601_v36  ;;  %v692_v8 = vadd.f32 %v6588_v15, %v6571_v33 }
 0x125   : > { %v6596_v23 = vpop.f32.mrb[11].mxu1  ;;  %v5220_v24 = vpop.eup %5219  ;;  %v833_v25 = vadd.f32 1.0, %v5218_v21  ;;  %v598_v15 = vadd.f32 %v6594_v20, %v6578_v61 }
 0x126   : > { %v5222_v26 = vpop.eup %5221  ;;  %5241 = vrcp.f32 %v737_v22  ;;  %v735_v27 = vadd.f32 1.0, %v5220_v24  ;;  %v700_v22 = vadd.f32 %v6584_v11, %v6601_v36 }
 0x127   : > { %v5224_v28 = vpop.eup %5223  ;;  %5243 = vrcp.f32 %v833_v25  ;;  %v831_v31 = vadd.f32 1.0, %v5222_v26  ;;  %v4766_v41 = vpop.f32.mrb[12].mxu0  ;;  %v595_v25 = vadd.f32 %v6586_v12, %v6571_v33 }
 0x128   : > { %v5226_v35 = vpop.eup %5225  ;;  %5245 = vrcp.f32 %v735_v27  ;;  %v760_v37 = vadd.f32 1.0, %v5224_v28  ;;  %v4786_v47 = vpop.f32.mrb[12].mxu1 }
 0x129   : > { %v5228_v42 = vpop.eup %5227  ;;  %5247 = vrcp.f32 %v831_v31  ;;  %v856_v43 = vadd.f32 1.0, %v5226_v35  ;;  %v610_v48 = vpop.f32.mrb[13].mxu0 }
 0x12a   : > { %v5230_v49 = vpop.eup %5229  ;;  %5249 = vrcp.f32 %v760_v37  ;;  %v758_v54 = vadd.f32 1.0, %v5228_v42  ;;  %v707_v55 = vpop.f32.mrb[13].mxu1 }
 0x12b   : > { %v6605_v51 = vpop.f32.mrb[14].mxu0  ;;  %v5232_v58 = vpop.eup %5231  ;;  %5251 = vrcp.f32 %v856_v43  ;;  %v854_v59 = vadd.f32 1.0, %v5230_v49 }
 0x12c   : > { %v6607_v62 = vpop.f32.mrb[14].mxu1  ;;  %v6609_v52 = vpop.f32.mrb[15].mxu0  ;;  %5253 = vrcp.f32 %v758_v54  ;;  %v761_v57 = vadd.f32 1.0, %v5232_v58 }
 0x12d   : > { %v6611_v0 = vpop.eup %5233  ;;  %v6613_v10 = vpop.f32.mrb[15].mxu1  ;;  %5255 = vrcp.f32 %v854_v59 }
 0x12e   : > { %v6615_v13 = vpop.eup %5235  ;;  %5257 = vrcp.f32 %v761_v57  ;;  %v6631_v27 = vpop.permute.xlu1 %416 }
 0x12f   : > { %v6617_v17 = vpop.eup %5237  ;;  %5259 = vpow2.f32 %v4156_v60  ;;  %7999 = vst [vmem:[#allocation7_spill] sm:$0xff] %v6631_v27  ;;  %v6633_v28 = vpop.permute.xlu0 %431  ;;  %v606_v11 = vadd.f32 %v6590_v16, %v6631_v27  ;;  %v703_v12 = vadd.f32 %v6592_v19, %v6631_v27  ;;  %v695_v16 = vadd.f32 %v6596_v23, %v6578_v61 }
 0x130   : > { %v6621_v21 = vpop.eup %5239  ;;  %5261 = vpow2.f32 %v4142_v9  ;;  %8000 = vst [vmem:[#allocation8_spill] sm:$0xff] %v6633_v28  ;;  %v619_v34 = vadd.f32 %v4766_v41, %v6633_v28  ;;  %v716_v37 = vadd.f32 %v4786_v47, %v6633_v28  ;;  %v611_v19 = vadd.f32 %v610_v48, %v6580_v63 }
 0x131   : > { %v6625_v24 = vpop.eup %5241  ;;  %5263 = vpow2.f32 %v4154_v14  ;;  %v708_v47 = vadd.f32 %v707_v55, %v6580_v63 }
 0x132   : > { %v6629_v26 = vpop.eup %5243  ;;  %5265 = vtanh.f32 %v603_v18  ;;  %v4147_v41 = vmul.f32 -1.442695, %v619_v34  ;;  %v4159_v49 = vmul.f32 -1.442695, %v716_v37  ;;  %v4145_v9 = vmul.f32 -1.442695, %v611_v19 }
 0x133   : > { %v6637_v31 = vpop.eup %5245  ;;  %5267 = vtanh.f32 %v700_v22 }
 0x134   : > { %v6642_v35 = vpop.eup %5247  ;;  %5269 = vtanh.f32 %v595_v25  ;;  %v4157_v25 = vmul.f32 -1.442695, %v708_v47 }
 0x135   : > { %v5250_v40 = vpop.eup %5249  ;;  %5271 = vtanh.f32 %v692_v8  ;;  %v6653_v8 = vpop.permute.xlu1 %436 }
 0x136   : > { %v5252_v42 = vpop.eup %5251  ;;  %5273 = vtanh.f32 %v606_v11  ;;  %v800_v57 = vmul.f32 0.0, %v5250_v40  ;;  %v622_v40 = vadd.f32 %v6605_v51, %v6653_v8  ;;  %v719_v51 = vadd.f32 %v6607_v62, %v6653_v8 }
 0x137   : > { %v5254_v43 = vpop.eup %5253  ;;  %5275 = vtanh.f32 %v703_v12  ;;  %v896_v18 = vmul.f32 0.0, %v5252_v42 }
 0x138   : > { %v5256_v46 = vpop.eup %5255  ;;  %5277 = vtanh.f32 %v598_v15  ;;  %v798_v11 = vmul.f32 0.0, %v5254_v43 }
 0x139   : > { %v5258_v54 = vpop.eup %5257  ;;  %5279 = vtanh.f32 %v695_v16  ;;  %v894_v12 = vmul.f32 0.0, %v5256_v46 }
 0x13a   : > { %v5260_v58 = vpop.eup %5259  ;;  %5281 = vpow2.f32 %v4147_v41  ;;  %v801_v42 = vmul.f32 0.0, %v5258_v54 }
 0x13b   : > { %v5262_v20 = vpop.eup %5261  ;;  %v857_v59 = vadd.f32 1.0, %v5260_v58  ;;  %5283 = vpow2.f32 %v4159_v49  ;;  %v4148_v58 = vmul.f32 -1.442695, %v622_v40 }
 0x13c   : > { %v5264_v60 = vpop.eup %5263  ;;  %v759_v23 = vadd.f32 1.0, %v5262_v20  ;;  %v614_v20 = vadd.f32 %v6609_v52, %v6598_v29 }
 0x13d   : > { %v5266_v14 = vpop.eup %5265  ;;  %5285 = vrcp.f32 %v857_v59  ;;  %v855_v22 = vadd.f32 1.0, %v5264_v60 }
 0x13e   : > { %v5268_v48 = vpop.eup %5267  ;;  %5287 = vrcp.f32 %v759_v23  ;;  %v804_v55 = vmul.f32 %v5266_v14, %v6611_v0 }
 0x13f   : > { %v5270_v34 = vpop.eup %5269  ;;  %5289 = vrcp.f32 %v855_v22  ;;  %v900_v37 = vmul.f32 %v5268_v48, %v6615_v13 }
 0x140   : > { %v5272_v15 = vpop.eup %5271  ;;  %v6659_v16 = vadd.f32 %v804_v55, %v800_v57  ;;  %v802_v41 = vmul.f32 %v5270_v34, %v6617_v17  ;;  %5291 = vpow2.f32 %v4145_v9  ;;  %v4160_v9 = vmul.f32 -1.442695, %v719_v51 }
 0x141   : > { %v5274_v49 = vpop.eup %5273  ;;  %v6662_v43 = vadd.f32 %v900_v37, %v896_v18  ;;  %v898_v0 = vmul.f32 %v5272_v15, %v6621_v21  ;;  %5293 = vpow2.f32 %v4157_v25  ;;  %v4146_v18 = vmul.f32 -1.442695, %v614_v20 }
 0x142   : > { %v5276_v46 = vpop.eup %5275  ;;  %v6665_v19 = vadd.f32 %v802_v41, %v798_v11  ;;  %v805_v13 = vmul.f32 %v5274_v49, %v6625_v24  ;;  %5295 = vtanh.f32 %v6659_v16 }
 0x143   : > { %v5278_v54 = vpop.eup %5277  ;;  %v6670_v47 = vadd.f32 %v898_v0, %v894_v12  ;;  %v901_v17 = vmul.f32 %v5276_v46, %v6629_v26  ;;  %5297 = vtanh.f32 %v6662_v43 }
 0x144   : > { %v5280_v59 = vpop.eup %5279  ;;  %v6675_v21 = vadd.f32 %v805_v13, %v801_v42  ;;  %v803_v60 = vmul.f32 %v5278_v54, %v6637_v31  ;;  %5299 = vpow2.f32 %v4148_v58  ;;  %v711_v31 = vadd.f32 %v6613_v10, %v6598_v29 }
 0x145   : > { %v5282_v57 = vpop.eup %5281  ;;  %v899_v24 = vmul.f32 %v5280_v59, %v6642_v35 }
 0x146   : > { %v5284_v62 = vpop.eup %5283  ;;  %v788_v23 = vadd.f32 1.0, %v5282_v57  ;;  %v4158_v42 = vmul.f32 -1.442695, %v711_v31 }
 0x147   : > { %v5286_v26 = vpop.eup %5285  ;;  %v884_v14 = vadd.f32 1.0, %v5284_v62 }
 0x148   : > { %v5288_v52 = vpop.eup %5287  ;;  %v897_v22 = vmul.f32 0.0, %v5286_v26  ;;  %5301 = vrcp.f32 %v788_v23 }
 0x149   : > { %v5290_v25 = vpop.eup %5289  ;;  %v799_v48 = vmul.f32 0.0, %v5288_v52  ;;  %5303 = vrcp.f32 %v884_v14 }
 0x14a   : > { %v5292_v35 = vpop.eup %5291  ;;  %v895_v11 = vmul.f32 0.0, %v5290_v25  ;;  %v6683_v55 = vadd.f32 %v901_v17, %v897_v22  ;;  %5305 = vpow2.f32 %v4160_v9 }
 0x14b   : > { %v5294_v34 = vpop.eup %5293  ;;  %v6685_v12 = vadd.f32 %v803_v60, %v799_v48  ;;  %v786_v37 = vadd.f32 1.0, %v5292_v35  ;;  %5307 = vpow2.f32 %v4146_v18 }
 0x14c   : > { %v6687_v40 = vadd.f32 %v899_v24, %v895_v11  ;;  %v882_v15 = vadd.f32 1.0, %v5294_v34  ;;  %5309 = vtanh.f32 %v6665_v19  ;;  %v5296_v41 = vpop.eup %5295 }
 0x14d   : > { %5311 = vtanh.f32 %v6670_v47  ;;  %v5298_v10 = vpop.eup %5297 }
 0x14e   : > { %5313 = vrcp.f32 %v786_v37  ;;  %v5300_v49 = vpop.eup %5299 }
 0x14f   : > { %5315 = vrcp.f32 %v882_v15  ;;  %v789_v46 = vadd.f32 1.0, %v5300_v49 }
 0x150   : > { %5317 = vpow2.f32 %v4158_v42 }
 0x151   : > { %5319 = vtanh.f32 %v6675_v21 }
 0x152   : > { %v5302_v0 = vpop.eup %5301  ;;  %5321 = vrcp.f32 %v789_v46 }
 0x153   : > { %v5304_v13 = vpop.eup %5303  ;;  %v816_v51 = vmul.f32 %v5302_v0, %v5296_v41  ;;  %5323 = vtanh.f32 %v6683_v55 }
 0x154   : > { %v5306_v54 = vpop.eup %5305  ;;  %v912_v17 = vmul.f32 %v5304_v13, %v5298_v10  ;;  %5325 = vtanh.f32 %v6685_v12 }
 0x155   : > { %v5308_v58 = vpop.eup %5307  ;;  %v885_v20 = vadd.f32 1.0, %v5306_v54  ;;  %918 = vst [vmem:[%s6695_s12 + $0x20] sm:$0xff] %v816_v51 }
 0x156   : > { %v787_v59 = vadd.f32 1.0, %v5308_v58  ;;  %919 = vst [vmem:[%s6695_s12 + $0x28] sm:$0xff] %v912_v17  ;;  %v5310_v60 = vpop.eup %5309 }
 0x157   : > { %5327 = vrcp.f32 %v885_v20  ;;  %v5312_v57 = vpop.eup %5311 }
 0x158   : > { %5329 = vrcp.f32 %v787_v59  ;;  %v5314_v24 = vpop.eup %5313 }
 0x159   : > { %v5316_v62 = vpop.eup %5315  ;;  %v814_v23 = vmul.f32 %v5314_v24, %v5310_v60  ;;  %5331 = vtanh.f32 %v6687_v40 }
 0x15a   : > { %v5318_v9 = vpop.eup %5317  ;;  %v910_v26 = vmul.f32 %v5316_v62, %v5312_v57 }
 0x15b   : > { %v5320_v14 = vpop.eup %5319  ;;  %v883_v18 = vadd.f32 1.0, %v5318_v9  ;;  %914 = vst [vmem:[%s6695_s12] sm:$0xff] %v814_v23 }
 0x15c   : > { %915 = vst [vmem:[%s6695_s12 + $0x8] sm:$0xff] %v910_v26  ;;  %v5322_v52 = vpop.eup %5321 }
 0x15d   : > { %5333 = vrcp.f32 %v883_v18  ;;  %v5324_v22 = vpop.eup %5323  ;;  %v817_v25 = vmul.f32 %v5322_v52, %v5320_v14 }
 0x15e   : > { %v5326_v48 = vpop.eup %5325 }
 0x15f   : > { %920 = vst [vmem:[%s6695_s12 + $0x30] sm:$0xff] %v817_v25  ;;  %v929_v35 = vpack.c.bf16 %v817_v25, %v816_v51 }
 0x161   : > { %v5328_v31 = vpop.eup %5327 }
 0x162   : > { %v5330_v11 = vpop.eup %5329  ;;  %v913_v34 = vmul.f32 %v5328_v31, %v5324_v22 }
 0x163   : > { %v815_v37 = vmul.f32 %v5330_v11, %v5326_v48  ;;  %v5332_v41 = vpop.eup %5331 }
 0x164   : > { %921 = vst [vmem:[%s6695_s12 + $0x38] sm:$0xff] %v913_v34  ;;  %v930_v15 = vpack.c.bf16 %v913_v34, %v912_v17 }
 0x165   : > { %916 = vst [vmem:[%s6695_s12 + $0x10] sm:$0xff] %v815_v37  ;;  %v927_v42 = vpack.c.bf16 %v815_v37, %v814_v23 }
 0x167   : > { %4792 = vmatprep.subr.bf16.mxu0 %v927_v42  ;;  %v5334_v10 = vpop.eup %5333 }
 0x168   : > { %4793 = vmatpush3.bf16.msra.mxu0 %v927_v42  ;;  %v911_v49 = vmul.f32 %v5334_v10, %v5332_v41 }
 0x169   : > { %4794 = vmatprep.subr.bf16.mxu0 %v929_v35 }
 0x16a   : > { %917 = vst [vmem:[%s6695_s12 + $0x18] sm:$0xff] %v911_v49  ;;  %v928_v0 = vpack.c.bf16 %v911_v49, %v910_v26 }
 0x16c   : > { %4795 = vmatpush3.bf16.msra.mxu0 %v929_v35  ;;  %4816 = vmatprep.subr.bf16.mxu1 %v928_v0 }
 0x16d   : > { %4817 = vmatpush3.bf16.msra.mxu1 %v928_v0 }
 0x16e   : > { %4818 = vmatprep.subr.bf16.mxu1 %v930_v15 }
 0x16f   : > { %4797 = vmatmul.mubr.msk.bf16.vlgmr.msra.gmra.mrb[16].mxu0 %vm503_vm0, %v6431_v38 }
 0x170   : > { %4800 = vmatprep.mubr.msk.bf16.mxu0 %vm503_vm0, %v6436_v39 }
 0x171   : > { %4819 = vmatpush3.bf16.msra.mxu1 %v930_v15 }
 0x174   : > { %4821 = vmatmul.mubr.msk.bf16.vlgmr.msra.gmra.mrb[16].mxu1 %vm503_vm0, %v6431_v38  ;;  %v5171_v38 = vld [vmem:[%s6422_s5 + $0x40] ss:$8 sps:$4 sm:$0xff]  }
 0x175   : > { %4824 = vmatprep.mubr.msk.bf16.mxu1 %vm503_vm0, %v6436_v39  ;;  %v5173_v39 = vld [vmem:[%s6422_s5 + $0x44] ss:$8 sps:$4 sm:$0xff]   ;;  %4836 = vmatprep.subr.bf16.mxu0 %v5171_v38 }
 0x176   : > { %4860 = vmatprep.subr.bf16.mxu1 %v5173_v39  ;;  %4837 = vmatpush3.bf16.msra.mxu0 %v5171_v38 }
 0x177   : > { %4801 = vmatmul.mubr.msk.bf16.gmra.mrb[20].mxu0 %vm503_vm0, %v6461_v44  ;;  %4861 = vmatpush3.bf16.msra.mxu1 %v5173_v39 }
 0x178   : > { %4804 = vmatprep.mubr.msk.bf16.mxu0 %vm503_vm0, %v6466_v45 }
 0x17c   : > { %4825 = vmatmul.mubr.msk.bf16.gmra.mrb[20].mxu1 %vm503_vm0, %v6461_v44  ;;  %v5174_v44 = vld [vmem:[%s6422_s5 + $0x50] ss:$8 sps:$4 sm:$0xff]  }
 0x17d   : > { %4828 = vmatprep.mubr.msk.bf16.mxu1 %vm503_vm0, %v6466_v45  ;;  %v5176_v45 = vld [vmem:[%s6422_s5 + $0x54] ss:$8 sps:$4 sm:$0xff]   ;;  %4838 = vmatprep.subr.bf16.mxu0 %v5174_v44 }
 0x17e   : > { %4862 = vmatprep.subr.bf16.mxu1 %v5176_v45  ;;  %4839 = vmatpush3.bf16.msra.mxu0 %v5174_v44 }
 0x17f   : > { %4805 = vmatmul.mubr.msk.bf16.gmra.mrb[24].mxu0 %vm503_vm0, %v6491_v50  ;;  %4863 = vmatpush3.bf16.msra.mxu1 %v5176_v45 }
 0x180   : > { %4808 = vmatprep.mubr.msk.bf16.mxu0 %vm503_vm0, %v6502_v53 }
 0x184   : > { %4829 = vmatmul.mubr.msk.bf16.gmra.mrb[24].mxu1 %vm503_vm0, %v6491_v50 }
 0x185   : > { %4832 = vmatprep.mubr.msk.bf16.mxu1 %vm503_vm0, %v6502_v53 }
 0x187   : > { %4809 = vmatmul.mubr.msk.bf16.gmra.mrb[28].mxu0 %vm503_vm0, %v6521_v56 }
 0x188   : > { %4844 = vmatprep.mubr.msk.bf16.mxu0 %vm503_vm0, %v6414_v32 }
 0x18c   : > { %4833 = vmatmul.mubr.msk.bf16.gmra.mrb[28].mxu1 %vm503_vm0, %v6521_v56 }
 0x18d   : > { %4868 = vmatprep.mubr.msk.bf16.mxu1 %vm503_vm0, %v6414_v32 }
 0x242   : > { %v4798_v50 = vpop.f32.mrb[16].mxu0 }
 0x243   : > { %v994_v53 = vadd.f32 %v4798_v50, %v6555_v5  ;;  %v985_v46 = vpop.f32.mrb[17].mxu0 }
 0x244   : > { %v986_v56 = vadd.f32 %v985_v46, %v6547_v1  ;;  %v4799_v13 = vpop.f32.mrb[18].mxu0 }
 0x245   : > { %v4187_v32 = vmul.f32 -1.442695, %v994_v53  ;;  %v997_v51 = vadd.f32 %v4799_v13, %v6557_v6  ;;  %v988_v54 = vpop.f32.mrb[19].mxu0 }
 0x246   : > { %v4185_v17 = vmul.f32 -1.442695, %v986_v56  ;;  %v989_v58 = vadd.f32 %v988_v54, %v6551_v3 }
 0x247   : > { %5335 = vpow2.f32 %v4187_v32  ;;  %v4188_v20 = vmul.f32 -1.442695, %v997_v51  ;;  %v4822_v59 = vpop.f32.mrb[16].mxu1 }
 0x248   : > { %5337 = vpow2.f32 %v4185_v17  ;;  %v4186_v60 = vmul.f32 -1.442695, %v989_v58  ;;  %v1091_v57 = vadd.f32 %v4822_v59, %v6555_v5  ;;  %v1082_v24 = vpop.f32.mrb[17].mxu1 }
 0x249   : > { %5339 = vpow2.f32 %v4188_v20  ;;  %v1083_v62 = vadd.f32 %v1082_v24, %v6547_v1  ;;  %v4823_v23 = vpop.f32.mrb[18].mxu1 }
 0x24a   : > { %5341 = vpow2.f32 %v4186_v60  ;;  %v4802_v9 = vpop.f32.mrb[20].mxu0  ;;  %v4199_v26 = vmul.f32 -1.442695, %v1091_v57  ;;  %v1094_v14 = vadd.f32 %v4823_v23, %v6557_v6  ;;  %v1085_v18 = vpop.f32.mrb[19].mxu1 }
 0x24b   : > { %v1010_v52 = vadd.f32 %v4802_v9, %v6559_v7  ;;  %v1001_v22 = vpop.f32.mrb[21].mxu0  ;;  %v4197_v25 = vmul.f32 -1.442695, %v1083_v62  ;;  %v1086_v48 = vadd.f32 %v1085_v18, %v6551_v3 }
 0x24c   : > { %v1002_v31 = vadd.f32 %v1001_v22, %v6549_v2  ;;  %v4803_v35 = vpop.f32.mrb[22].mxu0  ;;  %5343 = vpow2.f32 %v4199_v26  ;;  %v4200_v11 = vmul.f32 -1.442695, %v1094_v14 }
 0x24d   : > { %v4191_v34 = vmul.f32 -1.442695, %v1010_v52  ;;  %v1013_v37 = vadd.f32 %v4803_v35, %v6569_v30  ;;  %v1004_v15 = vpop.f32.mrb[23].mxu0  ;;  %5345 = vpow2.f32 %v4197_v25  ;;  %v4198_v42 = vmul.f32 -1.442695, %v1086_v48 }
 0x24e   : > { %v4189_v41 = vmul.f32 -1.442695, %v1002_v31  ;;  %5347 = vpow2.f32 %v4200_v11  ;;  %v1005_v48 = vadd.f32 %v1004_v15, %v6553_v4 }
 0x24f   : > { %v4192_v10 = vmul.f32 -1.442695, %v1013_v37  ;;  %5349 = vpow2.f32 %v4198_v42  ;;  %v4826_v49 = vpop.f32.mrb[20].mxu1 }
 0x250   : > { %5351 = vpow2.f32 %v4191_v34  ;;  %v1107_v38 = vadd.f32 %v4826_v49, %v6559_v7  ;;  %v1098_v39 = vpop.f32.mrb[21].mxu1 }
 0x251   : > { %v5336_v0 = vpop.eup %5335  ;;  %5353 = vpow2.f32 %v4189_v41  ;;  %v1099_v50 = vadd.f32 %v1098_v39, %v6549_v2  ;;  %v4827_v53 = vpop.f32.mrb[22].mxu1 }
 0x252   : > { %v5338_v44 = vpop.eup %5337  ;;  %v1159_v45 = vadd.f32 1.0, %v5336_v0  ;;  %v4806_v46 = vpop.f32.mrb[24].mxu0  ;;  %5355 = vpow2.f32 %v4192_v10  ;;  %v4203_v58 = vmul.f32 -1.442695, %v1107_v38  ;;  %v1110_v18 = vadd.f32 %v4827_v53, %v6569_v30 }
 0x253   : > { %v5340_v56 = vpop.eup %5339  ;;  %v1157_v13 = vadd.f32 1.0, %v5338_v44  ;;  %v1101_v32 = vpop.f32.mrb[23].mxu1  ;;  %v4201_v60 = vmul.f32 -1.442695, %v1099_v50  ;;  %v4190_v53 = vmul.f32 -1.442695, %v1005_v48 }
 0x254   : > { %v6756_v51 = vpop.f32.mrb[25].mxu0  ;;  %v5342_v54 = vpop.eup %5341  ;;  %5357 = vrcp.f32 %v1159_v45  ;;  %v1160_v17 = vadd.f32 1.0, %v5340_v56  ;;  %v1102_v37 = vadd.f32 %v1101_v32, %v6553_v4  ;;  %v4204_v44 = vmul.f32 -1.442695, %v1110_v18 }
 0x255   : > { %v6758_v20 = vpop.f32.mrb[26].mxu0  ;;  %5359 = vrcp.f32 %v1157_v13  ;;  %v1158_v59 = vadd.f32 1.0, %v5342_v54  ;;  %v1026_v54 = vadd.f32 %v4806_v46, %v6601_v36  ;;  %v1018_v46 = vadd.f32 %v6756_v51, %v6571_v33 }
 0x256   : > { %v6760_v57 = vpop.f32.mrb[27].mxu0  ;;  %5361 = vrcp.f32 %v1160_v17  ;;  %v5344_v24 = vpop.eup %5343  ;;  %v4202_v13 = vmul.f32 -1.442695, %v1102_v37 }
 0x257   : > { %5363 = vrcp.f32 %v1158_v59  ;;  %v5346_v62 = vpop.eup %5345  ;;  %v1255_v23 = vadd.f32 1.0, %v5344_v24  ;;  %v4830_v9 = vpop.f32.mrb[24].mxu1  ;;  %v1021_v51 = vadd.f32 %v6760_v57, %v6578_v61 }
 0x258   : > { %5365 = vpow2.f32 %v4203_v58  ;;  %v5348_v26 = vpop.eup %5347  ;;  %v1253_v14 = vadd.f32 1.0, %v5346_v62  ;;  %v1114_v52 = vpop.f32.mrb[25].mxu1 }
 0x259   : > { %5367 = vpow2.f32 %v4201_v60  ;;  %v5350_v22 = vpop.eup %5349  ;;  %v1256_v25 = vadd.f32 1.0, %v5348_v26  ;;  %v4831_v31 = vpop.f32.mrb[26].mxu1  ;;  %v1123_v26 = vadd.f32 %v4830_v9, %v6601_v36  ;;  %v1115_v48 = vadd.f32 %v1114_v52, %v6571_v33 }
 0x25a   : > { %5369 = vrcp.f32 %v1255_v23  ;;  %v4810_v35 = vpop.f32.mrb[28].mxu0  ;;  %v5352_v11 = vpop.eup %5351  ;;  %v1254_v34 = vadd.f32 1.0, %v5350_v22  ;;  %v1126_v9 = vadd.f32 %v4831_v31, %v6631_v27 }
 0x25b   : > { %5371 = vrcp.f32 %v1253_v14  ;;  %v1117_v42 = vpop.f32.mrb[27].mxu1  ;;  %v1033_v41 = vpop.f32.mrb[29].mxu0  ;;  %v1183_v49 = vadd.f32 1.0, %v5352_v11 }
 0x25c   : > { %v5354_v10 = vpop.eup %5353  ;;  %5373 = vrcp.f32 %v1256_v25  ;;  %v6765_v0 = vpop.f32.mrb[30].mxu0  ;;  %v1118_v52 = vadd.f32 %v1117_v42, %v6578_v61 }
 0x25d   : > { %v5356_v38 = vpop.eup %5355  ;;  %5375 = vrcp.f32 %v1254_v34  ;;  %v1181_v39 = vadd.f32 1.0, %v5354_v10  ;;  %v6767_v45 = vpop.f32.mrb[31].mxu0  ;;  %v1029_v34 = vadd.f32 %v6758_v20, %v6631_v27 }
 0x25e   : > { %v6769_v15 = vpop.eup %5357  ;;  %5377 = vrcp.f32 %v1183_v49  ;;  %v1184_v50 = vadd.f32 1.0, %v5356_v38  ;;  %v1042_v49 = vadd.f32 %v4810_v35, %v6633_v28 }
 0x25f   : > { %v6771_v56 = vpop.eup %5359  ;;  %5379 = vrcp.f32 %v1181_v39  ;;  %v4834_v17 = vpop.f32.mrb[28].mxu1 }
 0x260   : > { %v6773_v32 = vpop.eup %5361  ;;  %5381 = vrcp.f32 %v1184_v50  ;;  %v1130_v59 = vpop.f32.mrb[29].mxu1  ;;  %v1139_v20 = vadd.f32 %v4834_v17, %v6633_v28  ;;  %v4195_v31 = vmul.f32 -1.442695, %v1042_v49 }
 0x261   : > { %v6776_v58 = vpop.eup %5363  ;;  %5383 = vpow2.f32 %v4204_v44  ;;  %v6778_v24 = vpop.f32.mrb[30].mxu1 }
 0x262   : > { %v5366_v60 = vpop.eup %5365  ;;  %5385 = vpow2.f32 %v4190_v53  ;;  %v6781_v14 = vpop.f32.mrb[31].mxu1 }
 0x263   : > { %v5368_v62 = vpop.eup %5367  ;;  %v1279_v23 = vadd.f32 1.0, %v5366_v60  ;;  %5387 = vpow2.f32 %v4202_v13  ;;  %v1034_v13 = vadd.f32 %v1033_v41, %v6580_v63  ;;  %v1131_v60 = vadd.f32 %v1130_v59, %v6580_v63 }
 0x264   : > { %v5370_v18 = vpop.eup %5369  ;;  %v1277_v22 = vadd.f32 1.0, %v5368_v62  ;;  %5389 = vtanh.f32 %v1026_v54 }
 0x265   : > { %v5372_v25 = vpop.eup %5371  ;;  %5391 = vrcp.f32 %v1279_v23  ;;  %v4207_v23 = vmul.f32 -1.442695, %v1139_v20  ;;  %v4193_v41 = vmul.f32 -1.442695, %v1034_v13  ;;  %v4205_v59 = vmul.f32 -1.442695, %v1131_v60 }
 0x266   : > { %v6786_v11 = vpop.eup %5373  ;;  %5393 = vrcp.f32 %v1277_v22 }
 0x267   : > { %v6790_v37 = vpop.eup %5375  ;;  %5395 = vtanh.f32 %v1123_v26 }
 0x268   : > { %v5378_v10 = vpop.eup %5377  ;;  %5397 = vtanh.f32 %v1018_v46 }
 0x269   : > { %v5380_v38 = vpop.eup %5379  ;;  %5399 = vtanh.f32 %v1115_v48  ;;  %v1223_v57 = vmul.f32 %v5378_v10, %v6659_v16 }
 0x26a   : > { %v5382_v39 = vpop.eup %5381  ;;  %5401 = vtanh.f32 %v1029_v34  ;;  %v1221_v16 = vmul.f32 %v5380_v38, %v6665_v19  ;;  %v1142_v19 = vadd.f32 %v6778_v24, %v6653_v8 }
 0x26b   : > { %v5384_v44 = vpop.eup %5383  ;;  %5403 = vtanh.f32 %v1126_v9 }
 0x26c   : > { %v5386_v50 = vpop.eup %5385  ;;  %v1280_v53 = vadd.f32 1.0, %v5384_v44  ;;  %5405 = vtanh.f32 %v1021_v51  ;;  %v4208_v13 = vmul.f32 -1.442695, %v1142_v19 }
 0x26d   : > { %v5388_v54 = vpop.eup %5387  ;;  %v1182_v35 = vadd.f32 1.0, %v5386_v50  ;;  %5407 = vtanh.f32 %v1118_v52 }
 0x26e   : > { %v5390_v42 = vpop.eup %5389  ;;  %5409 = vrcp.f32 %v1280_v53  ;;  %v1278_v62 = vadd.f32 1.0, %v5388_v54 }
 0x26f   : > { %v5392_v17 = vpop.eup %5391  ;;  %5411 = vrcp.f32 %v1182_v35  ;;  %v1227_v26 = vmul.f32 %v5390_v42, %v6769_v15  ;;  %v1045_v15 = vadd.f32 %v6765_v0, %v6653_v8 }
 0x270   : > { %v5394_v22 = vpop.eup %5393  ;;  %v1319_v46 = vmul.f32 %v5392_v17, %v6662_v43  ;;  %5413 = vrcp.f32 %v1278_v62  ;;  %v1224_v43 = vmul.f32 %v5382_v39, %v6675_v21 }
 0x271   : > { %v5396_v48 = vpop.eup %5395  ;;  %v6804_v34 = vadd.f32 %v1227_v26, %v1223_v57  ;;  %5415 = vpow2.f32 %v4195_v31  ;;  %v1317_v10 = vmul.f32 %v5394_v22, %v6670_v47  ;;  %v1037_v47 = vadd.f32 %v6767_v45, %v6598_v29 }
 0x272   : > { %v5398_v9 = vpop.eup %5397  ;;  %v1323_v51 = vmul.f32 %v5396_v48, %v5370_v18  ;;  %5417 = vpow2.f32 %v4207_v23  ;;  %v4196_v24 = vmul.f32 -1.442695, %v1045_v15 }
 0x273   : > { %v5400_v49 = vpop.eup %5399  ;;  %v1225_v52 = vmul.f32 %v5398_v9, %v6771_v56  ;;  %5419 = vpow2.f32 %v4193_v41  ;;  %v4194_v57 = vmul.f32 -1.442695, %v1037_v47 }
 0x274   : > { %v5402_v38 = vpop.eup %5401  ;;  %v6813_v20 = vadd.f32 %v1323_v51, %v1319_v46  ;;  %v1321_v44 = vmul.f32 %v5400_v49, %v5372_v25  ;;  %5421 = vpow2.f32 %v4205_v59 }
 0x275   : > { %v5404_v18 = vpop.eup %5403  ;;  %v6817_v50 = vadd.f32 %v1225_v52, %v1221_v16  ;;  %v1228_v0 = vmul.f32 %v5402_v38, %v6773_v32  ;;  %5423 = vtanh.f32 %v6804_v34 }
 0x276   : > { %v5406_v21 = vpop.eup %5405  ;;  %v6820_v39 = vadd.f32 %v1321_v44, %v1317_v10  ;;  %v1324_v56 = vmul.f32 %v5404_v18, %v6786_v11  ;;  %5425 = vtanh.f32 %v6813_v20 }
 0x277   : > { %v5408_v53 = vpop.eup %5407  ;;  %v6823_v31 = vadd.f32 %v1228_v0, %v1224_v43  ;;  %v1226_v25 = vmul.f32 %v5406_v21, %v6776_v58  ;;  %5427 = vpow2.f32 %v4196_v24 }
 0x278   : > { %v5410_v54 = vpop.eup %5409  ;;  %v1322_v45 = vmul.f32 %v5408_v53, %v6790_v37  ;;  %5429 = vpow2.f32 %v4208_v13 }
 0x279   : > { %v5412_v32 = vpop.eup %5411  ;;  %v1320_v35 = vmul.f32 %v5410_v54, %v6683_v55  ;;  %5431 = vpow2.f32 %v4194_v57  ;;  %v1134_v55 = vadd.f32 %v6781_v14, %v6598_v29 }
 0x27a   : > { %v5414_v60 = vpop.eup %5413  ;;  %v1222_v11 = vmul.f32 %v5412_v32, %v6685_v12  ;;  %5433 = vtanh.f32 %v6817_v50 }
 0x27b   : > { %v5416_v42 = vpop.eup %5415  ;;  %v1318_v62 = vmul.f32 %v5414_v60, %v6687_v40  ;;  %v6832_v58 = vadd.f32 %v1324_v56, %v1320_v35  ;;  %5435 = vtanh.f32 %v6820_v39  ;;  %v4206_v48 = vmul.f32 -1.442695, %v1134_v55 }
 0x27c   : > { %v5418_v23 = vpop.eup %5417  ;;  %v6834_v17 = vadd.f32 %v1226_v25, %v1222_v11  ;;  %v1211_v37 = vadd.f32 1.0, %v5416_v42  ;;  %5437 = vtanh.f32 %v6823_v31 }
 0x27d   : > { %v6839_v26 = vadd.f32 %v1322_v45, %v1318_v62  ;;  %v1307_v12 = vadd.f32 1.0, %v5418_v23  ;;  %v5420_v22 = vpop.eup %5419 }
 0x27e   : > { %v5422_v40 = vpop.eup %5421  ;;  %v1209_v46 = vadd.f32 1.0, %v5420_v22  ;;  %5439 = vrcp.f32 %v1211_v37 }
 0x27f   : > { %v1305_v41 = vadd.f32 1.0, %v5422_v40  ;;  %5441 = vrcp.f32 %v1307_v12  ;;  %v5424_v16 = vpop.eup %5423  ;;  %v6857_v40 = vld [vmem:[%s7980_s1 + $0x8] sm:$0xff]  }
 0x280   : > { %5443 = vrcp.f32 %v1209_v46  ;;  %v5426_v59 = vpop.eup %5425  ;;  %v6864_v46 = vld [vmem:[%s7980_s1 + $0x10] sm:$0xff]  }
 0x281   : > { %5445 = vrcp.f32 %v1305_v41  ;;  %v5428_v14 = vpop.eup %5427  ;;  %v6873_v41 = vld [vmem:[%s7980_s1 + $0x18] sm:$0xff]  }
 0x282   : > { %5447 = vpow2.f32 %v4206_v48  ;;  %v5430_v9 = vpop.eup %5429  ;;  %v1212_v10 = vadd.f32 1.0, %v5428_v14  ;;  %v6882_v48 = vld [vmem:[%s7980_s1 + $0x20] sm:$0xff]   ;;  %v6909_v14 = vld [vmem:[%s7980_s1 + $0x38] sm:$0xff]  }
 0x283   : > { %5449 = vtanh.f32 %v6832_v58  ;;  %v5432_v51 = vpop.eup %5431  ;;  %v1308_v15 = vadd.f32 1.0, %v5430_v9  ;;  %v6918_v9 = vld [vmem:[%s7980_s1] sm:$0xff]  }
 0x284   : > { %5451 = vtanh.f32 %v6834_v17  ;;  %v5434_v49 = vpop.eup %5433  ;;  %v1210_v43 = vadd.f32 1.0, %v5432_v51  ;;  %v5179_v51 = vld [vmem:[%s6422_s5 + $0x64] ss:$8 sps:$4 sm:$0xff]  }
 0x285   : > { %5453 = vrcp.f32 %v1212_v10  ;;  %v5436_v52 = vpop.eup %5435  ;;  %v5177_v10 = vld [vmem:[%s6422_s5 + $0x60] ss:$8 sps:$4 sm:$0xff]  }
 0x286   : > { %5455 = vrcp.f32 %v1308_v15  ;;  %v5438_v19 = vpop.eup %5437  ;;  %v5180_v15 = vld [vmem:[%s6422_s5 + $0x70] ss:$8 sps:$4 sm:$0xff]  }
 0x287   : > { %5457 = vrcp.f32 %v1210_v43 }
 0x288   : > { %v5440_v38 = vpop.eup %5439  ;;  %5459 = vtanh.f32 %v6839_v26 }
 0x289   : > { %v5442_v44 = vpop.eup %5441  ;;  %v1239_v47 = vmul.f32 %v5440_v38, %v5424_v16  ;;  %v6891_v16 = vld [vmem:[%s7980_s1 + $0x28] sm:$0xff]  }
 0x28a   : > { %v5444_v18 = vpop.eup %5443  ;;  %v1335_v0 = vmul.f32 %v5442_v44, %v5426_v59  ;;  %v6900_v59 = vld [vmem:[%s7980_s1 + $0x30] sm:$0xff]  }
 0x28b   : > { %v5446_v21 = vpop.eup %5445  ;;  %v1237_v56 = vmul.f32 %v5444_v18, %v5434_v49  ;;  %4213 = vst [vmem:[%s6695_s12 + $0x60] sm:$0xff] %v1239_v47  ;;  %v5182_v49 = vld [vmem:[%s6422_s5 + $0x74] ss:$8 sps:$4 sm:$0xff]  }
 0x28c   : > { %v5448_v24 = vpop.eup %5447  ;;  %v1333_v53 = vmul.f32 %v5446_v21, %v5436_v52  ;;  %4214 = vst [vmem:[%s6695_s12 + $0x68] sm:$0xff] %v1335_v0 }
 0x28d   : > { %v5450_v25 = vpop.eup %5449  ;;  %v1306_v13 = vadd.f32 1.0, %v5448_v24  ;;  %4209 = vst [vmem:[%s6695_s12 + $0x40] sm:$0xff] %v1237_v56 }
 0x28e   : > { %v5452_v54 = vpop.eup %5451  ;;  %4210 = vst [vmem:[%s6695_s12 + $0x48] sm:$0xff] %v1333_v53 }
 0x28f   : > { %v5454_v45 = vpop.eup %5453  ;;  %5461 = vrcp.f32 %v1306_v13 }
 0x290   : > { %v5456_v57 = vpop.eup %5455  ;;  %v1240_v32 = vmul.f32 %v5454_v45, %v5438_v19 }
 0x291   : > { %v5458_v35 = vpop.eup %5457  ;;  %v1336_v60 = vmul.f32 %v5456_v57, %v5450_v25 }
 0x292   : > { %v1238_v11 = vmul.f32 %v5458_v35, %v5452_v54  ;;  %4215 = vst [vmem:[%s6695_s12 + $0x70] sm:$0xff] %v1240_v32  ;;  %v1353_v42 = vpack.c.bf16 %v1240_v32, %v1239_v47  ;;  %v5460_v37 = vpop.eup %5459 }
 0x293   : > { %4216 = vst [vmem:[%s6695_s12 + $0x78] sm:$0xff] %v1336_v60  ;;  %v1354_v62 = vpack.c.bf16 %v1336_v60, %v1335_v0 }
 0x294   : > { %4211 = vst [vmem:[%s6695_s12 + $0x50] sm:$0xff] %v1238_v11  ;;  %v1351_v23 = vpack.c.bf16 %v1238_v11, %v1237_v56 }
 0x296   : > { %4840 = vmatprep.subr.bf16.mxu0 %v1351_v23 }
 0x297   : > { %4841 = vmatpush3.bf16.msra.mxu0 %v1351_v23 }
 0x298   : > { %4842 = vmatprep.subr.bf16.mxu0 %v1353_v42 }
 0x299   : > { %v5462_v55 = vpop.eup %5461 }
 0x29a   : > { %v1334_v12 = vmul.f32 %v5462_v55, %v5460_v37 }
 0x29b   : > { %4843 = vmatpush3.bf16.msra.mxu0 %v1353_v42 }
 0x29c   : > { %4212 = vst [vmem:[%s6695_s12 + $0x58] sm:$0xff] %v1334_v12  ;;  %v1352_v22 = vpack.c.bf16 %v1334_v12, %v1333_v53  ;;  %4884 = vmatprep.subr.bf16.mxu0 %v5177_v10 }
 0x29e   : > { %4864 = vmatprep.subr.bf16.mxu1 %v1352_v22  ;;  %4845 = vmatmul.mubr.msk.bf16.vlgmr.msra.gmra.mrb[32].mxu0 %vm503_vm0, %v6857_v40 }
 0x29f   : > { %4865 = vmatpush3.bf16.msra.mxu1 %v1352_v22  ;;  %4848 = vmatprep.mubr.msk.bf16.mxu0 %vm503_vm0, %v6864_v46 }
 0x2a0   : > { %4866 = vmatprep.subr.bf16.mxu1 %v1354_v62  ;;  %4885 = vmatpush3.bf16.msra.mxu0 %v5177_v10 }
 0x2a1   : > { %4886 = vmatprep.subr.bf16.mxu0 %v5180_v15 }
 0x2a3   : > { %4867 = vmatpush3.bf16.msra.mxu1 %v1354_v62 }
 0x2a4   : > { %4908 = vmatprep.subr.bf16.mxu1 %v5179_v51  ;;  %4887 = vmatpush3.bf16.msra.mxu0 %v5180_v15 }
 0x2a6   : > { %4869 = vmatmul.mubr.msk.bf16.vlgmr.msra.gmra.mrb[32].mxu1 %vm503_vm0, %v6857_v40  ;;  %4849 = vmatmul.mubr.msk.bf16.gmra.mrb[36].mxu0 %vm503_vm0, %v6873_v41 }
 0x2a7   : > { %4872 = vmatprep.mubr.msk.bf16.mxu1 %vm503_vm0, %v6864_v46  ;;  %4852 = vmatprep.mubr.msk.bf16.mxu0 %vm503_vm0, %v6882_v48 }
 0x2a8   : > { %4909 = vmatpush3.bf16.msra.mxu1 %v5179_v51 }
 0x2a9   : > { %4910 = vmatprep.subr.bf16.mxu1 %v5182_v49 }
 0x2ac   : > { %4911 = vmatpush3.bf16.msra.mxu1 %v5182_v49 }
 0x2ae   : > { %4873 = vmatmul.mubr.msk.bf16.gmra.mrb[36].mxu1 %vm503_vm0, %v6873_v41  ;;  %4853 = vmatmul.mubr.msk.bf16.gmra.mrb[40].mxu0 %vm503_vm0, %v6891_v16 }
 0x2af   : > { %4876 = vmatprep.mubr.msk.bf16.mxu1 %vm503_vm0, %v6882_v48  ;;  %4856 = vmatprep.mubr.msk.bf16.mxu0 %vm503_vm0, %v6900_v59 }
 0x2b6   : > { %4877 = vmatmul.mubr.msk.bf16.gmra.mrb[40].mxu1 %vm503_vm0, %v6891_v16  ;;  %4857 = vmatmul.mubr.msk.bf16.gmra.mrb[44].mxu0 %vm503_vm0, %v6909_v14 }
 0x2b7   : > { %4880 = vmatprep.mubr.msk.bf16.mxu1 %vm503_vm0, %v6900_v59  ;;  %4892 = vmatprep.mubr.msk.bf16.mxu0 %vm503_vm0, %v6918_v9 }
 0x2be   : > { %4881 = vmatmul.mubr.msk.bf16.gmra.mrb[44].mxu1 %vm503_vm0, %v6909_v14 }
 0x2bf   : > { %4916 = vmatprep.mubr.msk.bf16.mxu1 %vm503_vm0, %v6918_v9 }
 0x371   : > { %v4846_v43 = vpop.f32.mrb[32].mxu0 }
 0x372   : > { %v1418_v52 = vadd.f32 %v4846_v43, %v6555_v5  ;;  %v1409_v19 = vpop.f32.mrb[33].mxu0 }
 0x373   : > { %v1410_v38 = vadd.f32 %v1409_v19, %v6547_v1  ;;  %v4847_v44 = vpop.f32.mrb[34].mxu0 }
 0x374   : > { %v4243_v47 = vmul.f32 -1.442695, %v1418_v52  ;;  %v1421_v18 = vadd.f32 %v4847_v44, %v6557_v6  ;;  %v1412_v0 = vpop.f32.mrb[35].mxu0 }
 0x375   : > { %v4241_v21 = vmul.f32 -1.442695, %v1410_v38  ;;  %v1413_v56 = vadd.f32 %v1412_v0, %v6551_v3 }
 0x376   : > { %5463 = vpow2.f32 %v4243_v47  ;;  %v4244_v24 = vmul.f32 -1.442695, %v1421_v18 }
 0x377   : > { %5465 = vpow2.f32 %v4241_v21  ;;  %v4242_v53 = vmul.f32 -1.442695, %v1413_v56 }
 0x378   : > { %5467 = vpow2.f32 %v4244_v24 }
 0x379   : > { %v4870_v25 = vpop.f32.mrb[32].mxu1  ;;  %5469 = vpow2.f32 %v4242_v53  ;;  %v4850_v13 = vpop.f32.mrb[36].mxu0 }
 0x37a   : > { %v1515_v54 = vadd.f32 %v4870_v25, %v6555_v5  ;;  %v1506_v45 = vpop.f32.mrb[33].mxu1  ;;  %v1434_v57 = vadd.f32 %v4850_v13, %v6559_v7  ;;  %v1425_v32 = vpop.f32.mrb[37].mxu0 }
 0x37b   : > { %v1507_v35 = vadd.f32 %v1506_v45, %v6547_v1  ;;  %v4871_v60 = vpop.f32.mrb[34].mxu1  ;;  %v4851_v11 = vpop.f32.mrb[38].mxu0  ;;  %v1426_v15 = vadd.f32 %v1425_v32, %v6549_v2 }
 0x37c   : > { %v4255_v42 = vmul.f32 -1.442695, %v1515_v54  ;;  %v1518_v62 = vadd.f32 %v4871_v60, %v6557_v6  ;;  %v1509_v23 = vpop.f32.mrb[35].mxu1  ;;  %v1428_v37 = vpop.f32.mrb[39].mxu0  ;;  %v4247_v10 = vmul.f32 -1.442695, %v1434_v57  ;;  %v1437_v21 = vadd.f32 %v4851_v11, %v6569_v30 }
 0x37d   : > { %v4253_v55 = vmul.f32 -1.442695, %v1507_v35  ;;  %v1510_v12 = vadd.f32 %v1509_v23, %v6551_v3  ;;  %v4245_v25 = vmul.f32 -1.442695, %v1426_v15 }
 0x37e   : > { %5471 = vpow2.f32 %v4255_v42  ;;  %v4256_v22 = vmul.f32 -1.442695, %v1518_v62  ;;  %v4248_v11 = vmul.f32 -1.442695, %v1437_v21 }
 0x37f   : > { %5473 = vpow2.f32 %v4253_v55  ;;  %v4254_v51 = vmul.f32 -1.442695, %v1510_v12 }
 0x380   : > { %v5464_v49 = vpop.eup %5463  ;;  %5475 = vpow2.f32 %v4256_v22  ;;  %v1429_v22 = vadd.f32 %v1428_v37, %v6553_v4 }
 0x381   : > { %v5466_v43 = vpop.eup %5465  ;;  %v1583_v52 = vadd.f32 1.0, %v5464_v49  ;;  %5477 = vpow2.f32 %v4254_v51  ;;  %v4874_v19 = vpop.f32.mrb[36].mxu1 }
 0x382   : > { %v4854_v38 = vpop.f32.mrb[40].mxu0  ;;  %v5468_v44 = vpop.eup %5467  ;;  %v1581_v47 = vadd.f32 1.0, %v5466_v43  ;;  %5479 = vpow2.f32 %v4247_v10  ;;  %v1531_v18 = vadd.f32 %v4874_v19, %v6559_v7 }
 0x383   : > { %v1522_v0 = vpop.f32.mrb[37].mxu1  ;;  %v6942_v56 = vpop.f32.mrb[41].mxu0  ;;  %5481 = vrcp.f32 %v1583_v52  ;;  %v1584_v53 = vadd.f32 1.0, %v5468_v44 }
 0x384   : > { %v5470_v24 = vpop.eup %5469  ;;  %v1523_v13 = vadd.f32 %v1522_v0, %v6549_v2  ;;  %v4875_v54 = vpop.f32.mrb[38].mxu1  ;;  %5483 = vrcp.f32 %v1581_v47  ;;  %v4259_v32 = vmul.f32 -1.442695, %v1531_v18 }
 0x385   : > { %v6945_v45 = vpop.f32.mrb[42].mxu0  ;;  %v1582_v57 = vadd.f32 1.0, %v5470_v24  ;;  %v1525_v35 = vpop.f32.mrb[39].mxu1  ;;  %5485 = vrcp.f32 %v1584_v53  ;;  %v1534_v23 = vadd.f32 %v4875_v54, %v6569_v30 }
 0x386   : > { %v6947_v60 = vpop.f32.mrb[43].mxu0  ;;  %v4257_v42 = vmul.f32 -1.442695, %v1523_v13  ;;  %v1526_v43 = vadd.f32 %v1525_v35, %v6553_v4 }
 0x387   : > { %5487 = vrcp.f32 %v1582_v57  ;;  %v4260_v24 = vmul.f32 -1.442695, %v1534_v23  ;;  %v4246_v57 = vmul.f32 -1.442695, %v1429_v22 }
 0x388   : > { %5489 = vpow2.f32 %v4259_v32  ;;  %v5472_v62 = vpop.eup %5471  ;;  %v4258_v35 = vmul.f32 -1.442695, %v1526_v43 }
 0x389   : > { %5491 = vpow2.f32 %v4245_v25  ;;  %v5474_v55 = vpop.eup %5473  ;;  %v1679_v12 = vadd.f32 1.0, %v5472_v62  ;;  %v4878_v10 = vpop.f32.mrb[40].mxu1 }
 0x38a   : > { %5493 = vpow2.f32 %v4257_v42  ;;  %v6951_v51 = vpop.f32.mrb[44].mxu0  ;;  %v5476_v15 = vpop.eup %5475  ;;  %v1677_v49 = vadd.f32 1.0, %v5474_v55 }
 0x38b   : > { %5495 = vpow2.f32 %v4248_v11  ;;  %v1538_v52 = vpop.f32.mrb[41].mxu1  ;;  %v6954_v19 = vpop.f32.mrb[45].mxu0  ;;  %v1680_v47 = vadd.f32 1.0, %v5476_v15  ;;  %v1450_v11 = vadd.f32 %v4854_v38, %v6601_v36  ;;  %v1547_v38 = vadd.f32 %v4878_v10, %v6601_v36 }
 0x38c   : > { %v5478_v44 = vpop.eup %5477  ;;  %5497 = vrcp.f32 %v1679_v12  ;;  %v4879_v18 = vpop.f32.mrb[42].mxu1 }
 0x38d   : > { %v6956_v0 = vpop.f32.mrb[46].mxu0  ;;  %v5480_v21 = vpop.eup %5479  ;;  %5499 = vrcp.f32 %v1677_v49  ;;  %v1678_v37 = vadd.f32 1.0, %v5478_v44  ;;  %v1550_v10 = vadd.f32 %v4879_v18, %v6631_v27 }
 0x38e   : > { %v1541_v53 = vpop.f32.mrb[43].mxu1  ;;  %v6958_v25 = vpop.f32.mrb[47].mxu0  ;;  %5501 = vrcp.f32 %v1680_v47  ;;  %v1607_v54 = vadd.f32 1.0, %v5480_v21 }
 0x38f   : > { %v5482_v13 = vpop.eup %5481  ;;  %5503 = vrcp.f32 %v1678_v37 }
 0x390   : > { %v6960_v32 = vpop.eup %5483  ;;  %5505 = vrcp.f32 %v1607_v54 }
 0x391   : > { %v6962_v42 = vpop.eup %5485  ;;  %5507 = vpow2.f32 %v4260_v24  ;;  %v4882_v55 = vpop.f32.mrb[44].mxu1 }
 0x392   : > { %v6965_v62 = vpop.eup %5487  ;;  %5509 = vpow2.f32 %v4246_v57  ;;  %v1554_v49 = vpop.f32.mrb[45].mxu1  ;;  %v1442_v57 = vadd.f32 %v6942_v56, %v6571_v33  ;;  %v1563_v18 = vadd.f32 %v4882_v55, %v6633_v28 }
 0x393   : > { %v5490_v23 = vpop.eup %5489  ;;  %5511 = vpow2.f32 %v4258_v35  ;;  %v6967_v47 = vpop.f32.mrb[46].mxu1 }
 0x394   : > { %v5492_v12 = vpop.eup %5491  ;;  %v1703_v15 = vadd.f32 1.0, %v5490_v23  ;;  %5513 = vtanh.f32 %v1450_v11  ;;  %v6970_v37 = vpop.f32.mrb[47].mxu1  ;;  %v1539_v23 = vadd.f32 %v1538_v52, %v6571_v33  ;;  %v1445_v52 = vadd.f32 %v6947_v60, %v6578_v61 }
 0x395   : > { %v5494_v22 = vpop.eup %5493  ;;  %v1605_v44 = vadd.f32 1.0, %v5492_v12  ;;  %v1453_v12 = vadd.f32 %v6945_v45, %v6631_v27  ;;  %v4263_v55 = vmul.f32 -1.442695, %v1563_v18 }
 0x396   : > { %v5496_v43 = vpop.eup %5495  ;;  %5515 = vrcp.f32 %v1703_v15  ;;  %v1701_v21 = vadd.f32 1.0, %v5494_v22 }
 0x397   : > { %v5498_v24 = vpop.eup %5497  ;;  %5517 = vrcp.f32 %v1605_v44  ;;  %v1608_v54 = vadd.f32 1.0, %v5496_v43 }
 0x398   : > { %v5500_v35 = vpop.eup %5499  ;;  %5519 = vrcp.f32 %v1701_v21  ;;  %v1466_v21 = vadd.f32 %v6951_v51, %v6633_v28  ;;  %v1555_v51 = vadd.f32 %v1554_v49, %v6580_v63 }
 0x399   : > { %v6975_v11 = vpop.eup %5501  ;;  %5521 = vrcp.f32 %v1608_v54 }
 0x39a   : > { %v6979_v15 = vpop.eup %5503  ;;  %5523 = vtanh.f32 %v1547_v38 }
 0x39b   : > { %v5506_v22 = vpop.eup %5505  ;;  %5525 = vtanh.f32 %v1442_v57 }
 0x39c   : > { %v5508_v44 = vpop.eup %5507  ;;  %5527 = vtanh.f32 %v1539_v23  ;;  %v1647_v45 = vmul.f32 %v5506_v22, %v6804_v34  ;;  %v1542_v23 = vadd.f32 %v1541_v53, %v6578_v61  ;;  %v4251_v34 = vmul.f32 -1.442695, %v1466_v21 }
 0x39d   : > { %v5510_v56 = vpop.eup %5509  ;;  %v1704_v43 = vadd.f32 1.0, %v5508_v44  ;;  %5529 = vtanh.f32 %v1453_v12  ;;  %v1458_v12 = vadd.f32 %v6954_v19, %v6580_v63  ;;  %v1469_v21 = vadd.f32 %v6956_v0, %v6653_v8 }
 0x39e   : > { %v5512_v54 = vpop.eup %5511  ;;  %v1606_v33 = vadd.f32 1.0, %v5510_v56  ;;  %5531 = vtanh.f32 %v1550_v10 }
 0x39f   : > { %v5514_v38 = vpop.eup %5513  ;;  %5533 = vrcp.f32 %v1704_v43  ;;  %v1702_v57 = vadd.f32 1.0, %v5512_v54  ;;  %v4249_v53 = vmul.f32 -1.442695, %v1458_v12 }
 0x3a0   : > { %v5516_v44 = vpop.eup %5515  ;;  %5535 = vrcp.f32 %v1606_v33  ;;  %v1651_v60 = vmul.f32 %v5514_v38, %v5482_v13  ;;  %v4261_v33 = vmul.f32 -1.442695, %v1555_v51 }
 0x3a1   : > { %v5518_v27 = vpop.eup %5517  ;;  %5537 = vrcp.f32 %v1702_v57  ;;  %v1743_v43 = vmul.f32 %v5516_v44, %v6813_v20  ;;  %v4252_v44 = vmul.f32 -1.442695, %v1469_v21 }
 0x3a2   : > { %v5520_v22 = vpop.eup %5519  ;;  %v6992_v10 = vadd.f32 %v1651_v60, %v1647_v45  ;;  %5539 = vtanh.f32 %v1445_v52  ;;  %v1645_v19 = vmul.f32 %v5518_v27, %v6817_v50  ;;  %v1566_v27 = vadd.f32 %v6967_v47, %v6653_v8 }
 0x3a3   : > { %v5522_v56 = vpop.eup %5521  ;;  %5541 = vtanh.f32 %v1542_v23  ;;  %v1741_v49 = vmul.f32 %v5520_v22, %v6820_v39 }
 0x3a4   : > { %v5524_v54 = vpop.eup %5523  ;;  %5543 = vpow2.f32 %v4251_v34  ;;  %v1648_v52 = vmul.f32 %v5522_v56, %v6823_v31  ;;  %v1461_v31 = vadd.f32 %v6958_v25, %v6598_v29  ;;  %v4264_v22 = vmul.f32 -1.442695, %v1566_v27 }
 0x3a5   : > { %v5526_v13 = vpop.eup %5525  ;;  %v1747_v38 = vmul.f32 %v5524_v54, %v5498_v24  ;;  %5545 = vpow2.f32 %v4263_v55 }
 0x3a6   : > { %v5528_v45 = vpop.eup %5527  ;;  %v1649_v18 = vmul.f32 %v5526_v13, %v6960_v32  ;;  %5547 = vpow2.f32 %v4249_v53  ;;  %v4250_v56 = vmul.f32 -1.442695, %v1461_v31 }
 0x3a7   : > { %v5530_v20 = vpop.eup %5529  ;;  %v7001_v57 = vadd.f32 %v1747_v38, %v1743_v43  ;;  %v1745_v23 = vmul.f32 %v5528_v45, %v5500_v35  ;;  %5549 = vpow2.f32 %v4261_v33 }
 0x3a8   : > { %v5532_v50 = vpop.eup %5531  ;;  %v7005_v39 = vadd.f32 %v1649_v18, %v1645_v19  ;;  %v1652_v24 = vmul.f32 %v5530_v20, %v6962_v42  ;;  %5551 = vtanh.f32 %v6992_v10 }
 0x3a9   : > { %v5534_v0 = vpop.eup %5533  ;;  %v7010_v32 = vadd.f32 %v1745_v23, %v1741_v49  ;;  %v1748_v12 = vmul.f32 %v5532_v50, %v6975_v11  ;;  %5553 = vpow2.f32 %v4252_v44 }
 0x3aa   : > { %v5536_v35 = vpop.eup %5535  ;;  %v1744_v60 = vmul.f32 %v5534_v0, %v6832_v58  ;;  %v7014_v51 = vadd.f32 %v1652_v24, %v1648_v52  ;;  %5555 = vtanh.f32 %v7001_v57 }
 0x3ab   : > { %v5538_v47 = vpop.eup %5537  ;;  %v1646_v34 = vmul.f32 %v5536_v35, %v6834_v17  ;;  %5557 = vpow2.f32 %v4264_v22  ;;  %v1558_v17 = vadd.f32 %v6970_v37, %v6598_v29 }
 0x3ac   : > { %v5540_v42 = vpop.eup %5539  ;;  %v1742_v55 = vmul.f32 %v5538_v47, %v6839_v26  ;;  %v7019_v25 = vadd.f32 %v1748_v12, %v1744_v60  ;;  %5559 = vpow2.f32 %v4250_v56 }
 0x3ad   : > { %v5542_v43 = vpop.eup %5541  ;;  %v1650_v11 = vmul.f32 %v5540_v42, %v6965_v62  ;;  %5561 = vtanh.f32 %v7005_v39  ;;  %v4262_v21 = vmul.f32 -1.442695, %v1558_v17 }
 0x3ae   : > { %v1746_v58 = vmul.f32 %v5542_v43, %v6979_v15  ;;  %v5544_v53 = vpop.eup %5543  ;;  %5563 = vtanh.f32 %v7010_v32 }
 0x3af   : > { %v7024_v54 = vadd.f32 %v1650_v11, %v1646_v34  ;;  %v5546_v26 = vpop.eup %5545  ;;  %v1635_v33 = vadd.f32 1.0, %v5544_v53 }
 0x3b0   : > { %v7028_v19 = vadd.f32 %v1746_v58, %v1742_v55  ;;  %v5548_v13 = vpop.eup %5547  ;;  %v1731_v62 = vadd.f32 1.0, %v5546_v26 }
 0x3b1   : > { %v5550_v49 = vpop.eup %5549  ;;  %v1633_v15 = vadd.f32 1.0, %v5548_v13  ;;  %5565 = vrcp.f32 %v1635_v33 }
 0x3b2   : > { %v1729_v38 = vadd.f32 1.0, %v5550_v49  ;;  %5567 = vrcp.f32 %v1731_v62  ;;  %v5552_v45 = vpop.eup %5551 }
 0x3b3   : > { %5569 = vrcp.f32 %v1633_v15  ;;  %v5554_v37 = vpop.eup %5553 }
 0x3b4   : > { %5571 = vrcp.f32 %v1729_v38  ;;  %v5556_v52 = vpop.eup %5555  ;;  %v1636_v18 = vadd.f32 1.0, %v5554_v37 }
 0x3b5   : > { %5573 = vpow2.f32 %v4262_v21  ;;  %v5558_v20 = vpop.eup %5557 }
 0x3b6   : > { %5575 = vtanh.f32 %v7014_v51  ;;  %v5560_v23 = vpop.eup %5559  ;;  %v1732_v27 = vadd.f32 1.0, %v5558_v20 }
 0x3b7   : > { %5577 = vtanh.f32 %v7019_v25  ;;  %v5562_v50 = vpop.eup %5561  ;;  %v1634_v24 = vadd.f32 1.0, %v5560_v23 }
 0x3b8   : > { %5579 = vrcp.f32 %v1636_v18  ;;  %v5564_v31 = vpop.eup %5563 }
 0x3b9   : > { %5581 = vtanh.f32 %v7024_v54 }
 0x3ba   : > { %5583 = vrcp.f32 %v1732_v27 }
 0x3bb   : > { %v5566_v0 = vpop.eup %5565  ;;  %5585 = vrcp.f32 %v1634_v24 }
 0x3bc   : > { %v5568_v12 = vpop.eup %5567  ;;  %v1663_v44 = vmul.f32 %v5566_v0, %v5552_v45  ;;  %5587 = vtanh.f32 %v7028_v19 }
 0x3bd   : > { %v5570_v35 = vpop.eup %5569  ;;  %v1759_v60 = vmul.f32 %v5568_v12, %v5556_v52 }
 0x3be   : > { %v5572_v47 = vpop.eup %5571  ;;  %v1661_v34 = vmul.f32 %v5570_v35, %v5562_v50  ;;  %4269 = vst [vmem:[%s6695_s12 + $0xa0] sm:$0xff] %v1663_v44 }
 0x3bf   : > { %v5574_v22 = vpop.eup %5573  ;;  %v1757_v42 = vmul.f32 %v5572_v47, %v5564_v31  ;;  %4270 = vst [vmem:[%s6695_s12 + $0xa8] sm:$0xff] %v1759_v60 }
 0x3c0   : > { %v5576_v55 = vpop.eup %5575  ;;  %v1730_v56 = vadd.f32 1.0, %v5574_v22  ;;  %4265 = vst [vmem:[%s6695_s12 + $0x80] sm:$0xff] %v1661_v34 }
 0x3c1   : > { %v5578_v43 = vpop.eup %5577  ;;  %4266 = vst [vmem:[%s6695_s12 + $0x88] sm:$0xff] %v1757_v42 }
 0x3c2   : > { %v5580_v11 = vpop.eup %5579  ;;  %5589 = vrcp.f32 %v1730_v56 }
 0x3c3   : > { %v5582_v58 = vpop.eup %5581  ;;  %v1664_v53 = vmul.f32 %v5580_v11, %v5576_v55 }
 0x3c4   : > { %v5584_v17 = vpop.eup %5583 }
 0x3c5   : > { %v5586_v26 = vpop.eup %5585  ;;  %4271 = vst [vmem:[%s6695_s12 + $0xb0] sm:$0xff] %v1664_v53  ;;  %v1777_v33 = vpack.c.bf16 %v1664_v53, %v1663_v44  ;;  %v1760_v13 = vmul.f32 %v5584_v17, %v5578_v43 }
 0x3c6   : > { %v1662_v62 = vmul.f32 %v5586_v26, %v5582_v58  ;;  %v5588_v38 = vpop.eup %5587 }
 0x3c7   : > { %4272 = vst [vmem:[%s6695_s12 + $0xb8] sm:$0xff] %v1760_v13  ;;  %v1778_v49 = vpack.c.bf16 %v1760_v13, %v1759_v60 }
 0x3c8   : > { %4267 = vst [vmem:[%s6695_s12 + $0x90] sm:$0xff] %v1662_v62  ;;  %v1775_v15 = vpack.c.bf16 %v1662_v62, %v1661_v34 }
 0x3ca   : > { %4888 = vmatprep.subr.bf16.mxu0 %v1775_v15 }
 0x3cb   : > { %4889 = vmatpush3.bf16.msra.mxu0 %v1775_v15 }
 0x3cc   : > { %v5590_v21 = vpop.eup %5589  ;;  %4890 = vmatprep.subr.bf16.mxu0 %v1777_v33 }
 0x3cd   : > { %v1758_v45 = vmul.f32 %v5590_v21, %v5588_v38 }
 0x3cf   : > { %4268 = vst [vmem:[%s6695_s12 + $0x98] sm:$0xff] %v1758_v45  ;;  %v1776_v37 = vpack.c.bf16 %v1758_v45, %v1757_v42  ;;  %4891 = vmatpush3.bf16.msra.mxu0 %v1777_v33 }
 0x3d1   : > { %4912 = vmatprep.subr.bf16.mxu1 %v1776_v37 }
 0x3d2   : > { %4913 = vmatpush3.bf16.msra.mxu1 %v1776_v37  ;;  %4893 = vmatmul.mubr.msk.bf16.vlgmr.msra.gmra.mrb[48].mxu0 %vm503_vm0, %v6857_v40 }
 0x3d3   : > { %4914 = vmatprep.subr.bf16.mxu1 %v1778_v49  ;;  %4896 = vmatprep.mubr.msk.bf16.mxu0 %vm503_vm0, %v6864_v46 }
 0x3d6   : > { %4915 = vmatpush3.bf16.msra.mxu1 %v1778_v49 }
 0x3d9   : > { %4917 = vmatmul.mubr.msk.bf16.vlgmr.msra.gmra.mrb[48].mxu1 %vm503_vm0, %v6857_v40  ;;  %v5183_v40 = vld [vmem:[%s6422_s5 + $0x80] ss:$8 sps:$4 sm:$0xff]  }
 0x3da   : > { %4920 = vmatprep.mubr.msk.bf16.mxu1 %vm503_vm0, %v6864_v46  ;;  %4897 = vmatmul.mubr.msk.bf16.gmra.mrb[52].mxu0 %vm503_vm0, %v6873_v41  ;;  %v5185_v46 = vld [vmem:[%s6422_s5 + $0x84] ss:$8 sps:$4 sm:$0xff]  }
 0x3db   : > { %4900 = vmatprep.mubr.msk.bf16.mxu0 %vm503_vm0, %v6882_v48  ;;  %4932 = vmatprep.subr.bf16.mxu0 %v5183_v40 }
 0x3dc   : > { %4956 = vmatprep.subr.bf16.mxu1 %v5185_v46  ;;  %4933 = vmatpush3.bf16.msra.mxu0 %v5183_v40 }
 0x3dd   : > { %4957 = vmatpush3.bf16.msra.mxu1 %v5185_v46 }
 0x3e1   : > { %4921 = vmatmul.mubr.msk.bf16.gmra.mrb[52].mxu1 %vm503_vm0, %v6873_v41  ;;  %v5186_v41 = vld [vmem:[%s6422_s5 + $0x90] ss:$8 sps:$4 sm:$0xff]  }
 0x3e2   : > { %4924 = vmatprep.mubr.msk.bf16.mxu1 %vm503_vm0, %v6882_v48  ;;  %4901 = vmatmul.mubr.msk.bf16.gmra.mrb[56].mxu0 %vm503_vm0, %v6891_v16  ;;  %v5188_v48 = vld [vmem:[%s6422_s5 + $0x94] ss:$8 sps:$4 sm:$0xff]  }
 0x3e3   : > { %4904 = vmatprep.mubr.msk.bf16.mxu0 %vm503_vm0, %v6900_v59  ;;  %4934 = vmatprep.subr.bf16.mxu0 %v5186_v41 }
 0x3e4   : > { %4958 = vmatprep.subr.bf16.mxu1 %v5188_v48  ;;  %4935 = vmatpush3.bf16.msra.mxu0 %v5186_v41 }
 0x3e5   : > { %4959 = vmatpush3.bf16.msra.mxu1 %v5188_v48 }
 0x3e9   : > { %4925 = vmatmul.mubr.msk.bf16.gmra.mrb[56].mxu1 %vm503_vm0, %v6891_v16 }
 0x3ea   : > { %4928 = vmatprep.mubr.msk.bf16.mxu1 %vm503_vm0, %v6900_v59  ;;  %4905 = vmatmul.mubr.msk.bf16.gmra.mrb[60].mxu0 %vm503_vm0, %v6909_v14 }
 0x3eb   : > { %4940 = vmatprep.mubr.msk.bf16.mxu0 %vm503_vm0, %v6918_v9 }
 0x3f1   : > { %4929 = vmatmul.mubr.msk.bf16.gmra.mrb[60].mxu1 %vm503_vm0, %v6909_v14 }
 0x3f2   : > { %4964 = vmatprep.mubr.msk.bf16.mxu1 %vm503_vm0, %v6918_v9 }
 0x4a5   : > { %v4894_v16 = vpop.f32.mrb[48].mxu0 }
 0x4a6   : > { %v1842_v59 = vadd.f32 %v4894_v16, %v6555_v5  ;;  %v1833_v52 = vpop.f32.mrb[49].mxu0 }
 0x4a7   : > { %v1834_v14 = vadd.f32 %v1833_v52, %v6547_v1  ;;  %v4895_v18 = vpop.f32.mrb[50].mxu0 }
 0x4a8   : > { %v4299_v9 = vmul.f32 -1.442695, %v1842_v59  ;;  %v1845_v20 = vadd.f32 %v4895_v18, %v6557_v6  ;;  %v1836_v23 = vpop.f32.mrb[51].mxu0 }
 0x4a9   : > { %v4297_v27 = vmul.f32 -1.442695, %v1834_v14  ;;  %v1837_v50 = vadd.f32 %v1836_v23, %v6551_v3 }
 0x4aa   : > { %5591 = vpow2.f32 %v4299_v9  ;;  %v4300_v24 = vmul.f32 -1.442695, %v1845_v20 }
 0x4ab   : > { %5593 = vpow2.f32 %v4297_v27  ;;  %v4298_v31 = vmul.f32 -1.442695, %v1837_v50 }
 0x4ac   : > { %v4918_v0 = vpop.f32.mrb[48].mxu1  ;;  %5595 = vpow2.f32 %v4300_v24 }
 0x4ad   : > { %v1939_v12 = vadd.f32 %v4918_v0, %v6555_v5  ;;  %v1930_v44 = vpop.f32.mrb[49].mxu1  ;;  %5597 = vpow2.f32 %v4298_v31  ;;  %v4898_v35 = vpop.f32.mrb[52].mxu0 }
 0x4ae   : > { %v1931_v60 = vadd.f32 %v1930_v44, %v6547_v1  ;;  %v4919_v47 = vpop.f32.mrb[50].mxu1  ;;  %v1858_v34 = vadd.f32 %v4898_v35, %v6559_v7  ;;  %v1849_v22 = vpop.f32.mrb[53].mxu0 }
 0x4af   : > { %v4311_v42 = vmul.f32 -1.442695, %v1939_v12  ;;  %v1942_v55 = vadd.f32 %v4919_v47, %v6557_v6  ;;  %v1933_v56 = vpop.f32.mrb[51].mxu1  ;;  %v1850_v43 = vadd.f32 %v1849_v22, %v6549_v2  ;;  %v4899_v11 = vpop.f32.mrb[54].mxu0 }
 0x4b0   : > { %v4309_v58 = vmul.f32 -1.442695, %v1931_v60  ;;  %v1934_v53 = vadd.f32 %v1933_v56, %v6551_v3  ;;  %v1852_v17 = vpop.f32.mrb[55].mxu0  ;;  %v4303_v33 = vmul.f32 -1.442695, %v1858_v34  ;;  %v1861_v40 = vadd.f32 %v4899_v11, %v6569_v30 }
 0x4b1   : > { %5599 = vpow2.f32 %v4311_v42  ;;  %v4312_v26 = vmul.f32 -1.442695, %v1942_v55  ;;  %v4301_v62 = vmul.f32 -1.442695, %v1850_v43  ;;  %v1853_v22 = vadd.f32 %v1852_v17, %v6553_v4 }
 0x4b2   : > { %5601 = vpow2.f32 %v4309_v58  ;;  %v4310_v13 = vmul.f32 -1.442695, %v1934_v53  ;;  %v4304_v31 = vmul.f32 -1.442695, %v1861_v40 }
 0x4b3   : > { %5603 = vpow2.f32 %v4312_v26 }
 0x4b4   : > { %v5592_v49 = vpop.eup %5591  ;;  %5605 = vpow2.f32 %v4310_v13  ;;  %v4922_v15 = vpop.f32.mrb[52].mxu1 }
 0x4b5   : > { %v5594_v38 = vpop.eup %5593  ;;  %v2007_v21 = vadd.f32 1.0, %v5592_v49  ;;  %5607 = vpow2.f32 %v4303_v33  ;;  %v1955_v45 = vadd.f32 %v4922_v15, %v6559_v7  ;;  %v1946_v37 = vpop.f32.mrb[53].mxu1 }
 0x4b6   : > { %v4902_v46 = vpop.f32.mrb[56].mxu0  ;;  %v5596_v41 = vpop.eup %5595  ;;  %v2005_v48 = vadd.f32 1.0, %v5594_v38  ;;  %5609 = vpow2.f32 %v4301_v62  ;;  %v1947_v16 = vadd.f32 %v1946_v37, %v6549_v2  ;;  %v4302_v37 = vmul.f32 -1.442695, %v1853_v22 }
 0x4b7   : > { %v4923_v59 = vpop.f32.mrb[54].mxu1  ;;  %v7093_v52 = vpop.f32.mrb[57].mxu0  ;;  %5611 = vrcp.f32 %v2007_v21  ;;  %v2008_v18 = vadd.f32 1.0, %v5596_v41  ;;  %v4315_v9 = vmul.f32 -1.442695, %v1955_v45 }
 0x4b8   : > { %v5598_v14 = vpop.eup %5597  ;;  %v1949_v20 = vpop.f32.mrb[55].mxu1  ;;  %5613 = vrcp.f32 %v2005_v48  ;;  %v4313_v50 = vmul.f32 -1.442695, %v1947_v16  ;;  %v1958_v35 = vadd.f32 %v4923_v59, %v6569_v30  ;;  %v1874_v16 = vadd.f32 %v4902_v46, %v6601_v36 }
 0x4b9   : > { %v7095_v23 = vpop.f32.mrb[58].mxu0  ;;  %v2006_v27 = vadd.f32 1.0, %v5598_v14  ;;  %5615 = vrcp.f32 %v2008_v18  ;;  %v1950_v11 = vadd.f32 %v1949_v20, %v6553_v4 }
 0x4ba   : > { %v7097_v24 = vpop.f32.mrb[59].mxu0  ;;  %v4316_v38 = vmul.f32 -1.442695, %v1958_v35 }
 0x4bb   : > { %5617 = vrcp.f32 %v2006_v27  ;;  %v5600_v0 = vpop.eup %5599  ;;  %v4314_v41 = vmul.f32 -1.442695, %v1950_v11  ;;  %v8002_v11 = vld [vmem:[#allocation7_spill] sm:$0xff] }
 0x4bc   : > { %5619 = vpow2.f32 %v4315_v9  ;;  %v5602_v12 = vpop.eup %5601  ;;  %v2103_v44 = vadd.f32 1.0, %v5600_v0  ;;  %v4926_v60 = vpop.f32.mrb[56].mxu1 }
 0x4bd   : > { %5621 = vpow2.f32 %v4313_v50  ;;  %v5604_v47 = vpop.eup %5603  ;;  %v2101_v34 = vadd.f32 1.0, %v5602_v12  ;;  %v1962_v42 = vpop.f32.mrb[57].mxu1  ;;  %v1971_v12 = vadd.f32 %v4926_v60, %v6601_v36 }
 0x4be   : > { %5623 = vpow2.f32 %v4304_v31  ;;  %v4906_v55 = vpop.f32.mrb[60].mxu0  ;;  %v5606_v56 = vpop.eup %5605  ;;  %v2104_v43 = vadd.f32 1.0, %v5604_v47  ;;  %v8001_v47 = vld [vmem:[#allocation4_spill] sm:$0xff] }
 0x4bf   : > { %5625 = vrcp.f32 %v2103_v44  ;;  %v4927_v58 = vpop.f32.mrb[58].mxu1  ;;  %v1881_v53 = vpop.f32.mrb[61].mxu0  ;;  %v2102_v33 = vadd.f32 1.0, %v5606_v56  ;;  %v1963_v56 = vadd.f32 %v1962_v42, %v8001_v47  ;;  %v1890_v42 = vadd.f32 %v4906_v55, %v6633_v28 }
 0x4c0   : > { %v5608_v26 = vpop.eup %5607  ;;  %5627 = vrcp.f32 %v2101_v34  ;;  %v1965_v13 = vpop.f32.mrb[59].mxu1  ;;  %v1866_v34 = vadd.f32 %v7093_v52, %v8001_v47  ;;  %v1974_v60 = vadd.f32 %v4927_v58, %v8002_v11  ;;  %v1869_v52 = vadd.f32 %v7097_v24, %v6578_v61 }
 0x4c1   : > { %v7102_v62 = vpop.f32.mrb[62].mxu0  ;;  %v5610_v49 = vpop.eup %5609  ;;  %5629 = vrcp.f32 %v2104_v43  ;;  %v2031_v15 = vadd.f32 1.0, %v5608_v26  ;;  %v1877_v26 = vadd.f32 %v7095_v23, %v8002_v11  ;;  %v1966_v24 = vadd.f32 %v1965_v13, %v6578_v61 }
 0x4c2   : > { %v7104_v17 = vpop.f32.mrb[63].mxu0  ;;  %v7106_v21 = vpop.eup %5611  ;;  %5631 = vrcp.f32 %v2102_v33  ;;  %v2029_v45 = vadd.f32 1.0, %v5610_v49  ;;  %v4307_v55 = vmul.f32 -1.442695, %v1890_v42 }
 0x4c3   : > { %v7108_v40 = vpop.eup %5613  ;;  %5633 = vrcp.f32 %v2031_v15 }
 0x4c4   : > { %v7110_v48 = vpop.eup %5615  ;;  %5635 = vrcp.f32 %v2029_v45  ;;  %v4930_v14 = vpop.f32.mrb[60].mxu1 }
 0x4c5   : > { %v7113_v59 = vpop.eup %5617  ;;  %5637 = vpow2.f32 %v4316_v38  ;;  %v1978_v9 = vpop.f32.mrb[61].mxu1  ;;  %v1987_v23 = vadd.f32 %v4930_v14, %v6633_v28 }
 0x4c6   : > { %v5620_v18 = vpop.eup %5619  ;;  %5639 = vpow2.f32 %v4302_v37  ;;  %v7115_v50 = vpop.f32.mrb[62].mxu1 }
 0x4c7   : > { %v5622_v20 = vpop.eup %5621  ;;  %v2127_v27 = vadd.f32 1.0, %v5620_v18  ;;  %5641 = vpow2.f32 %v4314_v41  ;;  %v7118_v44 = vpop.f32.mrb[63].mxu1  ;;  %v1882_v41 = vadd.f32 %v1881_v53, %v6580_v63  ;;  %v4319_v53 = vmul.f32 -1.442695, %v1987_v23 }
 0x4c8   : > { %v5624_v31 = vpop.eup %5623  ;;  %v2125_v0 = vadd.f32 1.0, %v5622_v20  ;;  %5643 = vtanh.f32 %v1874_v16 }
 0x4c9   : > { %v5626_v46 = vpop.eup %5625  ;;  %5645 = vrcp.f32 %v2127_v27  ;;  %v2032_v35 = vadd.f32 1.0, %v5624_v31  ;;  %v1979_v31 = vadd.f32 %v1978_v9, %v6580_v63  ;;  %v4305_v13 = vmul.f32 -1.442695, %v1882_v41 }
 0x4ca   : > { %v5628_v22 = vpop.eup %5627  ;;  %5647 = vrcp.f32 %v2125_v0 }
 0x4cb   : > { %v7123_v43 = vpop.eup %5629  ;;  %5649 = vrcp.f32 %v2032_v35 }
 0x4cc   : > { %v7127_v33 = vpop.eup %5631  ;;  %5651 = vtanh.f32 %v1971_v12 }
 0x4cd   : > { %v5634_v49 = vpop.eup %5633  ;;  %5653 = vtanh.f32 %v1866_v34 }
 0x4ce   : > { %v5636_v15 = vpop.eup %5635  ;;  %5655 = vtanh.f32 %v1963_v56  ;;  %v2071_v58 = vmul.f32 %v5634_v49, %v6992_v10 }
 0x4cf   : > { %v5638_v38 = vpop.eup %5637  ;;  %5657 = vtanh.f32 %v1877_v26  ;;  %v2069_v26 = vmul.f32 %v5636_v15, %v7005_v39 }
 0x4d0   : > { %v5640_v45 = vpop.eup %5639  ;;  %v2128_v37 = vadd.f32 1.0, %v5638_v38  ;;  %5659 = vtanh.f32 %v1974_v60  ;;  %v4317_v60 = vmul.f32 -1.442695, %v1979_v31 }
 0x4d1   : > { %v5642_v16 = vpop.eup %5641  ;;  %v2030_v18 = vadd.f32 1.0, %v5640_v45  ;;  %5661 = vtanh.f32 %v1869_v52  ;;  %v1990_v45 = vadd.f32 %v7115_v50, %v6653_v8 }
 0x4d2   : > { %v5644_v20 = vpop.eup %5643  ;;  %5663 = vrcp.f32 %v2128_v37  ;;  %v2126_v27 = vadd.f32 1.0, %v5642_v16 }
 0x4d3   : > { %v5646_v0 = vpop.eup %5645  ;;  %5665 = vrcp.f32 %v2030_v18  ;;  %v2075_v12 = vmul.f32 %v5644_v20, %v7106_v21  ;;  %v1893_v21 = vadd.f32 %v7102_v62, %v6653_v8  ;;  %v4320_v18 = vmul.f32 -1.442695, %v1990_v45 }
 0x4d4   : > { %v5648_v14 = vpop.eup %5647  ;;  %5667 = vrcp.f32 %v2126_v27  ;;  %v2167_v10 = vmul.f32 %v5646_v0, %v7001_v57 }
 0x4d5   : > { %v5650_v35 = vpop.eup %5649  ;;  %v7140_v34 = vadd.f32 %v2075_v12, %v2071_v58  ;;  %5669 = vtanh.f32 %v1966_v24  ;;  %v2165_v49 = vmul.f32 %v5648_v14, %v7010_v32  ;;  %v1982_v12 = vadd.f32 %v7118_v44, %v6598_v29 }
 0x4d6   : > { %v5652_v56 = vpop.eup %5651  ;;  %5671 = vpow2.f32 %v4307_v55  ;;  %v2072_v38 = vmul.f32 %v5650_v35, %v7014_v51 }
 0x4d7   : > { %v5654_v9 = vpop.eup %5653  ;;  %v2171_v52 = vmul.f32 %v5652_v56, %v5626_v46  ;;  %5673 = vpow2.f32 %v4319_v53  ;;  %v4318_v56 = vmul.f32 -1.442695, %v1982_v12 }
 0x4d8   : > { %v5656_v42 = vpop.eup %5655  ;;  %v2073_v57 = vmul.f32 %v5654_v9, %v7108_v40  ;;  %5675 = vpow2.f32 %v4305_v13  ;;  %v4308_v40 = vmul.f32 -1.442695, %v1893_v21 }
 0x4d9   : > { %v5658_v37 = vpop.eup %5657  ;;  %v7150_v39 = vadd.f32 %v2171_v52, %v2167_v10  ;;  %v2169_v15 = vmul.f32 %v5656_v42, %v5628_v22  ;;  %5677 = vpow2.f32 %v4317_v60 }
 0x4da   : > { %v5660_v23 = vpop.eup %5659  ;;  %v7152_v32 = vadd.f32 %v2073_v57, %v2069_v26  ;;  %v2076_v46 = vmul.f32 %v5658_v37, %v7110_v48  ;;  %5679 = vtanh.f32 %v7140_v34 }
 0x4db   : > { %v5662_v62 = vpop.eup %5661  ;;  %v7155_v41 = vadd.f32 %v2169_v15, %v2165_v49  ;;  %v2172_v51 = vmul.f32 %v5660_v23, %v7123_v43  ;;  %5681 = vpow2.f32 %v4308_v40 }
 0x4dc   : > { %v5664_v16 = vpop.eup %5663  ;;  %v7158_v58 = vadd.f32 %v2076_v46, %v2072_v38  ;;  %v2074_v50 = vmul.f32 %v5662_v62, %v7113_v59  ;;  %5683 = vpow2.f32 %v4320_v18 }
 0x4dd   : > { %v5666_v22 = vpop.eup %5665  ;;  %v2168_v24 = vmul.f32 %v5664_v16, %v7019_v25  ;;  %v1885_v25 = vadd.f32 %v7104_v17, %v6598_v29  ;;  %5685 = vtanh.f32 %v7150_v39 }
 0x4de   : > { %v5668_v20 = vpop.eup %5667  ;;  %v2070_v27 = vmul.f32 %v5666_v22, %v7024_v54  ;;  %5687 = vtanh.f32 %v7152_v32 }
 0x4df   : > { %v5670_v48 = vpop.eup %5669  ;;  %v2166_v55 = vmul.f32 %v5668_v20, %v7028_v19  ;;  %v7165_v31 = vadd.f32 %v2172_v51, %v2168_v24  ;;  %v4306_v13 = vmul.f32 -1.442695, %v1885_v25 }
 0x4e0   : > { %v5672_v43 = vpop.eup %5671  ;;  %v7167_v0 = vadd.f32 %v2074_v50, %v2070_v27  ;;  %v2170_v59 = vmul.f32 %v5670_v48, %v7127_v33 }
 0x4e1   : > { %v2059_v54 = vadd.f32 1.0, %v5672_v43  ;;  %v5674_v14 = vpop.eup %5673 }
 0x4e2   : > { %v7176_v19 = vadd.f32 %v2170_v59, %v2166_v55  ;;  %v5676_v53 = vpop.eup %5675  ;;  %v2155_v35 = vadd.f32 1.0, %v5674_v14 }
 0x4e3   : > { %5689 = vrcp.f32 %v2059_v54  ;;  %v5678_v10 = vpop.eup %5677  ;;  %v2057_v33 = vadd.f32 1.0, %v5676_v53 }
 0x4e4   : > { %5691 = vtanh.f32 %v7155_v41  ;;  %v2153_v17 = vadd.f32 1.0, %v5678_v10  ;;  %v5680_v26 = vpop.eup %5679 }
 0x4e5   : > { %5693 = vrcp.f32 %v2155_v35  ;;  %v5682_v44 = vpop.eup %5681 }
 0x4e6   : > { %5695 = vrcp.f32 %v2057_v33  ;;  %v5684_v60 = vpop.eup %5683  ;;  %v2060_v9 = vadd.f32 1.0, %v5682_v44  ;;  %v7194_v33 = vld [vmem:[%s7980_s1 + $0x8] sm:$0xff]   ;;  %v7239_v44 = vld [vmem:[%s7980_s1 + $0x30] sm:$0xff]  }
 0x4e7   : > { %5697 = vrcp.f32 %v2153_v17  ;;  %v5686_v49 = vpop.eup %5685  ;;  %v2156_v52 = vadd.f32 1.0, %v5684_v60  ;;  %v7212_v17 = vld [vmem:[%s7980_s1 + $0x18] sm:$0xff]  }
 0x4e8   : > { %5699 = vpow2.f32 %v4306_v13  ;;  %v5688_v21 = vpop.eup %5687  ;;  %v7203_v13 = vld [vmem:[%s7980_s1 + $0x10] sm:$0xff]   ;;  %v7248_v60 = vld [vmem:[%s7980_s1 + $0x38] sm:$0xff]  }
 0x4e9   : > { %5701 = vpow2.f32 %v4318_v56  ;;  %v7221_v56 = vld [vmem:[%s7980_s1 + $0x20] sm:$0xff]  }
 0x4ea   : > { %5703 = vtanh.f32 %v7158_v58 }
 0x4eb   : > { %5705 = vtanh.f32 %v7165_v31 }
 0x4ec   : > { %5707 = vrcp.f32 %v2060_v9  ;;  %v7257_v9 = vld [vmem:[%s7980_s1] sm:$0xff]  }
 0x4ed   : > { %v5690_v42 = vpop.eup %5689  ;;  %5709 = vrcp.f32 %v2156_v52  ;;  %v5191_v52 = vld [vmem:[%s6422_s5 + $0xa4] ss:$8 sps:$4 sm:$0xff]  }
 0x4ee   : > { %v5692_v38 = vpop.eup %5691  ;;  %v2087_v57 = vmul.f32 %v5690_v42, %v5680_v26  ;;  %5711 = vtanh.f32 %v7167_v0  ;;  %v7230_v26 = vld [vmem:[%s7980_s1 + $0x28] sm:$0xff]   ;;  %v5194_v42 = vld [vmem:[%s6422_s5 + $0xb4] ss:$8 sps:$4 sm:$0xff]  }
 0x4ef   : > { %v5694_v45 = vpop.eup %5693  ;;  %5713 = vtanh.f32 %v7176_v19 }
 0x4f0   : > { %v5696_v37 = vpop.eup %5695  ;;  %4325 = vst [vmem:[%s6695_s12 + $0xe0] sm:$0xff] %v2087_v57  ;;  %v2183_v15 = vmul.f32 %v5694_v45, %v5686_v49  ;;  %v5189_v49 = vld [vmem:[%s6422_s5 + $0xa0] ss:$8 sps:$4 sm:$0xff]  }
 0x4f1   : > { %v5698_v23 = vpop.eup %5697  ;;  %v2085_v46 = vmul.f32 %v5696_v37, %v5688_v21  ;;  %v5192_v21 = vld [vmem:[%s6422_s5 + $0xb0] ss:$8 sps:$4 sm:$0xff]  }
 0x4f2   : > { %v5700_v62 = vpop.eup %5699  ;;  %v2181_v51 = vmul.f32 %v5698_v23, %v5692_v38  ;;  %4326 = vst [vmem:[%s6695_s12 + $0xe8] sm:$0xff] %v2183_v15 }
 0x4f3   : > { %v5702_v40 = vpop.eup %5701  ;;  %v2058_v16 = vadd.f32 1.0, %v5700_v62  ;;  %4321 = vst [vmem:[%s6695_s12 + $0xc0] sm:$0xff] %v2085_v46 }
 0x4f4   : > { %v5704_v50 = vpop.eup %5703  ;;  %v2154_v18 = vadd.f32 1.0, %v5702_v40  ;;  %4322 = vst [vmem:[%s6695_s12 + $0xc8] sm:$0xff] %v2181_v51 }
 0x4f5   : > { %v5706_v22 = vpop.eup %5705  ;;  %5715 = vrcp.f32 %v2058_v16 }
 0x4f6   : > { %v5708_v24 = vpop.eup %5707  ;;  %5717 = vrcp.f32 %v2154_v18 }
 0x4f7   : > { %v5710_v20 = vpop.eup %5709  ;;  %v2088_v27 = vmul.f32 %v5708_v24, %v5704_v50 }
 0x4f8   : > { %v2184_v48 = vmul.f32 %v5710_v20, %v5706_v22  ;;  %v5712_v59 = vpop.eup %5711 }
 0x4f9   : > { %4327 = vst [vmem:[%s6695_s12 + $0xf0] sm:$0xff] %v2088_v27  ;;  %v2201_v55 = vpack.c.bf16 %v2088_v27, %v2087_v57  ;;  %v5714_v25 = vpop.eup %5713 }
 0x4fa   : > { %4328 = vst [vmem:[%s6695_s12 + $0xf8] sm:$0xff] %v2184_v48  ;;  %v2202_v43 = vpack.c.bf16 %v2184_v48, %v2183_v15 }
 0x4ff   : > { %v5716_v54 = vpop.eup %5715 }
 0x500   : > { %v5718_v12 = vpop.eup %5717  ;;  %v2086_v14 = vmul.f32 %v5716_v54, %v5712_v59 }
 0x501   : > { %v2182_v53 = vmul.f32 %v5718_v12, %v5714_v25 }
 0x502   : > { %4323 = vst [vmem:[%s6695_s12 + $0xd0] sm:$0xff] %v2086_v14  ;;  %v2199_v35 = vpack.c.bf16 %v2086_v14, %v2085_v46 }
 0x503   : > { %4324 = vst [vmem:[%s6695_s12 + $0xd8] sm:$0xff] %v2182_v53  ;;  %v2200_v10 = vpack.c.bf16 %v2182_v53, %v2181_v51 }
 0x504   : > { %4936 = vmatprep.subr.bf16.mxu0 %v2199_v35 }
 0x505   : > { %4960 = vmatprep.subr.bf16.mxu1 %v2200_v10  ;;  %4937 = vmatpush3.bf16.msra.mxu0 %v2199_v35 }
 0x506   : > { %4961 = vmatpush3.bf16.msra.mxu1 %v2200_v10  ;;  %4938 = vmatprep.subr.bf16.mxu0 %v2201_v55 }
 0x507   : > { %4962 = vmatprep.subr.bf16.mxu1 %v2202_v43 }
 0x509   : > { %4939 = vmatpush3.bf16.msra.mxu0 %v2201_v55 }
 0x50a   : > { %4963 = vmatpush3.bf16.msra.mxu1 %v2202_v43  ;;  %4980 = vmatprep.subr.bf16.mxu0 %v5189_v49 }
 0x50b   : > { %5004 = vmatprep.subr.bf16.mxu1 %v5191_v52 }
 0x50c   : > { %4941 = vmatmul.mubr.msk.bf16.vlgmr.msra.gmra.mrb[64].mxu0 %vm503_vm0, %v7194_v33 }
 0x50d   : > { %4965 = vmatmul.mubr.msk.bf16.vlgmr.msra.gmra.mrb[64].mxu1 %vm503_vm0, %v7194_v33  ;;  %4944 = vmatprep.mubr.msk.bf16.mxu0 %vm503_vm0, %v7203_v13 }
 0x50e   : > { %4968 = vmatprep.mubr.msk.bf16.mxu1 %vm503_vm0, %v7203_v13  ;;  %4981 = vmatpush3.bf16.msra.mxu0 %v5189_v49 }
 0x50f   : > { %5005 = vmatpush3.bf16.msra.mxu1 %v5191_v52  ;;  %4982 = vmatprep.subr.bf16.mxu0 %v5192_v21 }
 0x510   : > { %5006 = vmatprep.subr.bf16.mxu1 %v5194_v42 }
 0x512   : > { %4983 = vmatpush3.bf16.msra.mxu0 %v5192_v21 }
 0x513   : > { %5007 = vmatpush3.bf16.msra.mxu1 %v5194_v42 }
 0x514   : > { %4945 = vmatmul.mubr.msk.bf16.gmra.mrb[68].mxu0 %vm503_vm0, %v7212_v17 }
 0x515   : > { %4969 = vmatmul.mubr.msk.bf16.gmra.mrb[68].mxu1 %vm503_vm0, %v7212_v17  ;;  %4948 = vmatprep.mubr.msk.bf16.mxu0 %vm503_vm0, %v7221_v56 }
 0x516   : > { %4972 = vmatprep.mubr.msk.bf16.mxu1 %vm503_vm0, %v7221_v56 }
 0x51c   : > { %4949 = vmatmul.mubr.msk.bf16.gmra.mrb[72].mxu0 %vm503_vm0, %v7230_v26 }
 0x51d   : > { %4973 = vmatmul.mubr.msk.bf16.gmra.mrb[72].mxu1 %vm503_vm0, %v7230_v26  ;;  %4952 = vmatprep.mubr.msk.bf16.mxu0 %vm503_vm0, %v7239_v44 }
 0x51e   : > { %4976 = vmatprep.mubr.msk.bf16.mxu1 %vm503_vm0, %v7239_v44 }
 0x524   : > { %4953 = vmatmul.mubr.msk.bf16.gmra.mrb[76].mxu0 %vm503_vm0, %v7248_v60 }
 0x525   : > { %4977 = vmatmul.mubr.msk.bf16.gmra.mrb[76].mxu1 %vm503_vm0, %v7248_v60  ;;  %4988 = vmatprep.mubr.msk.bf16.mxu0 %vm503_vm0, %v7257_v9 }
 0x526   : > { %5012 = vmatprep.mubr.msk.bf16.mxu1 %vm503_vm0, %v7257_v9 }
 0x5df   : > { %v4942_v38 = vpop.f32.mrb[64].mxu0 }
 0x5e0   : > { %v2266_v57 = vadd.f32 %v4942_v38, %v6555_v5  ;;  %v4966_v45 = vpop.f32.mrb[64].mxu1  ;;  %v2257_v37 = vpop.f32.mrb[65].mxu0 }
 0x5e1   : > { %v2363_v15 = vadd.f32 %v4966_v45, %v6555_v5  ;;  %v2258_v23 = vadd.f32 %v2257_v37, %v6547_v1  ;;  %v2354_v46 = vpop.f32.mrb[65].mxu1  ;;  %v4943_v62 = vpop.f32.mrb[66].mxu0 }
 0x5e2   : > { %v4355_v51 = vmul.f32 -1.442695, %v2266_v57  ;;  %v2355_v40 = vadd.f32 %v2354_v46, %v6547_v1  ;;  %v2269_v16 = vadd.f32 %v4943_v62, %v6557_v6  ;;  %v4967_v50 = vpop.f32.mrb[66].mxu1  ;;  %v2260_v18 = vpop.f32.mrb[67].mxu0 }
 0x5e3   : > { %v4367_v22 = vmul.f32 -1.442695, %v2363_v15  ;;  %v4353_v24 = vmul.f32 -1.442695, %v2258_v23  ;;  %v2366_v20 = vadd.f32 %v4967_v50, %v6557_v6  ;;  %v2261_v27 = vadd.f32 %v2260_v18, %v6551_v3  ;;  %v2357_v48 = vpop.f32.mrb[67].mxu1 }
 0x5e4   : > { %5719 = vpow2.f32 %v4355_v51  ;;  %v4365_v55 = vmul.f32 -1.442695, %v2355_v40  ;;  %v4356_v43 = vmul.f32 -1.442695, %v2269_v16  ;;  %v2358_v59 = vadd.f32 %v2357_v48, %v6551_v3 }
 0x5e5   : > { %5721 = vpow2.f32 %v4367_v22  ;;  %v4368_v25 = vmul.f32 -1.442695, %v2366_v20  ;;  %v4354_v54 = vmul.f32 -1.442695, %v2261_v27 }
 0x5e6   : > { %5723 = vpow2.f32 %v4353_v24  ;;  %v4366_v12 = vmul.f32 -1.442695, %v2358_v59 }
 0x5e7   : > { %5725 = vpow2.f32 %v4365_v55  ;;  %v4946_v14 = vpop.f32.mrb[68].mxu0 }
 0x5e8   : > { %5727 = vpow2.f32 %v4356_v43  ;;  %v2282_v53 = vadd.f32 %v4946_v14, %v6559_v7  ;;  %v4970_v35 = vpop.f32.mrb[68].mxu1  ;;  %v2273_v10 = vpop.f32.mrb[69].mxu0 }
 0x5e9   : > { %5729 = vpow2.f32 %v4368_v25  ;;  %v2379_v49 = vadd.f32 %v4970_v35, %v6559_v7  ;;  %v2274_v52 = vadd.f32 %v2273_v10, %v6549_v2  ;;  %v2370_v21 = vpop.f32.mrb[69].mxu1  ;;  %v4947_v42 = vpop.f32.mrb[70].mxu0 }
 0x5ea   : > { %5731 = vpow2.f32 %v4354_v54  ;;  %v4359_v38 = vmul.f32 -1.442695, %v2282_v53  ;;  %v2371_v57 = vadd.f32 %v2370_v21, %v6549_v2  ;;  %v2285_v45 = vadd.f32 %v4947_v42, %v6569_v30  ;;  %v4971_v37 = vpop.f32.mrb[70].mxu1  ;;  %v2276_v15 = vpop.f32.mrb[71].mxu0 }
 0x5eb   : > { %5733 = vpow2.f32 %v4366_v12  ;;  %v4371_v23 = vmul.f32 -1.442695, %v2379_v49  ;;  %v4357_v46 = vmul.f32 -1.442695, %v2274_v52  ;;  %v2373_v62 = vpop.f32.mrb[71].mxu1 }
 0x5ec   : > { %5735 = vpow2.f32 %v4359_v38  ;;  %v4369_v51 = vmul.f32 -1.442695, %v2371_v57  ;;  %v4360_v40 = vmul.f32 -1.442695, %v2285_v45 }
 0x5ed   : > { %5737 = vpow2.f32 %v4371_v23  ;;  %v2382_v23 = vadd.f32 %v4971_v37, %v6569_v30 }
 0x5ee   : > { %v5720_v16 = vpop.eup %5719  ;;  %5739 = vpow2.f32 %v4357_v46 }
 0x5ef   : > { %v5722_v50 = vpop.eup %5721  ;;  %v2431_v18 = vadd.f32 1.0, %v5720_v16  ;;  %5741 = vpow2.f32 %v4369_v51  ;;  %v4950_v22 = vpop.f32.mrb[72].mxu0 }
 0x5f0   : > { %v5724_v24 = vpop.eup %5723  ;;  %v2527_v20 = vadd.f32 1.0, %v5722_v50  ;;  %5743 = vpow2.f32 %v4360_v40  ;;  %v4974_v27 = vpop.f32.mrb[72].mxu1  ;;  %v2277_v40 = vadd.f32 %v2276_v15, %v6553_v4 }
 0x5f1   : > { %v7280_v48 = vpop.f32.mrb[73].mxu0  ;;  %v5726_v55 = vpop.eup %5725  ;;  %5745 = vrcp.f32 %v2431_v18  ;;  %v2429_v43 = vadd.f32 1.0, %v5724_v24  ;;  %v2374_v24 = vadd.f32 %v2373_v62, %v6553_v4 }
 0x5f2   : > { %v2386_v59 = vpop.f32.mrb[73].mxu1  ;;  %v7282_v25 = vpop.f32.mrb[74].mxu0  ;;  %5747 = vrcp.f32 %v2527_v20  ;;  %v2525_v12 = vadd.f32 1.0, %v5726_v55  ;;  %v4358_v62 = vmul.f32 -1.442695, %v2277_v40  ;;  %v2290_v40 = vadd.f32 %v7280_v48, %v8001_v47 }
 0x5f3   : > { %v5728_v54 = vpop.eup %5727  ;;  %v7284_v14 = vpop.f32.mrb[74].mxu1  ;;  %5749 = vrcp.f32 %v2429_v43 }
 0x5f4   : > { %v7286_v53 = vpop.f32.mrb[75].mxu0  ;;  %v5730_v35 = vpop.eup %5729  ;;  %v2432_v10 = vadd.f32 1.0, %v5728_v54  ;;  %5751 = vrcp.f32 %v2525_v12 }
 0x5f5   : > { %v7288_v49 = vpop.f32.mrb[75].mxu1  ;;  %v5732_v52 = vpop.eup %5731  ;;  %v2528_v21 = vadd.f32 1.0, %v5730_v35 }
 0x5f6   : > { %v5734_v42 = vpop.eup %5733  ;;  %5753 = vrcp.f32 %v2432_v10  ;;  %v2430_v38 = vadd.f32 1.0, %v5732_v52  ;;  %v4372_v52 = vmul.f32 -1.442695, %v2382_v23  ;;  %v2395_v23 = vadd.f32 %v4974_v27, %v6601_v36 }
 0x5f7   : > { %v5736_v57 = vpop.eup %5735  ;;  %5755 = vrcp.f32 %v2528_v21  ;;  %v2526_v45 = vadd.f32 1.0, %v5734_v42  ;;  %v4954_v16 = vpop.f32.mrb[76].mxu0 }
 0x5f8   : > { %v5738_v46 = vpop.eup %5737  ;;  %5757 = vrcp.f32 %v2430_v38  ;;  %v2455_v51 = vadd.f32 1.0, %v5736_v57  ;;  %v4978_v20 = vpop.f32.mrb[76].mxu1 }
 0x5f9   : > { %v5740_v50 = vpop.eup %5739  ;;  %5759 = vrcp.f32 %v2526_v45  ;;  %v2551_v18 = vadd.f32 1.0, %v5738_v46  ;;  %v2305_v55 = vpop.f32.mrb[77].mxu0  ;;  %v4370_v46 = vmul.f32 -1.442695, %v2374_v24  ;;  %v2387_v24 = vadd.f32 %v2386_v59, %v8001_v47 }
 0x5fa   : > { %v5742_v43 = vpop.eup %5741  ;;  %5761 = vrcp.f32 %v2455_v51  ;;  %v2453_v54 = vadd.f32 1.0, %v5740_v50  ;;  %v2402_v12 = vpop.f32.mrb[77].mxu1  ;;  %v2298_v50 = vadd.f32 %v4950_v22, %v6601_v36  ;;  %v2301_v22 = vadd.f32 %v7282_v25, %v8002_v11 }
 0x5fb   : > { %v7293_v35 = vpop.f32.mrb[78].mxu0  ;;  %v5744_v37 = vpop.eup %5743  ;;  %5763 = vrcp.f32 %v2551_v18  ;;  %v2549_v10 = vadd.f32 1.0, %v5742_v43  ;;  %v2411_v48 = vadd.f32 %v4978_v20, %v6633_v28  ;;  %v2293_v59 = vadd.f32 %v7286_v53, %v6578_v61 }
 0x5fc   : > { %v7295_v21 = vpop.f32.mrb[78].mxu1  ;;  %v7297_v15 = vpop.f32.mrb[79].mxu0  ;;  %5765 = vrcp.f32 %v2453_v54  ;;  %v2456_v38 = vadd.f32 1.0, %v5744_v37  ;;  %v2390_v25 = vadd.f32 %v7288_v49, %v6578_v61  ;;  %v2403_v20 = vadd.f32 %v2402_v12, %v6580_v63 }
 0x5fd   : > { %v5746_v42 = vpop.eup %5745  ;;  %v7299_v57 = vpop.f32.mrb[79].mxu1  ;;  %5767 = vrcp.f32 %v2549_v10  ;;  %v2314_v10 = vadd.f32 %v4954_v16, %v6633_v28 }
 0x5fe   : > { %v5748_v45 = vpop.eup %5747  ;;  %5769 = vrcp.f32 %v2456_v38 }
 0x5ff   : > { %v7301_v51 = vpop.eup %5749  ;;  %5771 = vpow2.f32 %v4372_v52  ;;  %v2398_v52 = vadd.f32 %v7284_v14, %v8002_v11  ;;  %v4363_v16 = vmul.f32 -1.442695, %v2314_v10  ;;  %v2306_v14 = vadd.f32 %v2305_v55, %v6580_v63 }
 0x600   : > { %v7304_v18 = vpop.eup %5751  ;;  %5773 = vpow2.f32 %v4358_v62 }
 0x601   : > { %v7307_v43 = vpop.eup %5753  ;;  %5775 = vpow2.f32 %v4370_v46 }
 0x602   : > { %v7311_v54 = vpop.eup %5755  ;;  %5777 = vtanh.f32 %v2298_v50 }
 0x603   : > { %v7314_v37 = vpop.eup %5757  ;;  %5779 = vtanh.f32 %v2395_v23  ;;  %v4375_v23 = vmul.f32 -1.442695, %v2411_v48  ;;  %v4373_v48 = vmul.f32 -1.442695, %v2403_v20 }
 0x604   : > { %v7319_v27 = vpop.eup %5759  ;;  %5781 = vtanh.f32 %v2290_v40 }
 0x605   : > { %v5762_v38 = vpop.eup %5761  ;;  %5783 = vtanh.f32 %v2387_v24 }
 0x606   : > { %v5764_v62 = vpop.eup %5763  ;;  %5785 = vtanh.f32 %v2301_v22  ;;  %v2495_v49 = vmul.f32 %v5762_v38, %v7140_v34  ;;  %v4361_v22 = vmul.f32 -1.442695, %v2306_v14  ;;  %v2317_v34 = vadd.f32 %v7293_v35, %v6653_v8 }
 0x607   : > { %v5766_v46 = vpop.eup %5765  ;;  %5787 = vtanh.f32 %v2398_v52  ;;  %v2591_v52 = vmul.f32 %v5764_v62, %v7150_v39  ;;  %v2414_v35 = vadd.f32 %v7295_v21, %v6653_v8 }
 0x608   : > { %v5768_v50 = vpop.eup %5767  ;;  %5789 = vtanh.f32 %v2293_v59  ;;  %v2493_v12 = vmul.f32 %v5766_v46, %v7152_v32  ;;  %v2309_v46 = vadd.f32 %v7297_v15, %v6598_v29 }
 0x609   : > { %v5770_v11 = vpop.eup %5769  ;;  %5791 = vtanh.f32 %v2390_v25 }
 0x60a   : > { %v5772_v40 = vpop.eup %5771  ;;  %5793 = vpow2.f32 %v4363_v16  ;;  %v2589_v16 = vmul.f32 %v5768_v50, %v7155_v41 }
 0x60b   : > { %v5774_v53 = vpop.eup %5773  ;;  %v2552_v28 = vadd.f32 1.0, %v5772_v40  ;;  %5795 = vpow2.f32 %v4375_v23  ;;  %v2496_v23 = vmul.f32 %v5770_v11, %v7158_v58 }
 0x60c   : > { %v5776_v24 = vpop.eup %5775  ;;  %v2454_v61 = vadd.f32 1.0, %v5774_v53 }
 0x60d   : > { %v5778_v10 = vpop.eup %5777  ;;  %5797 = vrcp.f32 %v2552_v28  ;;  %v2550_v55 = vadd.f32 1.0, %v5776_v24  ;;  %v4376_v24 = vmul.f32 -1.442695, %v2414_v35 }
 0x60e   : > { %v5780_v59 = vpop.eup %5779  ;;  %5799 = vrcp.f32 %v2454_v61  ;;  %v2499_v25 = vmul.f32 %v5778_v10, %v5746_v42 }
 0x60f   : > { %v5782_v63 = vpop.eup %5781  ;;  %5801 = vrcp.f32 %v2550_v55  ;;  %v2595_v40 = vmul.f32 %v5780_v59, %v5748_v45 }
 0x610   : > { %v5784_v38 = vpop.eup %5783  ;;  %v7337_v39 = vadd.f32 %v2499_v25, %v2495_v49  ;;  %v2497_v28 = vmul.f32 %v5782_v63, %v7301_v51  ;;  %5803 = vpow2.f32 %v4361_v22  ;;  %v4364_v51 = vmul.f32 -1.442695, %v2317_v34 }
 0x611   : > { %v5786_v62 = vpop.eup %5785  ;;  %v7340_v32 = vadd.f32 %v2595_v40, %v2591_v52  ;;  %v2593_v61 = vmul.f32 %v5784_v38, %v7304_v18  ;;  %5805 = vpow2.f32 %v4373_v48  ;;  %v4362_v22 = vmul.f32 -1.442695, %v2309_v46 }
 0x612   : > { %v5788_v41 = vpop.eup %5787  ;;  %v7343_v42 = vadd.f32 %v2497_v28, %v2493_v12  ;;  %v2500_v45 = vmul.f32 %v5786_v62, %v7307_v43  ;;  %5807 = vtanh.f32 %v7337_v39 }
 0x613   : > { %v5790_v11 = vpop.eup %5789  ;;  %v7348_v58 = vadd.f32 %v2593_v61, %v2589_v16  ;;  %v2596_v63 = vmul.f32 %v5788_v41, %v7311_v54  ;;  %5809 = vtanh.f32 %v7340_v32 }
 0x614   : > { %v5792_v50 = vpop.eup %5791  ;;  %v7353_v18 = vadd.f32 %v2500_v45, %v2496_v23  ;;  %v2498_v14 = vmul.f32 %v5790_v11, %v7314_v37  ;;  %5811 = vpow2.f32 %v4364_v51 }
 0x615   : > { %v5794_v20 = vpop.eup %5793  ;;  %v2594_v43 = vmul.f32 %v5792_v50, %v7319_v27  ;;  %v2406_v27 = vadd.f32 %v7299_v57, %v6598_v29 }
 0x616   : > { %v5796_v21 = vpop.eup %5795  ;;  %v2483_v53 = vadd.f32 1.0, %v5794_v20 }
 0x617   : > { %v5798_v54 = vpop.eup %5797  ;;  %v2579_v49 = vadd.f32 1.0, %v5796_v21 }
 0x618   : > { %v5800_v15 = vpop.eup %5799  ;;  %v2592_v10 = vmul.f32 %v5798_v54, %v7165_v31  ;;  %5813 = vrcp.f32 %v2483_v53 }
 0x619   : > { %v5802_v52 = vpop.eup %5801  ;;  %v2494_v37 = vmul.f32 %v5800_v15, %v7167_v0  ;;  %5815 = vrcp.f32 %v2579_v49  ;;  %v4374_v0 = vmul.f32 -1.442695, %v2406_v27 }
 0x61a   : > { %v5804_v55 = vpop.eup %5803  ;;  %v2590_v48 = vmul.f32 %v5802_v52, %v7176_v19  ;;  %v7364_v59 = vadd.f32 %v2596_v63, %v2592_v10  ;;  %5817 = vpow2.f32 %v4376_v24 }
 0x61b   : > { %v5806_v12 = vpop.eup %5805  ;;  %v7366_v25 = vadd.f32 %v2498_v14, %v2494_v37  ;;  %v2481_v16 = vadd.f32 1.0, %v5804_v55  ;;  %5819 = vpow2.f32 %v4362_v22 }
 0x61c   : > { %v7368_v31 = vadd.f32 %v2594_v43, %v2590_v48  ;;  %v2577_v40 = vadd.f32 1.0, %v5806_v12  ;;  %5821 = vtanh.f32 %v7343_v42  ;;  %v5808_v57 = vpop.eup %5807 }
 0x61d   : > { %5823 = vtanh.f32 %v7348_v58  ;;  %v5810_v19 = vpop.eup %5809 }
 0x61e   : > { %5825 = vrcp.f32 %v2481_v16  ;;  %v5812_v34 = vpop.eup %5811 }
 0x61f   : > { %5827 = vrcp.f32 %v2577_v40  ;;  %v2484_v23 = vadd.f32 1.0, %v5812_v34 }
 0x620   : > { %5829 = vpow2.f32 %v4374_v0 }
 0x621   : > { %5831 = vtanh.f32 %v7353_v18 }
 0x622   : > { %v5814_v38 = vpop.eup %5813  ;;  %5833 = vrcp.f32 %v2484_v23 }
 0x623   : > { %v5816_v28 = vpop.eup %5815  ;;  %v2511_v62 = vmul.f32 %v5814_v38, %v5808_v57  ;;  %5835 = vtanh.f32 %v7364_v59 }
 0x624   : > { %v5818_v61 = vpop.eup %5817  ;;  %v2607_v41 = vmul.f32 %v5816_v28, %v5810_v19  ;;  %5837 = vtanh.f32 %v7366_v25 }
 0x625   : > { %v5820_v45 = vpop.eup %5819  ;;  %v2580_v35 = vadd.f32 1.0, %v5818_v61  ;;  %4381 = vst [vmem:[%s6695_s12 + $0x120] sm:$0xff] %v2511_v62 }
 0x626   : > { %v2482_v11 = vadd.f32 1.0, %v5820_v45  ;;  %4382 = vst [vmem:[%s6695_s12 + $0x128] sm:$0xff] %v2607_v41  ;;  %v5822_v63 = vpop.eup %5821 }
 0x627   : > { %5839 = vrcp.f32 %v2580_v35  ;;  %v5824_v51 = vpop.eup %5823 }
 0x628   : > { %5841 = vrcp.f32 %v2482_v11  ;;  %v5826_v46 = vpop.eup %5825 }
 0x629   : > { %v5828_v50 = vpop.eup %5827  ;;  %v2509_v14 = vmul.f32 %v5826_v46, %v5822_v63  ;;  %5843 = vtanh.f32 %v7368_v31 }
 0x62a   : > { %v5830_v20 = vpop.eup %5829  ;;  %v2605_v43 = vmul.f32 %v5828_v50, %v5824_v51 }
 0x62b   : > { %v5832_v21 = vpop.eup %5831  ;;  %v2578_v53 = vadd.f32 1.0, %v5830_v20  ;;  %4377 = vst [vmem:[%s6695_s12 + $0x100] sm:$0xff] %v2509_v14 }
 0x62c   : > { %4378 = vst [vmem:[%s6695_s12 + $0x108] sm:$0xff] %v2605_v43  ;;  %v5834_v24 = vpop.eup %5833 }
 0x62d   : > { %5845 = vrcp.f32 %v2578_v53  ;;  %v5836_v54 = vpop.eup %5835  ;;  %v2512_v49 = vmul.f32 %v5834_v24, %v5832_v21 }
 0x62e   : > { %v5838_v22 = vpop.eup %5837 }
 0x62f   : > { %4383 = vst [vmem:[%s6695_s12 + $0x130] sm:$0xff] %v2512_v49  ;;  %v2625_v10 = vpack.c.bf16 %v2512_v49, %v2511_v62 }
 0x631   : > { %v5840_v15 = vpop.eup %5839 }
 0x632   : > { %v5842_v52 = vpop.eup %5841  ;;  %v2608_v37 = vmul.f32 %v5840_v15, %v5836_v54 }
 0x633   : > { %v2510_v27 = vmul.f32 %v5842_v52, %v5838_v22  ;;  %v5844_v12 = vpop.eup %5843 }
 0x634   : > { %4384 = vst [vmem:[%s6695_s12 + $0x138] sm:$0xff] %v2608_v37  ;;  %v2626_v55 = vpack.c.bf16 %v2608_v37, %v2607_v41 }
 0x635   : > { %4379 = vst [vmem:[%s6695_s12 + $0x110] sm:$0xff] %v2510_v27  ;;  %v2623_v48 = vpack.c.bf16 %v2510_v27, %v2509_v14 }
 0x637   : > { %4984 = vmatprep.subr.bf16.mxu0 %v2623_v48  ;;  %v5846_v16 = vpop.eup %5845 }
 0x638   : > { %4985 = vmatpush3.bf16.msra.mxu0 %v2623_v48  ;;  %v2606_v40 = vmul.f32 %v5846_v16, %v5844_v12 }
 0x639   : > { %4986 = vmatprep.subr.bf16.mxu0 %v2625_v10 }
 0x63a   : > { %4380 = vst [vmem:[%s6695_s12 + $0x118] sm:$0xff] %v2606_v40  ;;  %v2624_v0 = vpack.c.bf16 %v2606_v40, %v2605_v43 }
 0x63c   : > { %4987 = vmatpush3.bf16.msra.mxu0 %v2625_v10  ;;  %5008 = vmatprep.subr.bf16.mxu1 %v2624_v0 }
 0x63d   : > { %5009 = vmatpush3.bf16.msra.mxu1 %v2624_v0 }
 0x63e   : > { %5010 = vmatprep.subr.bf16.mxu1 %v2626_v55 }
 0x63f   : > { %4989 = vmatmul.mubr.msk.bf16.vlgmr.msra.gmra.mrb[80].mxu0 %vm503_vm0, %v7194_v33 }
 0x640   : > { %4992 = vmatprep.mubr.msk.bf16.mxu0 %vm503_vm0, %v7203_v13 }
 0x641   : > { %5011 = vmatpush3.bf16.msra.mxu1 %v2626_v55 }
 0x644   : > { %5013 = vmatmul.mubr.msk.bf16.vlgmr.msra.gmra.mrb[80].mxu1 %vm503_vm0, %v7194_v33  ;;  %v5195_v33 = vld [vmem:[%s6422_s5 + $0xc0] ss:$8 sps:$4 sm:$0xff]  }
 0x645   : > { %5016 = vmatprep.mubr.msk.bf16.mxu1 %vm503_vm0, %v7203_v13  ;;  %v5197_v13 = vld [vmem:[%s6422_s5 + $0xc4] ss:$8 sps:$4 sm:$0xff]   ;;  %5028 = vmatprep.subr.bf16.mxu0 %v5195_v33 }
 0x646   : > { %5052 = vmatprep.subr.bf16.mxu1 %v5197_v13  ;;  %5029 = vmatpush3.bf16.msra.mxu0 %v5195_v33 }
 0x647   : > { %4993 = vmatmul.mubr.msk.bf16.gmra.mrb[84].mxu0 %vm503_vm0, %v7212_v17  ;;  %5053 = vmatpush3.bf16.msra.mxu1 %v5197_v13 }
 0x648   : > { %4996 = vmatprep.mubr.msk.bf16.mxu0 %vm503_vm0, %v7221_v56 }
 0x64c   : > { %5017 = vmatmul.mubr.msk.bf16.gmra.mrb[84].mxu1 %vm503_vm0, %v7212_v17  ;;  %v5198_v17 = vld [vmem:[%s6422_s5 + $0xd0] ss:$8 sps:$4 sm:$0xff]  }
 0x64d   : > { %5020 = vmatprep.mubr.msk.bf16.mxu1 %vm503_vm0, %v7221_v56  ;;  %v5200_v56 = vld [vmem:[%s6422_s5 + $0xd4] ss:$8 sps:$4 sm:$0xff]   ;;  %5030 = vmatprep.subr.bf16.mxu0 %v5198_v17 }
 0x64e   : > { %5054 = vmatprep.subr.bf16.mxu1 %v5200_v56  ;;  %5031 = vmatpush3.bf16.msra.mxu0 %v5198_v17 }
 0x64f   : > { %4997 = vmatmul.mubr.msk.bf16.gmra.mrb[88].mxu0 %vm503_vm0, %v7230_v26  ;;  %5055 = vmatpush3.bf16.msra.mxu1 %v5200_v56 }
 0x650   : > { %5000 = vmatprep.mubr.msk.bf16.mxu0 %vm503_vm0, %v7239_v44 }
 0x654   : > { %5021 = vmatmul.mubr.msk.bf16.gmra.mrb[88].mxu1 %vm503_vm0, %v7230_v26 }
 0x655   : > { %5024 = vmatprep.mubr.msk.bf16.mxu1 %vm503_vm0, %v7239_v44 }
 0x657   : > { %5001 = vmatmul.mubr.msk.bf16.gmra.mrb[92].mxu0 %vm503_vm0, %v7248_v60 }
 0x658   : > { %5036 = vmatprep.mubr.msk.bf16.mxu0 %vm503_vm0, %v7257_v9 }
 0x65c   : > { %5025 = vmatmul.mubr.msk.bf16.gmra.mrb[92].mxu1 %vm503_vm0, %v7248_v60 }
 0x65d   : > { %5060 = vmatprep.mubr.msk.bf16.mxu1 %vm503_vm0, %v7257_v9 }
 0x712   : > { %v4990_v26 = vpop.f32.mrb[80].mxu0 }
 0x713   : > { %v2690_v44 = vadd.f32 %v4990_v26, %v6555_v5  ;;  %v2681_v57 = vpop.f32.mrb[81].mxu0 }
 0x714   : > { %v2682_v60 = vadd.f32 %v2681_v57, %v6547_v1  ;;  %v4991_v19 = vpop.f32.mrb[82].mxu0 }
 0x715   : > { %v4411_v9 = vmul.f32 -1.442695, %v2690_v44  ;;  %v2693_v34 = vadd.f32 %v4991_v19, %v6557_v6  ;;  %v2684_v38 = vpop.f32.mrb[83].mxu0 }
 0x716   : > { %v4409_v23 = vmul.f32 -1.442695, %v2682_v60  ;;  %v2685_v28 = vadd.f32 %v2684_v38, %v6551_v3 }
 0x717   : > { %5847 = vpow2.f32 %v4411_v9  ;;  %v4412_v62 = vmul.f32 -1.442695, %v2693_v34  ;;  %v5014_v61 = vpop.f32.mrb[80].mxu1 }
 0x718   : > { %5849 = vpow2.f32 %v4409_v23  ;;  %v4410_v41 = vmul.f32 -1.442695, %v2685_v28  ;;  %v2787_v45 = vadd.f32 %v5014_v61, %v6555_v5  ;;  %v2778_v35 = vpop.f32.mrb[81].mxu1 }
 0x719   : > { %5851 = vpow2.f32 %v4412_v62  ;;  %v2779_v11 = vadd.f32 %v2778_v35, %v6547_v1  ;;  %v5015_v63 = vpop.f32.mrb[82].mxu1 }
 0x71a   : > { %5853 = vpow2.f32 %v4410_v41  ;;  %v4994_v51 = vpop.f32.mrb[84].mxu0  ;;  %v4423_v46 = vmul.f32 -1.442695, %v2787_v45  ;;  %v2790_v50 = vadd.f32 %v5015_v63, %v6557_v6  ;;  %v2781_v14 = vpop.f32.mrb[83].mxu1 }
 0x71b   : > { %v2706_v20 = vadd.f32 %v4994_v51, %v6559_v7  ;;  %v2697_v43 = vpop.f32.mrb[85].mxu0  ;;  %v4421_v21 = vmul.f32 -1.442695, %v2779_v11  ;;  %v2782_v53 = vadd.f32 %v2781_v14, %v6551_v3 }
 0x71c   : > { %v2698_v24 = vadd.f32 %v2697_v43, %v6549_v2  ;;  %v4995_v54 = vpop.f32.mrb[86].mxu0  ;;  %5855 = vpow2.f32 %v4423_v46  ;;  %v4424_v49 = vmul.f32 -1.442695, %v2790_v50 }
 0x71d   : > { %v4415_v22 = vmul.f32 -1.442695, %v2706_v20  ;;  %v2709_v15 = vadd.f32 %v4995_v54, %v6569_v30  ;;  %v2700_v10 = vpop.f32.mrb[87].mxu0  ;;  %5857 = vpow2.f32 %v4421_v21  ;;  %v4422_v52 = vmul.f32 -1.442695, %v2782_v53 }
 0x71e   : > { %v4413_v37 = vmul.f32 -1.442695, %v2698_v24  ;;  %5859 = vpow2.f32 %v4424_v49  ;;  %v2701_v14 = vadd.f32 %v2700_v10, %v6553_v4 }
 0x71f   : > { %v4416_v27 = vmul.f32 -1.442695, %v2709_v15  ;;  %5861 = vpow2.f32 %v4422_v52  ;;  %v5018_v55 = vpop.f32.mrb[84].mxu1 }
 0x720   : > { %5863 = vpow2.f32 %v4415_v22  ;;  %v2803_v12 = vadd.f32 %v5018_v55, %v6559_v7  ;;  %v2794_v16 = vpop.f32.mrb[85].mxu1 }
 0x721   : > { %v5848_v48 = vpop.eup %5847  ;;  %5865 = vpow2.f32 %v4413_v37  ;;  %v2795_v33 = vadd.f32 %v2794_v16, %v6549_v2  ;;  %v5019_v13 = vpop.f32.mrb[86].mxu1  ;;  %v4414_v16 = vmul.f32 -1.442695, %v2701_v14 }
 0x722   : > { %v5850_v40 = vpop.eup %5849  ;;  %v2855_v0 = vadd.f32 1.0, %v5848_v48  ;;  %v4998_v17 = vpop.f32.mrb[88].mxu0  ;;  %5867 = vpow2.f32 %v4416_v27  ;;  %v4427_v9 = vmul.f32 -1.442695, %v2803_v12  ;;  %v2806_v63 = vadd.f32 %v5019_v13, %v6569_v30 }
 0x723   : > { %v5852_v56 = vpop.eup %5851  ;;  %v2853_v26 = vadd.f32 1.0, %v5850_v40  ;;  %v2797_v44 = vpop.f32.mrb[87].mxu1  ;;  %v4425_v23 = vmul.f32 -1.442695, %v2795_v33  ;;  %v2722_v13 = vadd.f32 %v4998_v17, %v6601_v36 }
 0x724   : > { %v7433_v57 = vpop.f32.mrb[89].mxu0  ;;  %v5854_v60 = vpop.eup %5853  ;;  %5869 = vrcp.f32 %v2855_v0  ;;  %v2856_v19 = vadd.f32 1.0, %v5852_v56  ;;  %v2798_v24 = vadd.f32 %v2797_v44, %v6553_v4  ;;  %v4428_v55 = vmul.f32 -1.442695, %v2806_v63 }
 0x725   : > { %v7435_v34 = vpop.f32.mrb[90].mxu0  ;;  %5871 = vrcp.f32 %v2853_v26  ;;  %v2854_v38 = vadd.f32 1.0, %v5854_v60  ;;  %v2714_v17 = vadd.f32 %v7433_v57, %v8001_v47 }
 0x726   : > { %v7437_v28 = vpop.f32.mrb[91].mxu0  ;;  %5873 = vrcp.f32 %v2856_v19  ;;  %v5856_v62 = vpop.eup %5855  ;;  %v4426_v0 = vmul.f32 -1.442695, %v2798_v24  ;;  %v8005_v24 = vld [vmem:[#allocation8_spill] sm:$0xff] }
 0x727   : > { %5875 = vrcp.f32 %v2854_v38  ;;  %v5858_v61 = vpop.eup %5857  ;;  %v2951_v41 = vadd.f32 1.0, %v5856_v62  ;;  %v5022_v45 = vpop.f32.mrb[88].mxu1 }
 0x728   : > { %5877 = vpow2.f32 %v4427_v9  ;;  %v5860_v35 = vpop.eup %5859  ;;  %v2949_v11 = vadd.f32 1.0, %v5858_v61  ;;  %v2810_v51 = vpop.f32.mrb[89].mxu1 }
 0x729   : > { %5879 = vpow2.f32 %v4425_v23  ;;  %v5862_v46 = vpop.eup %5861  ;;  %v2952_v50 = vadd.f32 1.0, %v5860_v35  ;;  %v5023_v20 = vpop.f32.mrb[90].mxu1  ;;  %v2819_v23 = vadd.f32 %v5022_v45, %v6601_v36 }
 0x72a   : > { %5881 = vrcp.f32 %v2951_v41  ;;  %v5002_v43 = vpop.f32.mrb[92].mxu0  ;;  %v5864_v21 = vpop.eup %5863  ;;  %v2950_v53 = vadd.f32 1.0, %v5862_v46  ;;  %v8003_v46 = vld [vmem:[#allocation7_spill] sm:$0xff] }
 0x72b   : > { %5883 = vrcp.f32 %v2949_v11  ;;  %v2813_v54 = vpop.f32.mrb[91].mxu1  ;;  %v2729_v49 = vpop.f32.mrb[93].mxu0  ;;  %v2879_v15 = vadd.f32 1.0, %v5864_v21  ;;  %v2811_v11 = vadd.f32 %v2810_v51, %v8001_v47  ;;  %v2822_v45 = vadd.f32 %v5023_v20, %v8003_v46 }
 0x72c   : > { %v5866_v22 = vpop.eup %5865  ;;  %5885 = vrcp.f32 %v2952_v50  ;;  %v7442_v52 = vpop.f32.mrb[94].mxu0  ;;  %v2725_v50 = vadd.f32 %v7435_v34, %v8003_v46 }
 0x72d   : > { %v5868_v37 = vpop.eup %5867  ;;  %5887 = vrcp.f32 %v2950_v53  ;;  %v2877_v27 = vadd.f32 1.0, %v5866_v22  ;;  %v7444_v48 = vpop.f32.mrb[95].mxu0  ;;  %v8004_v53 = vld [vmem:[#allocation5_spill] sm:$0xff]  ;;  %v2738_v22 = vadd.f32 %v5002_v43, %v8005_v24 }
 0x72e   : > { %v7446_v10 = vpop.eup %5869  ;;  %5889 = vrcp.f32 %v2879_v15  ;;  %v2880_v12 = vadd.f32 1.0, %v5868_v37  ;;  %v2717_v57 = vadd.f32 %v7437_v28, %v8004_v53  ;;  %v2814_v51 = vadd.f32 %v2813_v54, %v8004_v53 }
 0x72f   : > { %v7448_v40 = vpop.eup %5871  ;;  %5891 = vrcp.f32 %v2877_v27  ;;  %v5026_v56 = vpop.f32.mrb[92].mxu1  ;;  %v4419_v20 = vmul.f32 -1.442695, %v2738_v22 }
 0x730   : > { %v7450_v33 = vpop.eup %5873  ;;  %5893 = vrcp.f32 %v2880_v12  ;;  %v2826_v44 = vpop.f32.mrb[93].mxu1  ;;  %v2835_v34 = vadd.f32 %v5026_v56, %v8005_v24 }
 0x731   : > { %v7453_v26 = vpop.eup %5875  ;;  %5895 = vpow2.f32 %v4428_v55  ;;  %v7455_v19 = vpop.f32.mrb[94].mxu1 }
 0x732   : > { %v5878_v60 = vpop.eup %5877  ;;  %5897 = vpow2.f32 %v4414_v16  ;;  %v7458_v62 = vpop.f32.mrb[95].mxu1  ;;  %v8006_v16 = vld [vmem:[#allocation6_spill] sm:$0xff] }
 0x733   : > { %v5880_v9 = vpop.eup %5879  ;;  %v2975_v38 = vadd.f32 1.0, %v5878_v60  ;;  %5899 = vpow2.f32 %v4426_v0  ;;  %v2730_v0 = vadd.f32 %v2729_v49, %v8006_v16  ;;  %v2827_v60 = vadd.f32 %v2826_v44, %v8006_v16 }
 0x734   : > { %v5882_v61 = vpop.eup %5881  ;;  %v2973_v41 = vadd.f32 1.0, %v5880_v9  ;;  %5901 = vtanh.f32 %v2722_v13 }
 0x735   : > { %v5884_v35 = vpop.eup %5883  ;;  %5903 = vrcp.f32 %v2975_v38  ;;  %v4431_v38 = vmul.f32 -1.442695, %v2835_v34  ;;  %v4417_v49 = vmul.f32 -1.442695, %v2730_v0  ;;  %v4429_v44 = vmul.f32 -1.442695, %v2827_v60 }
 0x736   : > { %v7463_v63 = vpop.eup %5885  ;;  %5905 = vrcp.f32 %v2973_v41 }
 0x737   : > { %v7467_v14 = vpop.eup %5887  ;;  %5907 = vtanh.f32 %v2819_v23 }
 0x738   : > { %v5890_v21 = vpop.eup %5889  ;;  %5909 = vtanh.f32 %v2714_v17 }
 0x739   : > { %v5892_v15 = vpop.eup %5891  ;;  %5911 = vtanh.f32 %v2811_v11  ;;  %v2919_v28 = vmul.f32 %v5890_v21, %v7337_v39 }
 0x73a   : > { %v5894_v37 = vpop.eup %5893  ;;  %5913 = vtanh.f32 %v2725_v50  ;;  %v2917_v39 = vmul.f32 %v5892_v15, %v7343_v42  ;;  %v2838_v42 = vadd.f32 %v7455_v19, %v6653_v8 }
 0x73b   : > { %v5896_v27 = vpop.eup %5895  ;;  %5915 = vtanh.f32 %v2822_v45 }
 0x73c   : > { %v5898_v55 = vpop.eup %5897  ;;  %v2976_v12 = vadd.f32 1.0, %v5896_v27  ;;  %5917 = vtanh.f32 %v2717_v57  ;;  %v4432_v0 = vmul.f32 -1.442695, %v2838_v42 }
 0x73d   : > { %v5900_v13 = vpop.eup %5899  ;;  %v2878_v43 = vadd.f32 1.0, %v5898_v55  ;;  %5919 = vtanh.f32 %v2814_v51 }
 0x73e   : > { %v5902_v54 = vpop.eup %5901  ;;  %5921 = vrcp.f32 %v2976_v12  ;;  %v2974_v9 = vadd.f32 1.0, %v5900_v13 }
 0x73f   : > { %v5904_v56 = vpop.eup %5903  ;;  %5923 = vrcp.f32 %v2878_v43  ;;  %v2923_v23 = vmul.f32 %v5902_v54, %v7446_v10  ;;  %v2741_v10 = vadd.f32 %v7442_v52, %v6653_v8 }
 0x740   : > { %v5906_v41 = vpop.eup %5905  ;;  %v3015_v17 = vmul.f32 %v5904_v56, %v7340_v32  ;;  %5925 = vrcp.f32 %v2974_v9  ;;  %v2920_v32 = vmul.f32 %v5894_v37, %v7353_v18 }
 0x741   : > { %v5908_v11 = vpop.eup %5907  ;;  %v7481_v50 = vadd.f32 %v2923_v23, %v2919_v28  ;;  %5927 = vpow2.f32 %v4419_v20  ;;  %v3013_v21 = vmul.f32 %v5906_v41, %v7348_v58  ;;  %v2733_v58 = vadd.f32 %v7444_v48, %v6598_v29 }
 0x742   : > { %v5910_v45 = vpop.eup %5909  ;;  %v3019_v57 = vmul.f32 %v5908_v11, %v5882_v61  ;;  %5929 = vpow2.f32 %v4431_v38  ;;  %v4420_v19 = vmul.f32 -1.442695, %v2741_v10 }
 0x743   : > { %v5912_v22 = vpop.eup %5911  ;;  %v2921_v51 = vmul.f32 %v5910_v45, %v7448_v40  ;;  %5931 = vpow2.f32 %v4417_v49  ;;  %v4418_v28 = vmul.f32 -1.442695, %v2733_v58 }
 0x744   : > { %v5914_v15 = vpop.eup %5913  ;;  %v7490_v34 = vadd.f32 %v3019_v57, %v3015_v17  ;;  %v3017_v27 = vmul.f32 %v5912_v22, %v5884_v35  ;;  %5933 = vpow2.f32 %v4429_v44 }
 0x745   : > { %v5916_v61 = vpop.eup %5915  ;;  %v7494_v55 = vadd.f32 %v2921_v51, %v2917_v39  ;;  %v2924_v52 = vmul.f32 %v5914_v15, %v7450_v33  ;;  %5935 = vtanh.f32 %v7481_v50 }
 0x746   : > { %v5918_v18 = vpop.eup %5917  ;;  %v7497_v37 = vadd.f32 %v3017_v27, %v3013_v21  ;;  %v3020_v40 = vmul.f32 %v5916_v61, %v7463_v63  ;;  %5937 = vtanh.f32 %v7490_v34 }
 0x747   : > { %v5920_v12 = vpop.eup %5919  ;;  %v7500_v20 = vadd.f32 %v2924_v52, %v2920_v32  ;;  %v2922_v35 = vmul.f32 %v5918_v18, %v7453_v26  ;;  %5939 = vpow2.f32 %v4420_v19 }
 0x748   : > { %v5922_v13 = vpop.eup %5921  ;;  %v3018_v48 = vmul.f32 %v5920_v12, %v7467_v14  ;;  %5941 = vpow2.f32 %v4432_v0 }
 0x749   : > { %v5924_v33 = vpop.eup %5923  ;;  %v3016_v43 = vmul.f32 %v5922_v13, %v7364_v59  ;;  %5943 = vpow2.f32 %v4418_v28  ;;  %v2830_v59 = vadd.f32 %v7458_v62, %v6598_v29 }
 0x74a   : > { %v5926_v60 = vpop.eup %5925  ;;  %v2918_v63 = vmul.f32 %v5924_v33, %v7366_v25  ;;  %5945 = vtanh.f32 %v7494_v55 }
 0x74b   : > { %v5928_v54 = vpop.eup %5927  ;;  %v3014_v9 = vmul.f32 %v5926_v60, %v7368_v31  ;;  %v7509_v26 = vadd.f32 %v3020_v40, %v3016_v43  ;;  %5947 = vtanh.f32 %v7497_v37  ;;  %v4430_v11 = vmul.f32 -1.442695, %v2830_v59 }
 0x74c   : > { %v5930_v38 = vpop.eup %5929  ;;  %v7511_v56 = vadd.f32 %v2922_v35, %v2918_v63  ;;  %v2907_v14 = vadd.f32 1.0, %v5928_v54  ;;  %5949 = vtanh.f32 %v7500_v20 }
 0x74d   : > { %v7516_v23 = vadd.f32 %v3018_v48, %v3014_v9  ;;  %v3003_v25 = vadd.f32 1.0, %v5930_v38  ;;  %v5932_v41 = vpop.eup %5931 }
 0x74e   : > { %v5934_v31 = vpop.eup %5933  ;;  %v2905_v17 = vadd.f32 1.0, %v5932_v41  ;;  %5951 = vrcp.f32 %v2907_v14 }
 0x74f   : > { %v3001_v49 = vadd.f32 1.0, %v5934_v31  ;;  %5953 = vrcp.f32 %v3003_v25  ;;  %v5936_v39 = vpop.eup %5935  ;;  %v7534_v31 = vld [vmem:[%s7980_s1 + $0x8] sm:$0xff]  }
 0x750   : > { %5955 = vrcp.f32 %v2905_v17  ;;  %v5938_v44 = vpop.eup %5937  ;;  %v7541_v17 = vld [vmem:[%s7980_s1 + $0x10] sm:$0xff]  }
 0x751   : > { %5957 = vrcp.f32 %v3001_v49  ;;  %v5940_v62 = vpop.eup %5939  ;;  %v7550_v49 = vld [vmem:[%s7980_s1 + $0x18] sm:$0xff]  }
 0x752   : > { %5959 = vpow2.f32 %v4430_v11  ;;  %v5942_v45 = vpop.eup %5941  ;;  %v2908_v21 = vadd.f32 1.0, %v5940_v62  ;;  %v7559_v11 = vld [vmem:[%s7980_s1 + $0x20] sm:$0xff]   ;;  %v7586_v62 = vld [vmem:[%s7980_s1 + $0x38] sm:$0xff]  }
 0x753   : > { %5961 = vtanh.f32 %v7509_v26  ;;  %v5944_v57 = vpop.eup %5943  ;;  %v3004_v10 = vadd.f32 1.0, %v5942_v45  ;;  %v6254_v45 = vld [vmem:[%s7980_s1] sm:$0xff]  }
 0x754   : > { %5963 = vtanh.f32 %v7511_v56  ;;  %v5946_v22 = vpop.eup %5945  ;;  %v2906_v32 = vadd.f32 1.0, %v5944_v57  ;;  %v5203_v57 = vld [vmem:[%s6422_s5 + $0xe4] ss:$8 sps:$4 sm:$0xff]  }
 0x755   : > { %5965 = vrcp.f32 %v2908_v21  ;;  %v5948_v51 = vpop.eup %5947  ;;  %v5201_v21 = vld [vmem:[%s6422_s5 + $0xe0] ss:$8 sps:$4 sm:$0xff]  }
 0x756   : > { %5967 = vrcp.f32 %v3004_v10  ;;  %v5950_v42 = vpop.eup %5949  ;;  %v5204_v10 = vld [vmem:[%s6422_s5 + $0xf0] ss:$8 sps:$4 sm:$0xff]  }
 0x757   : > { %5969 = vrcp.f32 %v2906_v32 }
 0x758   : > { %v5952_v15 = vpop.eup %5951  ;;  %5971 = vtanh.f32 %v7516_v23 }
 0x759   : > { %v5954_v27 = vpop.eup %5953  ;;  %v2935_v58 = vmul.f32 %v5952_v15, %v5936_v39  ;;  %v7568_v39 = vld [vmem:[%s7980_s1 + $0x28] sm:$0xff]  }
 0x75a   : > { %v5956_v61 = vpop.eup %5955  ;;  %v3031_v52 = vmul.f32 %v5954_v27, %v5938_v44  ;;  %v7577_v44 = vld [vmem:[%s7980_s1 + $0x30] sm:$0xff]  }
 0x75b   : > { %v5958_v18 = vpop.eup %5957  ;;  %v2933_v40 = vmul.f32 %v5956_v61, %v5946_v22  ;;  %4437 = vst [vmem:[%s6695_s12 + $0x160] sm:$0xff] %v2935_v58  ;;  %v5206_v22 = vld [vmem:[%s6422_s5 + $0xf4] ss:$8 sps:$4 sm:$0xff]   ;;  %s4559_s5 = sshll.u32 (%p6330_p5), %s4099_s15, 4 }
 0x75c   : > { %v5960_v19 = vpop.eup %5959  ;;  %v3029_v12 = vmul.f32 %v5958_v18, %v5948_v51  ;;  %4438 = vst [vmem:[%s6695_s12 + $0x168] sm:$0xff] %v3031_v52  ;;  %s7842_s20 = scalar_lea.vmem (%p6330_p5), %s7982_s3, %s4559_s5 }
 0x75d   : > { %v5962_v35 = vpop.eup %5961  ;;  %v3002_v0 = vadd.f32 1.0, %v5960_v19  ;;  %4433 = vst [vmem:[%s6695_s12 + $0x140] sm:$0xff] %v2933_v40 }
 0x75e   : > { %v5964_v13 = vpop.eup %5963  ;;  %4434 = vst [vmem:[%s6695_s12 + $0x148] sm:$0xff] %v3029_v12 }
 0x75f   : > { %v5966_v48 = vpop.eup %5965  ;;  %5973 = vrcp.f32 %v3002_v0 }
 0x760   : > { %v5968_v28 = vpop.eup %5967  ;;  %v2936_v33 = vmul.f32 %v5966_v48, %v5950_v42 }
 0x761   : > { %v5970_v43 = vpop.eup %5969  ;;  %v3032_v60 = vmul.f32 %v5968_v28, %v5962_v35 }
 0x762   : > { %v2934_v63 = vmul.f32 %v5970_v43, %v5964_v13  ;;  %4439 = vst [vmem:[%s6695_s12 + $0x170] sm:$0xff] %v2936_v33  ;;  %v3049_v54 = vpack.c.bf16 %v2936_v33, %v2935_v58  ;;  %v5972_v14 = vpop.eup %5971 }
 0x763   : > { %4440 = vst [vmem:[%s6695_s12 + $0x178] sm:$0xff] %v3032_v60  ;;  %v3050_v9 = vpack.c.bf16 %v3032_v60, %v3031_v52 }
 0x764   : > { %4435 = vst [vmem:[%s6695_s12 + $0x150] sm:$0xff] %v2934_v63  ;;  %v3047_v38 = vpack.c.bf16 %v2934_v63, %v2933_v40 }
 0x766   : > { %5032 = vmatprep.subr.bf16.mxu0 %v3047_v38 }
 0x767   : > { %5033 = vmatpush3.bf16.msra.mxu0 %v3047_v38 }
 0x768   : > { %5034 = vmatprep.subr.bf16.mxu0 %v3049_v54 }
 0x769   : > { %v5974_v59 = vpop.eup %5973 }
 0x76a   : > { %v3030_v25 = vmul.f32 %v5974_v59, %v5972_v14 }
 0x76b   : > { %5035 = vmatpush3.bf16.msra.mxu0 %v3049_v54 }
 0x76c   : > { %4436 = vst [vmem:[%s6695_s12 + $0x158] sm:$0xff] %v3030_v25  ;;  %v3048_v41 = vpack.c.bf16 %v3030_v25, %v3029_v12  ;;  %5076 = vmatprep.subr.bf16.mxu0 %v5201_v21 }
 0x76e   : > { %5056 = vmatprep.subr.bf16.mxu1 %v3048_v41  ;;  %5037 = vmatmul.mubr.msk.bf16.vlgmr.msra.gmra.mrb[96].mxu0 %vm503_vm0, %v7534_v31 }
 0x76f   : > { %5057 = vmatpush3.bf16.msra.mxu1 %v3048_v41  ;;  %5040 = vmatprep.mubr.msk.bf16.mxu0 %vm503_vm0, %v7541_v17 }
 0x770   : > { %5058 = vmatprep.subr.bf16.mxu1 %v3050_v9  ;;  %5077 = vmatpush3.bf16.msra.mxu0 %v5201_v21 }
 0x771   : > { %5078 = vmatprep.subr.bf16.mxu0 %v5204_v10 }
 0x773   : > { %5059 = vmatpush3.bf16.msra.mxu1 %v3050_v9 }
 0x774   : > { %5100 = vmatprep.subr.bf16.mxu1 %v5203_v57  ;;  %5079 = vmatpush3.bf16.msra.mxu0 %v5204_v10 }
 0x776   : > { %5061 = vmatmul.mubr.msk.bf16.vlgmr.msra.gmra.mrb[96].mxu1 %vm503_vm0, %v7534_v31  ;;  %5041 = vmatmul.mubr.msk.bf16.gmra.mrb[100].mxu0 %vm503_vm0, %v7550_v49 }
 0x777   : > { %5064 = vmatprep.mubr.msk.bf16.mxu1 %vm503_vm0, %v7541_v17  ;;  %5044 = vmatprep.mubr.msk.bf16.mxu0 %vm503_vm0, %v7559_v11 }
 0x778   : > { %5101 = vmatpush3.bf16.msra.mxu1 %v5203_v57 }
 0x779   : > { %5102 = vmatprep.subr.bf16.mxu1 %v5206_v22 }
 0x77c   : > { %5103 = vmatpush3.bf16.msra.mxu1 %v5206_v22 }
 0x77e   : > { %5065 = vmatmul.mubr.msk.bf16.gmra.mrb[100].mxu1 %vm503_vm0, %v7550_v49  ;;  %5045 = vmatmul.mubr.msk.bf16.gmra.mrb[104].mxu0 %vm503_vm0, %v7568_v39 }
 0x77f   : > { %5068 = vmatprep.mubr.msk.bf16.mxu1 %vm503_vm0, %v7559_v11  ;;  %5048 = vmatprep.mubr.msk.bf16.mxu0 %vm503_vm0, %v7577_v44 }
 0x786   : > { %5069 = vmatmul.mubr.msk.bf16.gmra.mrb[104].mxu1 %vm503_vm0, %v7568_v39  ;;  %5049 = vmatmul.mubr.msk.bf16.gmra.mrb[108].mxu0 %vm503_vm0, %v7586_v62 }
 0x787   : > { %5072 = vmatprep.mubr.msk.bf16.mxu1 %vm503_vm0, %v7577_v44  ;;  %5084 = vmatprep.mubr.msk.bf16.mxu0 %vm503_vm0, %v6254_v45 }
 0x78e   : > { %5073 = vmatmul.mubr.msk.bf16.gmra.mrb[108].mxu1 %vm503_vm0, %v7586_v62 }
 0x78f   : > { %5108 = vmatprep.mubr.msk.bf16.mxu1 %vm503_vm0, %v6254_v45 }
 0x841   : > { %v5038_v32 = vpop.f32.mrb[96].mxu0 }
 0x842   : > { %v3114_v51 = vadd.f32 %v5038_v32, %v6555_v5  ;;  %v3105_v42 = vpop.f32.mrb[97].mxu0 }
 0x843   : > { %v3106_v15 = vadd.f32 %v3105_v42, %v6547_v1  ;;  %v5039_v27 = vpop.f32.mrb[98].mxu0 }
 0x844   : > { %v4467_v58 = vmul.f32 -1.442695, %v3114_v51  ;;  %v3117_v61 = vadd.f32 %v5039_v27, %v6557_v6  ;;  %v3108_v52 = vpop.f32.mrb[99].mxu0 }
 0x845   : > { %v4465_v18 = vmul.f32 -1.442695, %v3106_v15  ;;  %v3109_v40 = vadd.f32 %v3108_v52, %v6551_v3 }
 0x846   : > { %5975 = vpow2.f32 %v4467_v58  ;;  %v4468_v19 = vmul.f32 -1.442695, %v3117_v61 }
 0x847   : > { %5977 = vpow2.f32 %v4465_v18  ;;  %v4466_v12 = vmul.f32 -1.442695, %v3109_v40 }
 0x848   : > { %5979 = vpow2.f32 %v4468_v19 }
 0x849   : > { %v5062_v35 = vpop.f32.mrb[96].mxu1  ;;  %5981 = vpow2.f32 %v4466_v12  ;;  %v5042_v0 = vpop.f32.mrb[100].mxu0 }
 0x84a   : > { %v3211_v13 = vadd.f32 %v5062_v35, %v6555_v5  ;;  %v3202_v48 = vpop.f32.mrb[97].mxu1  ;;  %v3130_v28 = vadd.f32 %v5042_v0, %v6559_v7  ;;  %v3121_v33 = vpop.f32.mrb[101].mxu0 }
 0x84b   : > { %v3203_v43 = vadd.f32 %v3202_v48, %v6547_v1  ;;  %v5063_v60 = vpop.f32.mrb[98].mxu1  ;;  %v5043_v63 = vpop.f32.mrb[102].mxu0  ;;  %v3122_v57 = vadd.f32 %v3121_v33, %v6549_v2 }
 0x84c   : > { %v4479_v54 = vmul.f32 -1.442695, %v3211_v13  ;;  %v3214_v9 = vadd.f32 %v5063_v60, %v6557_v6  ;;  %v3205_v38 = vpop.f32.mrb[99].mxu1  ;;  %v3124_v14 = vpop.f32.mrb[103].mxu0  ;;  %v4471_v45 = vmul.f32 -1.442695, %v3130_v28  ;;  %v3133_v52 = vadd.f32 %v5043_v63, %v6569_v30 }
 0x84d   : > { %v4477_v59 = vmul.f32 -1.442695, %v3203_v43  ;;  %v3206_v25 = vadd.f32 %v3205_v38, %v6551_v3  ;;  %v4469_v12 = vmul.f32 -1.442695, %v3122_v57 }
 0x84e   : > { %5983 = vpow2.f32 %v4479_v54  ;;  %v4480_v41 = vmul.f32 -1.442695, %v3214_v9  ;;  %v4472_v63 = vmul.f32 -1.442695, %v3133_v52 }
 0x84f   : > { %5985 = vpow2.f32 %v4477_v59  ;;  %v4478_v21 = vmul.f32 -1.442695, %v3206_v25  ;;  %v3125_v25 = vadd.f32 %v3124_v14, %v6553_v4 }
 0x850   : > { %v5976_v10 = vpop.eup %5975  ;;  %5987 = vpow2.f32 %v4480_v41 }
 0x851   : > { %v5978_v22 = vpop.eup %5977  ;;  %v3279_v32 = vadd.f32 1.0, %v5976_v10  ;;  %5989 = vpow2.f32 %v4478_v21  ;;  %v5066_v51 = vpop.f32.mrb[100].mxu1 }
 0x852   : > { %v5046_v42 = vpop.f32.mrb[104].mxu0  ;;  %v5980_v15 = vpop.eup %5979  ;;  %v3277_v27 = vadd.f32 1.0, %v5978_v22  ;;  %5991 = vpow2.f32 %v4471_v45  ;;  %v3227_v58 = vadd.f32 %v5066_v51, %v6559_v7 }
 0x853   : > { %v3218_v61 = vpop.f32.mrb[101].mxu1  ;;  %v7615_v18 = vpop.f32.mrb[105].mxu0  ;;  %5993 = vrcp.f32 %v3279_v32  ;;  %v3280_v19 = vadd.f32 1.0, %v5980_v15 }
 0x854   : > { %v5982_v40 = vpop.eup %5981  ;;  %v3219_v35 = vadd.f32 %v3218_v61, %v6549_v2  ;;  %v5067_v0 = vpop.f32.mrb[102].mxu1  ;;  %5995 = vrcp.f32 %v3277_v27  ;;  %v4483_v28 = vmul.f32 -1.442695, %v3227_v58 }
 0x855   : > { %v7618_v13 = vpop.f32.mrb[106].mxu0  ;;  %v3278_v48 = vadd.f32 1.0, %v5982_v40  ;;  %v3221_v33 = vpop.f32.mrb[103].mxu1  ;;  %5997 = vrcp.f32 %v3280_v19  ;;  %v3230_v9 = vadd.f32 %v5067_v0, %v6569_v30  ;;  %v4470_v0 = vmul.f32 -1.442695, %v3125_v25 }
 0x856   : > { %v7620_v43 = vpop.f32.mrb[107].mxu0  ;;  %v4481_v60 = vmul.f32 -1.442695, %v3219_v35  ;;  %v3222_v10 = vadd.f32 %v3221_v33, %v6553_v4 }
 0x857   : > { %5999 = vrcp.f32 %v3278_v48  ;;  %v4484_v52 = vmul.f32 -1.442695, %v3230_v9 }
 0x858   : > { %6001 = vpow2.f32 %v4483_v28  ;;  %v5984_v54 = vpop.eup %5983  ;;  %v4482_v28 = vmul.f32 -1.442695, %v3222_v10 }
 0x859   : > { %6003 = vpow2.f32 %v4469_v12  ;;  %v5986_v38 = vpop.eup %5985  ;;  %v3375_v59 = vadd.f32 1.0, %v5984_v54  ;;  %v5070_v41 = vpop.f32.mrb[104].mxu1 }
 0x85a   : > { %6005 = vpow2.f32 %v4481_v60  ;;  %v7624_v45 = vpop.f32.mrb[108].mxu0  ;;  %v5988_v21 = vpop.eup %5987  ;;  %v3373_v57 = vadd.f32 1.0, %v5986_v38  ;;  %v3146_v60 = vadd.f32 %v5046_v42, %v6601_v36  ;;  %v3243_v42 = vadd.f32 %v5070_v41, %v6601_v36 }
 0x85b   : > { %6007 = vpow2.f32 %v4472_v63  ;;  %v3234_v22 = vpop.f32.mrb[105].mxu1  ;;  %v7627_v32 = vpop.f32.mrb[109].mxu0  ;;  %v3376_v15 = vadd.f32 1.0, %v5988_v21 }
 0x85c   : > { %v5990_v51 = vpop.eup %5989  ;;  %6009 = vrcp.f32 %v3375_v59  ;;  %v5071_v27 = vpop.f32.mrb[106].mxu1 }
 0x85d   : > { %v7629_v58 = vpop.f32.mrb[110].mxu0  ;;  %v5992_v61 = vpop.eup %5991  ;;  %6011 = vrcp.f32 %v3373_v57  ;;  %v3374_v14 = vadd.f32 1.0, %v5990_v51  ;;  %v3246_v41 = vadd.f32 %v5071_v27, %v8003_v46 }
 0x85e   : > { %v3237_v40 = vpop.f32.mrb[107].mxu1  ;;  %v7631_v19 = vpop.f32.mrb[111].mxu0  ;;  %6013 = vrcp.f32 %v3376_v15  ;;  %v3303_v35 = vadd.f32 1.0, %v5992_v61 }
 0x85f   : > { %v5994_v12 = vpop.eup %5993  ;;  %6015 = vrcp.f32 %v3374_v14 }
 0x860   : > { %v7633_v48 = vpop.eup %5995  ;;  %6017 = vrcp.f32 %v3303_v35  ;;  %v3138_v35 = vadd.f32 %v7615_v18, %v8001_v47 }
 0x861   : > { %v7635_v33 = vpop.eup %5997  ;;  %6019 = vpow2.f32 %v4484_v52  ;;  %v5074_v9 = vpop.f32.mrb[108].mxu1 }
 0x862   : > { %v7638_v63 = vpop.eup %5999  ;;  %6021 = vpow2.f32 %v4470_v0  ;;  %v3250_v21 = vpop.f32.mrb[109].mxu1  ;;  %v3259_v27 = vadd.f32 %v5074_v9, %v8005_v24 }
 0x863   : > { %v6002_v54 = vpop.eup %6001  ;;  %6023 = vpow2.f32 %v4482_v28  ;;  %v7640_v51 = vpop.f32.mrb[110].mxu1  ;;  %v3235_v28 = vadd.f32 %v3234_v22, %v8001_v47  ;;  %v3141_v22 = vadd.f32 %v7620_v43, %v8004_v53 }
 0x864   : > { %v6004_v38 = vpop.eup %6003  ;;  %v3399_v59 = vadd.f32 1.0, %v6002_v54  ;;  %6025 = vtanh.f32 %v3146_v60  ;;  %v7643_v61 = vpop.f32.mrb[111].mxu1  ;;  %v3149_v54 = vadd.f32 %v7618_v13, %v8003_v46  ;;  %v4487_v9 = vmul.f32 -1.442695, %v3259_v27 }
 0x865   : > { %v6006_v25 = vpop.eup %6005  ;;  %v3301_v57 = vadd.f32 1.0, %v6004_v38 }
 0x866   : > { %v6008_v10 = vpop.eup %6007  ;;  %6027 = vrcp.f32 %v3399_v59  ;;  %v3397_v15 = vadd.f32 1.0, %v6006_v25 }
 0x867   : > { %v6010_v14 = vpop.eup %6009  ;;  %6029 = vrcp.f32 %v3301_v57  ;;  %v3304_v52 = vadd.f32 1.0, %v6008_v10  ;;  %v3162_v10 = vadd.f32 %v7624_v45, %v8005_v24  ;;  %v3251_v45 = vadd.f32 %v3250_v21, %v8006_v16 }
 0x868   : > { %v6012_v0 = vpop.eup %6011  ;;  %6031 = vrcp.f32 %v3397_v15 }
 0x869   : > { %v7648_v60 = vpop.eup %6013  ;;  %6033 = vrcp.f32 %v3304_v52 }
 0x86a   : > { %v7652_v38 = vpop.eup %6015  ;;  %6035 = vtanh.f32 %v3243_v42 }
 0x86b   : > { %v6018_v59 = vpop.eup %6017  ;;  %6037 = vtanh.f32 %v3138_v35 }
 0x86c   : > { %v6020_v25 = vpop.eup %6019  ;;  %6039 = vtanh.f32 %v3235_v28  ;;  %v3343_v13 = vmul.f32 %v6018_v59, %v7481_v50  ;;  %v3238_v28 = vadd.f32 %v3237_v40, %v8004_v53  ;;  %v4475_v50 = vmul.f32 -1.442695, %v3162_v10 }
 0x86d   : > { %v6022_v18 = vpop.eup %6021  ;;  %v3400_v57 = vadd.f32 1.0, %v6020_v25  ;;  %6041 = vtanh.f32 %v3149_v54  ;;  %v3154_v54 = vadd.f32 %v7627_v32, %v8006_v16  ;;  %v3165_v10 = vadd.f32 %v7629_v58, %v6653_v8 }
 0x86e   : > { %v6024_v15 = vpop.eup %6023  ;;  %v3302_v52 = vadd.f32 1.0, %v6022_v18  ;;  %6043 = vtanh.f32 %v3246_v41 }
 0x86f   : > { %v6026_v42 = vpop.eup %6025  ;;  %6045 = vrcp.f32 %v3400_v57  ;;  %v3398_v35 = vadd.f32 1.0, %v6024_v15  ;;  %v4473_v40 = vmul.f32 -1.442695, %v3154_v54 }
 0x870   : > { %v6028_v25 = vpop.eup %6027  ;;  %6047 = vrcp.f32 %v3302_v52  ;;  %v3347_v43 = vmul.f32 %v6026_v42, %v5994_v12  ;;  %v4485_v52 = vmul.f32 -1.442695, %v3251_v45 }
 0x871   : > { %v6030_v46 = vpop.eup %6029  ;;  %6049 = vrcp.f32 %v3398_v35  ;;  %v3439_v57 = vmul.f32 %v6028_v25, %v7490_v34  ;;  %v4476_v25 = vmul.f32 -1.442695, %v3165_v10 }
 0x872   : > { %v6032_v59 = vpop.eup %6031  ;;  %v7665_v41 = vadd.f32 %v3347_v43, %v3343_v13  ;;  %6051 = vtanh.f32 %v3141_v22  ;;  %v3341_v32 = vmul.f32 %v6030_v46, %v7494_v55  ;;  %v3262_v46 = vadd.f32 %v7640_v51, %v6653_v8 }
 0x873   : > { %v6034_v18 = vpop.eup %6033  ;;  %6053 = vtanh.f32 %v3238_v28  ;;  %v3437_v21 = vmul.f32 %v6032_v59, %v7497_v37 }
 0x874   : > { %v6036_v15 = vpop.eup %6035  ;;  %6055 = vpow2.f32 %v4475_v50  ;;  %v3344_v22 = vmul.f32 %v6034_v18, %v7500_v20  ;;  %v3157_v20 = vadd.f32 %v7631_v19, %v6598_v29  ;;  %v4488_v59 = vmul.f32 -1.442695, %v3262_v46 }
 0x875   : > { %v6038_v12 = vpop.eup %6037  ;;  %v3443_v42 = vmul.f32 %v6036_v15, %v6010_v14  ;;  %6057 = vpow2.f32 %v4487_v9 }
 0x876   : > { %v6040_v13 = vpop.eup %6039  ;;  %v3345_v27 = vmul.f32 %v6038_v12, %v7633_v48  ;;  %6059 = vpow2.f32 %v4473_v40  ;;  %v4474_v18 = vmul.f32 -1.442695, %v3157_v20 }
 0x877   : > { %v6042_v34 = vpop.eup %6041  ;;  %v7674_v35 = vadd.f32 %v3443_v42, %v3439_v57  ;;  %v3441_v28 = vmul.f32 %v6040_v13, %v6012_v0  ;;  %6061 = vpow2.f32 %v4485_v52 }
 0x878   : > { %v6044_v55 = vpop.eup %6043  ;;  %v7678_v37 = vadd.f32 %v3345_v27, %v3341_v32  ;;  %v3348_v14 = vmul.f32 %v6042_v34, %v7635_v33  ;;  %6063 = vtanh.f32 %v7665_v41 }
 0x879   : > { %v6046_v58 = vpop.eup %6045  ;;  %v7683_v48 = vadd.f32 %v3441_v28, %v3437_v21  ;;  %v3444_v54 = vmul.f32 %v6044_v55, %v7648_v60  ;;  %6065 = vpow2.f32 %v4476_v25 }
 0x87a   : > { %v6048_v0 = vpop.eup %6047  ;;  %v3440_v43 = vmul.f32 %v6046_v58, %v7509_v26  ;;  %v7687_v45 = vadd.f32 %v3348_v14, %v3344_v22  ;;  %6067 = vtanh.f32 %v7674_v35 }
 0x87b   : > { %v6050_v51 = vpop.eup %6049  ;;  %v3342_v50 = vmul.f32 %v6048_v0, %v7511_v56  ;;  %6069 = vpow2.f32 %v4488_v59  ;;  %v3254_v56 = vadd.f32 %v7643_v61, %v6598_v29 }
 0x87c   : > { %v6052_v33 = vpop.eup %6051  ;;  %v3438_v9 = vmul.f32 %v6050_v51, %v7516_v23  ;;  %v7692_v19 = vadd.f32 %v3444_v54, %v3440_v43  ;;  %6071 = vpow2.f32 %v4474_v18 }
 0x87d   : > { %v6054_v57 = vpop.eup %6053  ;;  %v3346_v60 = vmul.f32 %v6052_v33, %v7638_v63  ;;  %6073 = vtanh.f32 %v7678_v37  ;;  %v4486_v10 = vmul.f32 -1.442695, %v3254_v56 }
 0x87e   : > { %v3442_v26 = vmul.f32 %v6054_v57, %v7652_v38  ;;  %v6056_v40 = vpop.eup %6055  ;;  %6075 = vtanh.f32 %v7683_v48 }
 0x87f   : > { %v7697_v15 = vadd.f32 %v3346_v60, %v3342_v50  ;;  %v6058_v23 = vpop.eup %6057  ;;  %v3331_v52 = vadd.f32 1.0, %v6056_v40 }
 0x880   : > { %v7701_v32 = vadd.f32 %v3442_v26, %v3438_v9  ;;  %v6060_v12 = vpop.eup %6059  ;;  %v3427_v63 = vadd.f32 1.0, %v6058_v23 }
 0x881   : > { %v6062_v21 = vpop.eup %6061  ;;  %v3329_v38 = vadd.f32 1.0, %v6060_v12  ;;  %6077 = vrcp.f32 %v3331_v52 }
 0x882   : > { %v3425_v42 = vadd.f32 1.0, %v6062_v21  ;;  %6079 = vrcp.f32 %v3427_v63  ;;  %v6064_v13 = vpop.eup %6063 }
 0x883   : > { %6081 = vrcp.f32 %v3329_v38  ;;  %v6066_v61 = vpop.eup %6065 }
 0x884   : > { %6083 = vrcp.f32 %v3425_v42  ;;  %v6068_v22 = vpop.eup %6067  ;;  %v3332_v27 = vadd.f32 1.0, %v6066_v61 }
 0x885   : > { %6085 = vpow2.f32 %v4486_v10  ;;  %v6070_v34 = vpop.eup %6069 }
 0x886   : > { %6087 = vtanh.f32 %v7687_v45  ;;  %v6072_v28 = vpop.eup %6071  ;;  %v3428_v46 = vadd.f32 1.0, %v6070_v34 }
 0x887   : > { %6089 = vtanh.f32 %v7692_v19  ;;  %v6074_v55 = vpop.eup %6073  ;;  %v3330_v14 = vadd.f32 1.0, %v6072_v28 }
 0x888   : > { %6091 = vrcp.f32 %v3332_v27  ;;  %v6076_v20 = vpop.eup %6075 }
 0x889   : > { %6093 = vtanh.f32 %v7697_v15 }
 0x88a   : > { %6095 = vrcp.f32 %v3428_v46 }
 0x88b   : > { %v6078_v58 = vpop.eup %6077  ;;  %6097 = vrcp.f32 %v3330_v14 }
 0x88c   : > { %v6080_v54 = vpop.eup %6079  ;;  %v3359_v25 = vmul.f32 %v6078_v58, %v6064_v13  ;;  %6099 = vtanh.f32 %v7701_v32 }
 0x88d   : > { %v6082_v0 = vpop.eup %6081  ;;  %v3455_v43 = vmul.f32 %v6080_v54, %v6068_v22 }
 0x88e   : > { %v6084_v51 = vpop.eup %6083  ;;  %v3357_v50 = vmul.f32 %v6082_v0, %v6074_v55  ;;  %4493 = vst [vmem:[%s6695_s12 + $0x1a0] sm:$0xff] %v3359_v25 }
 0x88f   : > { %v6086_v59 = vpop.eup %6085  ;;  %v3453_v33 = vmul.f32 %v6084_v51, %v6076_v20  ;;  %4494 = vst [vmem:[%s6695_s12 + $0x1a8] sm:$0xff] %v3455_v43 }
 0x890   : > { %v6088_v9 = vpop.eup %6087  ;;  %v3426_v18 = vadd.f32 1.0, %v6086_v59  ;;  %4489 = vst [vmem:[%s6695_s12 + $0x180] sm:$0xff] %v3357_v50 }
 0x891   : > { %v6090_v57 = vpop.eup %6089  ;;  %4490 = vst [vmem:[%s6695_s12 + $0x188] sm:$0xff] %v3453_v33 }
 0x892   : > { %v6092_v60 = vpop.eup %6091  ;;  %6101 = vrcp.f32 %v3426_v18 }
 0x893   : > { %v6094_v26 = vpop.eup %6093  ;;  %v3360_v40 = vmul.f32 %v6092_v60, %v6088_v9 }
 0x894   : > { %v6096_v56 = vpop.eup %6095 }
 0x895   : > { %v6098_v23 = vpop.eup %6097  ;;  %4495 = vst [vmem:[%s6695_s12 + $0x1b0] sm:$0xff] %v3360_v40  ;;  %v3473_v52 = vpack.c.bf16 %v3360_v40, %v3359_v25  ;;  %v3456_v12 = vmul.f32 %v6096_v56, %v6090_v57 }
 0x896   : > { %v3358_v63 = vmul.f32 %v6098_v23, %v6094_v26  ;;  %v6100_v42 = vpop.eup %6099 }
 0x897   : > { %4496 = vst [vmem:[%s6695_s12 + $0x1b8] sm:$0xff] %v3456_v12  ;;  %v3474_v21 = vpack.c.bf16 %v3456_v12, %v3455_v43 }
 0x898   : > { %4491 = vst [vmem:[%s6695_s12 + $0x190] sm:$0xff] %v3358_v63  ;;  %v3471_v38 = vpack.c.bf16 %v3358_v63, %v3357_v50 }
 0x89a   : > { %5080 = vmatprep.subr.bf16.mxu0 %v3471_v38 }
 0x89b   : > { %5081 = vmatpush3.bf16.msra.mxu0 %v3471_v38 }
 0x89c   : > { %v6102_v10 = vpop.eup %6101  ;;  %5082 = vmatprep.subr.bf16.mxu0 %v3473_v52 }
 0x89d   : > { %v3454_v13 = vmul.f32 %v6102_v10, %v6100_v42 }
 0x89f   : > { %4492 = vst [vmem:[%s6695_s12 + $0x198] sm:$0xff] %v3454_v13  ;;  %v3472_v61 = vpack.c.bf16 %v3454_v13, %v3453_v33  ;;  %5083 = vmatpush3.bf16.msra.mxu0 %v3473_v52 }
 0x8a1   : > { %5104 = vmatprep.subr.bf16.mxu1 %v3472_v61 }
 0x8a2   : > { %5105 = vmatpush3.bf16.msra.mxu1 %v3472_v61  ;;  %5085 = vmatmul.mubr.msk.bf16.vlgmr.msra.gmra.mrb[112].mxu0 %vm503_vm0, %v7534_v31 }
 0x8a3   : > { %5106 = vmatprep.subr.bf16.mxu1 %v3474_v21  ;;  %5088 = vmatprep.mubr.msk.bf16.mxu0 %vm503_vm0, %v7541_v17 }
 0x8a6   : > { %5107 = vmatpush3.bf16.msra.mxu1 %v3474_v21 }
 0x8a9   : > { %5109 = vmatmul.mubr.msk.bf16.vlgmr.msra.gmra.mrb[112].mxu1 %vm503_vm0, %v7534_v31 }
 0x8aa   : > { %5112 = vmatprep.mubr.msk.bf16.mxu1 %vm503_vm0, %v7541_v17  ;;  %5089 = vmatmul.mubr.msk.bf16.gmra.mrb[116].mxu0 %vm503_vm0, %v7550_v49 }
 0x8ab   : > { %5092 = vmatprep.mubr.msk.bf16.mxu0 %vm503_vm0, %v7559_v11 }
 0x8b1   : > { %5113 = vmatmul.mubr.msk.bf16.gmra.mrb[116].mxu1 %vm503_vm0, %v7550_v49 }
 0x8b2   : > { %5116 = vmatprep.mubr.msk.bf16.mxu1 %vm503_vm0, %v7559_v11  ;;  %5093 = vmatmul.mubr.msk.bf16.gmra.mrb[120].mxu0 %vm503_vm0, %v7568_v39 }
 0x8b3   : > { %5096 = vmatprep.mubr.msk.bf16.mxu0 %vm503_vm0, %v7577_v44 }
 0x8b9   : > { %5117 = vmatmul.mubr.msk.bf16.gmra.mrb[120].mxu1 %vm503_vm0, %v7568_v39 }
 0x8ba   : > { %5120 = vmatprep.mubr.msk.bf16.mxu1 %vm503_vm0, %v7577_v44  ;;  %5097 = vmatmul.mubr.msk.bf16.gmra.mrb[124].mxu0 %vm503_vm0, %v7586_v62 }
 0x8c1   : > { %5121 = vmatmul.mubr.msk.bf16.gmra.mrb[124].mxu1 %vm503_vm0, %v7586_v62 }
 0x975   : > { %v5086_v31 = vpop.f32.mrb[112].mxu0 }
 0x976   : > { %v3538_v17 = vadd.f32 %v5086_v31, %v6555_v5  ;;  %v3529_v49 = vpop.f32.mrb[113].mxu0 }
 0x977   : > { %v3530_v11 = vadd.f32 %v3529_v49, %v6547_v1  ;;  %v5087_v22 = vpop.f32.mrb[114].mxu0 }
 0x978   : > { %v4523_v27 = vmul.f32 -1.442695, %v3538_v17  ;;  %v3541_v34 = vadd.f32 %v5087_v22, %v6557_v6  ;;  %v3532_v39 = vpop.f32.mrb[115].mxu0 }
 0x979   : > { %v4521_v28 = vmul.f32 -1.442695, %v3530_v11  ;;  %v3533_v44 = vadd.f32 %v3532_v39, %v6551_v3 }
 0x97a   : > { %6103 = vpow2.f32 %v4523_v27  ;;  %v4524_v46 = vmul.f32 -1.442695, %v3541_v34 }
 0x97b   : > { %6105 = vpow2.f32 %v4521_v28  ;;  %v4522_v55 = vmul.f32 -1.442695, %v3533_v44 }
 0x97c   : > { %v5110_v14 = vpop.f32.mrb[112].mxu1  ;;  %6107 = vpow2.f32 %v4524_v46 }
 0x97d   : > { %v3635_v62 = vadd.f32 %v5110_v14, %v6555_v5  ;;  %v3626_v20 = vpop.f32.mrb[113].mxu1  ;;  %6109 = vpow2.f32 %v4522_v55  ;;  %v5090_v58 = vpop.f32.mrb[116].mxu0 }
 0x97e   : > { %v3627_v54 = vadd.f32 %v3626_v20, %v6547_v1  ;;  %v5111_v25 = vpop.f32.mrb[114].mxu1  ;;  %v3554_v0 = vadd.f32 %v5090_v58, %v6559_v7  ;;  %v3545_v43 = vpop.f32.mrb[117].mxu0 }
 0x97f   : > { %v4535_v51 = vmul.f32 -1.442695, %v3635_v62  ;;  %v3638_v50 = vadd.f32 %v5111_v25, %v6557_v6  ;;  %v3629_v59 = vpop.f32.mrb[115].mxu1  ;;  %v3546_v33 = vadd.f32 %v3545_v43, %v6549_v2  ;;  %v5091_v9 = vpop.f32.mrb[118].mxu0 }
 0x980   : > { %v4533_v18 = vmul.f32 -1.442695, %v3627_v54  ;;  %v3630_v57 = vadd.f32 %v3629_v59, %v6551_v3  ;;  %v3548_v5 = vpop.f32.mrb[119].mxu0  ;;  %v4527_v26 = vmul.f32 -1.442695, %v3554_v0  ;;  %v3557_v21 = vadd.f32 %v5091_v9, %v6569_v30 }
 0x981   : > { %6111 = vpow2.f32 %v4535_v51  ;;  %v4536_v60 = vmul.f32 -1.442695, %v3638_v50  ;;  %v4525_v40 = vmul.f32 -1.442695, %v3546_v33  ;;  %v3549_v20 = vadd.f32 %v3548_v5, %v6553_v4 }
 0x982   : > { %6113 = vpow2.f32 %v4533_v18  ;;  %v4534_v1 = vmul.f32 -1.442695, %v3630_v57  ;;  %v4528_v39 = vmul.f32 -1.442695, %v3557_v21 }
 0x983   : > { %6115 = vpow2.f32 %v4536_v60 }
 0x984   : > { %v6104_v56 = vpop.eup %6103  ;;  %6117 = vpow2.f32 %v4534_v1  ;;  %v5114_v23 = vpop.f32.mrb[116].mxu1 }
 0x985   : > { %v6106_v52 = vpop.eup %6105  ;;  %v3703_v6 = vadd.f32 1.0, %v6104_v56  ;;  %6119 = vpow2.f32 %v4527_v26  ;;  %v3651_v12 = vadd.f32 %v5114_v23, %v6559_v7  ;;  %v3642_v63 = vpop.f32.mrb[117].mxu1 }
 0x986   : > { %v5094_v3 = vpop.f32.mrb[120].mxu0  ;;  %v6108_v38 = vpop.eup %6107  ;;  %v3701_v42 = vadd.f32 1.0, %v6106_v52  ;;  %6121 = vpow2.f32 %v4525_v40  ;;  %v3643_v10 = vadd.f32 %v3642_v63, %v6549_v2  ;;  %v4526_v40 = vmul.f32 -1.442695, %v3549_v20 }
 0x987   : > { %v5115_v13 = vpop.f32.mrb[118].mxu1  ;;  %v7758_v61 = vpop.f32.mrb[121].mxu0  ;;  %6123 = vrcp.f32 %v3703_v6  ;;  %v3704_v17 = vadd.f32 1.0, %v6108_v38  ;;  %v4539_v49 = vmul.f32 -1.442695, %v3651_v12  ;;  %v3570_v52 = vadd.f32 %v5094_v3, %v6601_v36 }
 0x988   : > { %v6110_v31 = vpop.eup %6109  ;;  %v3645_v11 = vpop.f32.mrb[119].mxu1  ;;  %6125 = vrcp.f32 %v3701_v42  ;;  %v4537_v27 = vmul.f32 -1.442695, %v3643_v10  ;;  %v3654_v46 = vadd.f32 %v5115_v13, %v6569_v30 }
 0x989   : > { %v7760_v22 = vpop.f32.mrb[122].mxu0  ;;  %v3702_v7 = vadd.f32 1.0, %v6110_v31  ;;  %6127 = vrcp.f32 %v3704_v17  ;;  %v3646_v43 = vadd.f32 %v3645_v11, %v6553_v4 }
 0x98a   : > { %v7762_v34 = vpop.f32.mrb[123].mxu0  ;;  %v4540_v60 = vmul.f32 -1.442695, %v3654_v46 }
 0x98b   : > { %6129 = vrcp.f32 %v3702_v7  ;;  %v6112_v28 = vpop.eup %6111  ;;  %v4538_v56 = vmul.f32 -1.442695, %v3646_v43  ;;  %v3562_v7 = vadd.f32 %v7758_v61, %v8001_v47  ;;  %v3565_v61 = vadd.f32 %v7762_v34, %v8004_v53 }
 0x98c   : > { %6131 = vpow2.f32 %v4539_v49  ;;  %v6114_v2 = vpop.eup %6113  ;;  %v3799_v44 = vadd.f32 1.0, %v6112_v28  ;;  %v5118_v55 = vpop.f32.mrb[120].mxu1 }
 0x98d   : > { %6133 = vpow2.f32 %v4537_v27  ;;  %v6116_v14 = vpop.eup %6115  ;;  %v3797_v62 = vadd.f32 1.0, %v6114_v2  ;;  %v3658_v58 = vpop.f32.mrb[121].mxu1  ;;  %v3667_v17 = vadd.f32 %v5118_v55, %v6601_v36  ;;  %v8007_v2 = vld [vmem:[#allocation7_spill] sm:$0xff] }
 0x98e   : > { %6135 = vpow2.f32 %v4528_v39  ;;  %v5098_v54 = vpop.f32.mrb[124].mxu0  ;;  %v6118_v25 = vpop.eup %6117  ;;  %v3800_v0 = vadd.f32 1.0, %v6116_v14  ;;  %v3659_v39 = vadd.f32 %v3658_v58, %v8001_v47 }
 0x98f   : > { %6137 = vrcp.f32 %v3799_v44  ;;  %v5119_v51 = vpop.f32.mrb[122].mxu1  ;;  %v3577_v50 = vpop.f32.mrb[125].mxu0  ;;  %v3798_v33 = vadd.f32 1.0, %v6118_v25  ;;  %v3573_v44 = vadd.f32 %v7760_v22, %v8007_v2  ;;  %v3586_v47 = vadd.f32 %v5098_v54, %v8005_v24 }
 0x990   : > { %v6120_v59 = vpop.eup %6119  ;;  %6139 = vrcp.f32 %v3797_v62  ;;  %v3661_v9 = vpop.f32.mrb[123].mxu1  ;;  %v3670_v36 = vadd.f32 %v5119_v51, %v8007_v2  ;;  %v3578_v25 = vadd.f32 %v3577_v50, %v8006_v16 }
 0x991   : > { %v7767_v30 = vpop.f32.mrb[126].mxu0  ;;  %v6122_v18 = vpop.eup %6121  ;;  %6141 = vrcp.f32 %v3800_v0  ;;  %v3727_v57 = vadd.f32 1.0, %v6120_v59  ;;  %v3662_v34 = vadd.f32 %v3661_v9, %v8004_v53  ;;  %v4531_v54 = vmul.f32 -1.442695, %v3586_v47 }
 0x992   : > { %v7769_v5 = vpop.f32.mrb[127].mxu0  ;;  %v7771_v26 = vpop.eup %6123  ;;  %6143 = vrcp.f32 %v3798_v33  ;;  %v3725_v1 = vadd.f32 1.0, %v6122_v18 }
 0x993   : > { %v7773_v4 = vpop.eup %6125  ;;  %6145 = vrcp.f32 %v3727_v57 }
 0x994   : > { %v7775_v23 = vpop.eup %6127  ;;  %6147 = vrcp.f32 %v3725_v1  ;;  %v5122_v12 = vpop.f32.mrb[124].mxu1 }
 0x995   : > { %v7778_v6 = vpop.eup %6129  ;;  %6149 = vpow2.f32 %v4540_v60  ;;  %v3674_v21 = vpop.f32.mrb[125].mxu1  ;;  %v3683_v22 = vadd.f32 %v5122_v12, %v8005_v24 }
 0x996   : > { %v6132_v63 = vpop.eup %6131  ;;  %6151 = vpow2.f32 %v4526_v40  ;;  %v7780_v10 = vpop.f32.mrb[126].mxu1  ;;  %v3675_v18 = vadd.f32 %v3674_v21, %v8006_v16 }
 0x997   : > { %v6134_v38 = vpop.eup %6133  ;;  %v3823_v42 = vadd.f32 1.0, %v6132_v63  ;;  %6153 = vpow2.f32 %v4538_v56  ;;  %v7783_v49 = vpop.f32.mrb[127].mxu1  ;;  %v4543_v50 = vmul.f32 -1.442695, %v3683_v22  ;;  %v4529_v56 = vmul.f32 -1.442695, %v3578_v25 }
 0x998   : > { %v6136_v13 = vpop.eup %6135  ;;  %v3821_v31 = vadd.f32 1.0, %v6134_v38  ;;  %6155 = vtanh.f32 %v3570_v52  ;;  %v4541_v52 = vmul.f32 -1.442695, %v3675_v18 }
 0x999   : > { %v6138_v3 = vpop.eup %6137  ;;  %6157 = vrcp.f32 %v3823_v42  ;;  %v3728_v11 = vadd.f32 1.0, %v6136_v13  ;;  %v3686_v42 = vadd.f32 %v7780_v10, %v6653_v8 }
 0x99a   : > { %v6140_v27 = vpop.eup %6139  ;;  %6159 = vrcp.f32 %v3821_v31 }
 0x99b   : > { %v7788_v28 = vpop.eup %6141  ;;  %6161 = vrcp.f32 %v3728_v11 }
 0x99c   : > { %v7792_v46 = vpop.eup %6143  ;;  %6163 = vtanh.f32 %v3667_v17 }
 0x99d   : > { %v6146_v55 = vpop.eup %6145  ;;  %6165 = vtanh.f32 %v3562_v7 }
 0x99e   : > { %v6148_v14 = vpop.eup %6147  ;;  %6167 = vtanh.f32 %v3659_v39  ;;  %v3767_v43 = vmul.f32 %v6146_v55, %v7665_v41 }
 0x99f   : > { %v6150_v62 = vpop.eup %6149  ;;  %6169 = vtanh.f32 %v3573_v44  ;;  %v3765_v9 = vmul.f32 %v6148_v14, %v7678_v37  ;;  %v4544_v44 = vmul.f32 -1.442695, %v3686_v42 }
 0x9a0   : > { %v6152_v20 = vpop.eup %6151  ;;  %v3824_v58 = vadd.f32 1.0, %v6150_v62  ;;  %6171 = vtanh.f32 %v3670_v36 }
 0x9a1   : > { %v6154_v0 = vpop.eup %6153  ;;  %v3726_v51 = vadd.f32 1.0, %v6152_v20  ;;  %6173 = vtanh.f32 %v3565_v61 }
 0x9a2   : > { %v6156_v59 = vpop.eup %6155  ;;  %6175 = vrcp.f32 %v3824_v58  ;;  %v3822_v33 = vadd.f32 1.0, %v6154_v0 }
 0x9a3   : > { %v6158_v57 = vpop.eup %6157  ;;  %6177 = vrcp.f32 %v3726_v51  ;;  %v3771_v60 = vmul.f32 %v6156_v59, %v7771_v26  ;;  %v3589_v26 = vadd.f32 %v7767_v30, %v6653_v8 }
 0x9a4   : > { %v6160_v24 = vpop.eup %6159  ;;  %6179 = vrcp.f32 %v3822_v33  ;;  %v3863_v41 = vmul.f32 %v6158_v57, %v7674_v35 }
 0x9a5   : > { %v6162_v1 = vpop.eup %6161  ;;  %v3775_v40 = vadd.f32 %v3771_v60, %v3767_v43  ;;  %6181 = vtanh.f32 %v3662_v34  ;;  %v3861_v16 = vmul.f32 %v6160_v24, %v7683_v48 }
 0x9a6   : > { %v6164_v53 = vpop.eup %6163  ;;  %6183 = vpow2.f32 %v4531_v54  ;;  %v3768_v38 = vmul.f32 %v6162_v1, %v7687_v45  ;;  %v4532_v45 = vmul.f32 -1.442695, %v3589_v26 }
 0x9a7   : > { %v6166_v12 = vpop.eup %6165  ;;  %v3867_v63 = vmul.f32 %v6164_v53, %v6138_v3  ;;  %6185 = vpow2.f32 %v4543_v50 }
 0x9a8   : > { %v6168_v21 = vpop.eup %6167  ;;  %v3769_v35 = vmul.f32 %v6166_v12, %v7773_v4  ;;  %6187 = vpow2.f32 %v4529_v56 }
 0x9a9   : > { %v6170_v13 = vpop.eup %6169  ;;  %v3871_v37 = vadd.f32 %v3867_v63, %v3863_v41  ;;  %v3865_v31 = vmul.f32 %v6168_v21, %v6140_v27  ;;  %6189 = vpow2.f32 %v4541_v52 }
 0x9aa   : > { %v6172_v17 = vpop.eup %6171  ;;  %v3773_v11 = vadd.f32 %v3769_v35, %v3765_v9  ;;  %v3772_v48 = vmul.f32 %v6170_v13, %v7775_v23  ;;  %6191 = vtanh.f32 %v3775_v40 }
 0x9ab   : > { %v6174_v3 = vpop.eup %6173  ;;  %v3869_v30 = vadd.f32 %v3865_v31, %v3861_v16  ;;  %v3868_v7 = vmul.f32 %v6172_v17, %v7788_v28  ;;  %6193 = vpow2.f32 %v4532_v45  ;;  %v3922_v45 = vld [vmem:[%s6695_s12 + $0x28] sm:$0xff] (%p6330_p5) }
 0x9ac   : > { %v6176_v39 = vpop.eup %6175  ;;  %v3776_v4 = vadd.f32 %v3772_v48, %v3768_v38  ;;  %v3770_v2 = vmul.f32 %v6174_v3, %v7778_v6  ;;  %6195 = vpow2.f32 %v4544_v44  ;;  %v3581_v6 = vadd.f32 %v7769_v5, %v6598_v29  ;;  %v3914_v48 = vld [vmem:[%s6695_s12 + $0x8] sm:$0xff] (%p6330_p5)  ;;  %v3916_v3 = vld [vmem:[%s6695_s12 + $0x10] sm:$0xff] (%p6330_p5)  ;;  %3923 = vst [vmem:[%s7842_s20 + $0x48] sm:$0xff] (%p6330_p5), %v3922_v45 }
 0x9ad   : > { %v6178_v8 = vpop.eup %6177  ;;  %v3864_v10 = vmul.f32 %v6176_v39, %v7692_v19  ;;  %6197 = vtanh.f32 %v3871_v37  ;;  %v3678_v19 = vadd.f32 %v7783_v49, %v6598_v29  ;;  %3915 = vst [vmem:[%s7842_s20 + $0x8] sm:$0xff] (%p6330_p5), %v3914_v48  ;;  %3917 = vst [vmem:[%s7842_s20 + $0x20] sm:$0xff] (%p6330_p5), %v3916_v3  ;;  %v3924_v39 = vld [vmem:[%s6695_s12 + $0x30] sm:$0xff] (%p6330_p5)  ;;  %v3930_v44 = vld [vmem:[%s6695_s12 + $0x48] sm:$0xff] (%p6330_p5) }
 0x9ae   : > { %v6180_v27 = vpop.eup %6179  ;;  %v3766_v36 = vmul.f32 %v6178_v8, %v7697_v15  ;;  %6199 = vtanh.f32 %v3773_v11  ;;  %v4530_v0 = vmul.f32 -1.442695, %v3581_v6  ;;  %v3912_v11 = vld [vmem:[%s6695_s12] sm:$0xff] (%p6330_p5)  ;;  %3925 = vst [vmem:[%s7842_s20 + $0x60] sm:$0xff] (%p6330_p5), %v3924_v39  ;;  %v3932_v8 = vld [vmem:[%s6695_s12 + $0x50] sm:$0xff] (%p6330_p5)  ;;  %3931 = vst [vmem:[%s7842_s20 + $0x88] sm:$0xff] (%p6330_p5), %v3930_v44 }
 0x9af   : > { %v6182_v55 = vpop.eup %6181  ;;  %v3862_v23 = vmul.f32 %v6180_v27, %v7701_v32  ;;  %v3872_v61 = vadd.f32 %v3868_v7, %v3864_v10  ;;  %v4542_v43 = vmul.f32 -1.442695, %v3678_v19  ;;  %v3920_v7 = vld [vmem:[%s6695_s12 + $0x20] sm:$0xff] (%p6330_p5)  ;;  %3913 = vst [vmem:[%s7842_s20] sm:$0xff] (%p6330_p5), %v3912_v11  ;;  %v3934_v10 = vld [vmem:[%s6695_s12 + $0x58] sm:$0xff] (%p6330_p5)  ;;  %3933 = vst [vmem:[%s7842_s20 + $0xa0] sm:$0xff] (%p6330_p5), %v3932_v8 }
 0x9b0   : > { %v6184_v14 = vpop.eup %6183  ;;  %v3774_v28 = vadd.f32 %v3770_v2, %v3766_v36  ;;  %v3866_v47 = vmul.f32 %v6182_v55, %v7792_v46  ;;  %3921 = vst [vmem:[%s7842_s20 + $0x40] sm:$0xff] (%p6330_p5), %v3920_v7  ;;  %v3928_v2 = vld [vmem:[%s6695_s12 + $0x40] sm:$0xff] (%p6330_p5)  ;;  %3935 = vst [vmem:[%s7842_s20 + $0xa8] sm:$0xff] (%p6330_p5), %v3934_v10  ;;  %v3938_v36 = vld [vmem:[%s6695_s12 + $0x68] sm:$0xff] (%p6330_p5) }
 0x9b1   : > { %v3755_v62 = vadd.f32 1.0, %v6184_v14  ;;  %v6186_v15 = vpop.eup %6185  ;;  %3929 = vst [vmem:[%s7842_s20 + $0x80] sm:$0xff] (%p6330_p5), %v3928_v2  ;;  %v3936_v27 = vld [vmem:[%s6695_s12 + $0x60] sm:$0xff] (%p6330_p5)  ;;  %v3940_v55 = vld [vmem:[%s6695_s12 + $0x70] sm:$0xff] (%p6330_p5)  ;;  %3939 = vst [vmem:[%s7842_s20 + $0xc8] sm:$0xff] (%p6330_p5), %v3938_v36 }
 0x9b2   : > { %v3870_v20 = vadd.f32 %v3866_v47, %v3862_v23  ;;  %v6188_v58 = vpop.eup %6187  ;;  %v3851_v32 = vadd.f32 1.0, %v6186_v15  ;;  %3937 = vst [vmem:[%s7842_s20 + $0xc0] sm:$0xff] (%p6330_p5), %v3936_v27  ;;  %3941 = vst [vmem:[%s7842_s20 + $0xe0] sm:$0xff] (%p6330_p5), %v3940_v55  ;;  %v3942_v23 = vld [vmem:[%s6695_s12 + $0x78] sm:$0xff] (%p6330_p5)  ;;  %v3946_v14 = vld [vmem:[%s6695_s12 + $0x88] sm:$0xff] (%p6330_p5) }
 0x9b3   : > { %6201 = vrcp.f32 %v3755_v62  ;;  %v6190_v22 = vpop.eup %6189  ;;  %v3753_v25 = vadd.f32 1.0, %v6188_v58  ;;  %3943 = vst [vmem:[%s7842_s20 + $0xe8] sm:$0xff] (%p6330_p5), %v3942_v23  ;;  %3947 = vst [vmem:[%s7842_s20 + $0x108] sm:$0xff] (%p6330_p5), %v3946_v14  ;;  %v3950_v47 = vld [vmem:[%s6695_s12 + $0x98] sm:$0xff] (%p6330_p5)  ;;  %v3952_v6 = vld [vmem:[%s6695_s12 + $0xa0] sm:$0xff] (%p6330_p5) }
 0x9b4   : > { %6203 = vtanh.f32 %v3869_v30  ;;  %v3849_v46 = vadd.f32 1.0, %v6190_v22  ;;  %v6192_v5 = vpop.eup %6191  ;;  %v3918_v30 = vld [vmem:[%s6695_s12 + $0x18] sm:$0xff] (%p6330_p5)  ;;  %3951 = vst [vmem:[%s7842_s20 + $0x128] sm:$0xff] (%p6330_p5), %v3950_v47  ;;  %3953 = vst [vmem:[%s7842_s20 + $0x140] sm:$0xff] (%p6330_p5), %v3952_v6  ;;  %v3954_v62 = vld [vmem:[%s6695_s12 + $0xa8] sm:$0xff] (%p6330_p5) }
 0x9b5   : > { %6205 = vrcp.f32 %v3851_v32  ;;  %v6194_v51 = vpop.eup %6193  ;;  %3919 = vst [vmem:[%s7842_s20 + $0x28] sm:$0xff] (%p6330_p5), %v3918_v30  ;;  %v3956_v19 = vld [vmem:[%s6695_s12 + $0xb0] sm:$0xff] (%p6330_p5)  ;;  %v3958_v15 = vld [vmem:[%s6695_s12 + $0xb8] sm:$0xff] (%p6330_p5)  ;;  %3955 = vst [vmem:[%s7842_s20 + $0x148] sm:$0xff] (%p6330_p5), %v3954_v62 }
 0x9b6   : > { %6207 = vrcp.f32 %v3753_v25  ;;  %v6196_v29 = vpop.eup %6195  ;;  %v3756_v49 = vadd.f32 1.0, %v6194_v51  ;;  %3957 = vst [vmem:[%s7842_s20 + $0x160] sm:$0xff] (%p6330_p5), %v3956_v19  ;;  %3959 = vst [vmem:[%s7842_s20 + $0x168] sm:$0xff] (%p6330_p5), %v3958_v15  ;;  %v3962_v58 = vld [vmem:[%s6695_s12 + $0xc8] sm:$0xff] (%p6330_p5)  ;;  %v3964_v32 = vld [vmem:[%s6695_s12 + $0xd0] sm:$0xff] (%p6330_p5) }
 0x9b7   : > { %6209 = vrcp.f32 %v3849_v46  ;;  %v6198_v34 = vpop.eup %6197  ;;  %v3852_v59 = vadd.f32 1.0, %v6196_v29  ;;  %3963 = vst [vmem:[%s7842_s20 + $0x188] sm:$0xff] (%p6330_p5), %v3962_v58  ;;  %3965 = vst [vmem:[%s7842_s20 + $0x1a0] sm:$0xff] (%p6330_p5), %v3964_v32  ;;  %v3966_v22 = vld [vmem:[%s6695_s12 + $0xd8] sm:$0xff] (%p6330_p5)  ;;  %v3968_v25 = vld [vmem:[%s6695_s12 + $0xe0] sm:$0xff] (%p6330_p5) }
 0x9b8   : > { %6211 = vpow2.f32 %v4530_v0  ;;  %v6200_v33 = vpop.eup %6199  ;;  %v3970_v0 = vld [vmem:[%s6695_s12 + $0xe8] sm:$0xff] (%p6330_p5)  ;;  %3967 = vst [vmem:[%s7842_s20 + $0x1a8] sm:$0xff] (%p6330_p5), %v3966_v22  ;;  %3969 = vst [vmem:[%s7842_s20 + $0x1c0] sm:$0xff] (%p6330_p5), %v3968_v25  ;;  %v3972_v46 = vld [vmem:[%s6695_s12 + $0xf0] sm:$0xff] (%p6330_p5) }
 0x9b9   : > { %6213 = vpow2.f32 %v4542_v43  ;;  %3971 = vst [vmem:[%s7842_s20 + $0x1c8] sm:$0xff] (%p6330_p5), %v3970_v0  ;;  %v3974_v43 = vld [vmem:[%s6695_s12 + $0xf8] sm:$0xff] (%p6330_p5)  ;;  %3973 = vst [vmem:[%s7842_s20 + $0x1e0] sm:$0xff] (%p6330_p5), %v3972_v46  ;;  %v3978_v51 = vld [vmem:[%s6695_s12 + $0x108] sm:$0xff] (%p6330_p5) }
 0x9ba   : > { %6215 = vtanh.f32 %v3776_v4  ;;  %v3926_v4 = vld [vmem:[%s6695_s12 + $0x38] sm:$0xff] (%p6330_p5)  ;;  %3975 = vst [vmem:[%s7842_s20 + $0x1e8] sm:$0xff] (%p6330_p5), %v3974_v43  ;;  %v3980_v29 = vld [vmem:[%s6695_s12 + $0x110] sm:$0xff] (%p6330_p5)  ;;  %3979 = vst [vmem:[%s7842_s20 + $0x208] sm:$0xff] (%p6330_p5), %v3978_v51 }
 0x9bb   : > { %6217 = vtanh.f32 %v3872_v61  ;;  %3927 = vst [vmem:[%s7842_s20 + $0x68] sm:$0xff] (%p6330_p5), %v3926_v4  ;;  %v3944_v61 = vld [vmem:[%s6695_s12 + $0x80] sm:$0xff] (%p6330_p5)  ;;  %3981 = vst [vmem:[%s7842_s20 + $0x220] sm:$0xff] (%p6330_p5), %v3980_v29 }
 0x9bc   : > { %6219 = vrcp.f32 %v3756_v49  ;;  %3945 = vst [vmem:[%s7842_s20 + $0x100] sm:$0xff] (%p6330_p5), %v3944_v61  ;;  %v3982_v49 = vld [vmem:[%s6695_s12 + $0x118] sm:$0xff] (%p6330_p5) }
 0x9bd   : > { %v6202_v54 = vpop.eup %6201  ;;  %6221 = vrcp.f32 %v3852_v59  ;;  %3983 = vst [vmem:[%s7842_s20 + $0x228] sm:$0xff] (%p6330_p5), %v3982_v49  ;;  %v3986_v59 = vld [vmem:[%s6695_s12 + $0x128] sm:$0xff] (%p6330_p5) }
 0x9be   : > { %v6204_v18 = vpop.eup %6203  ;;  %v3783_v57 = vmul.f32 %v6202_v54, %v6192_v5  ;;  %6223 = vtanh.f32 %v3774_v28  ;;  %v3948_v28 = vld [vmem:[%s6695_s12 + $0x90] sm:$0xff] (%p6330_p5)  ;;  %v3976_v5 = vld [vmem:[%s6695_s12 + $0x100] sm:$0xff] (%p6330_p5)  ;;  %3987 = vst [vmem:[%s7842_s20 + $0x248] sm:$0xff] (%p6330_p5), %v3986_v59  ;;  %v3990_v54 = vld [vmem:[%s6695_s12 + $0x138] sm:$0xff] (%p6330_p5) }
 0x9bf   : > { %v6206_v60 = vpop.eup %6205  ;;  %6225 = vtanh.f32 %v3870_v20  ;;  %3949 = vst [vmem:[%s7842_s20 + $0x120] sm:$0xff] (%p6330_p5), %v3948_v28  ;;  %v3960_v20 = vld [vmem:[%s6695_s12 + $0xc0] sm:$0xff] (%p6330_p5)  ;;  %3977 = vst [vmem:[%s7842_s20 + $0x200] sm:$0xff] (%p6330_p5), %v3976_v5 }
 0x9c0   : > { %v6208_v24 = vpop.eup %6207  ;;  %4549 = vst [vmem:[%s6695_s12 + $0x1e0] sm:$0xff] %v3783_v57  ;;  %v3879_v50 = vmul.f32 %v6206_v60, %v6198_v34  ;;  %3961 = vst [vmem:[%s7842_s20 + $0x180] sm:$0xff] (%p6330_p5), %v3960_v20  ;;  %v3984_v34 = vld [vmem:[%s6695_s12 + $0x120] sm:$0xff] (%p6330_p5)  ;;  %v3994_v57 = vld [vmem:[%s6695_s12 + $0x148] sm:$0xff] (%p6330_p5) }
 0x9c1   : > { %v6210_v1 = vpop.eup %6209  ;;  %v3781_v41 = vmul.f32 %v6208_v24, %v6200_v33  ;;  %v3988_v33 = vld [vmem:[%s6695_s12 + $0x130] sm:$0xff] (%p6330_p5)  ;;  %3985 = vst [vmem:[%s7842_s20 + $0x240] sm:$0xff] (%p6330_p5), %v3984_v34  ;;  %3991 = vst [vmem:[%s7842_s20 + $0x268] sm:$0xff] (%p6330_p5), %v3990_v54  ;;  %v3998_v24 = vld [vmem:[%s6695_s12 + $0x158] sm:$0xff] (%p6330_p5) }
 0x9c2   : > { %v6212_v40 = vpop.eup %6211  ;;  %4550 = vst [vmem:[%s6695_s12 + $0x1e8] sm:$0xff] %v3879_v50  ;;  %v3877_v56 = vmul.f32 %v6210_v1, %v6204_v18  ;;  %3989 = vst [vmem:[%s7842_s20 + $0x260] sm:$0xff] (%p6330_p5), %v3988_v33  ;;  %v3992_v18 = vld [vmem:[%s6695_s12 + $0x140] sm:$0xff] (%p6330_p5)  ;;  %v3996_v60 = vld [vmem:[%s6695_s12 + $0x150] sm:$0xff] (%p6330_p5) }
 0x9c3   : > { %v6214_v53 = vpop.eup %6213  ;;  %4545 = vst [vmem:[%s6695_s12 + $0x1c0] sm:$0xff] %v3781_v41  ;;  %v3754_v9 = vadd.f32 1.0, %v6212_v40  ;;  %3993 = vst [vmem:[%s7842_s20 + $0x280] sm:$0xff] (%p6330_p5), %v3992_v18  ;;  %v4000_v50 = vld [vmem:[%s6695_s12 + $0x160] sm:$0xff] (%p6330_p5)  ;;  %v4002_v1 = vld [vmem:[%s6695_s12 + $0x168] sm:$0xff] (%p6330_p5) }
 0x9c4   : > { %v6216_v52 = vpop.eup %6215  ;;  %4546 = vst [vmem:[%s6695_s12 + $0x1c8] sm:$0xff] %v3877_v56  ;;  %v3850_v12 = vadd.f32 1.0, %v6214_v53  ;;  %3995 = vst [vmem:[%s7842_s20 + $0x288] sm:$0xff] (%p6330_p5), %v3994_v57  ;;  %v4004_v41 = vld [vmem:[%s6695_s12 + $0x170] sm:$0xff] (%p6330_p5)  ;;  %v4006_v40 = vld [vmem:[%s6695_s12 + $0x178] sm:$0xff] (%p6330_p5) }
 0x9c5   : > { %v6218_v16 = vpop.eup %6217  ;;  %6227 = vrcp.f32 %v3754_v9  ;;  %3997 = vst [vmem:[%s7842_s20 + $0x2a0] sm:$0xff] (%p6330_p5), %v3996_v60  ;;  %3999 = vst [vmem:[%s7842_s20 + $0x2a8] sm:$0xff] (%p6330_p5), %v3998_v24  ;;  %v4008_v56 = vld [vmem:[%s6695_s12 + $0x180] sm:$0xff] (%p6330_p5)  ;;  %v4010_v53 = vld [vmem:[%s6695_s12 + $0x188] sm:$0xff] (%p6330_p5) }
 0x9c6   : > { %v6220_v63 = vpop.eup %6219  ;;  %6229 = vrcp.f32 %v3850_v12  ;;  %4001 = vst [vmem:[%s7842_s20 + $0x2c0] sm:$0xff] (%p6330_p5), %v4000_v50  ;;  %4003 = vst [vmem:[%s7842_s20 + $0x2c8] sm:$0xff] (%p6330_p5), %v4002_v1  ;;  %v4012_v9 = vld [vmem:[%s6695_s12 + $0x190] sm:$0xff] (%p6330_p5)  ;;  %v4016_v12 = vld [vmem:[%s6695_s12 + $0x1a0] sm:$0xff] (%p6330_p5) }
 0x9c7   : > { %v6222_v26 = vpop.eup %6221  ;;  %v3784_v21 = vmul.f32 %v6220_v63, %v6216_v52  ;;  %4005 = vst [vmem:[%s7842_s20 + $0x2e0] sm:$0xff] (%p6330_p5), %v4004_v41  ;;  %4007 = vst [vmem:[%s7842_s20 + $0x2e8] sm:$0xff] (%p6330_p5), %v4006_v40  ;;  %v4014_v52 = vld [vmem:[%s6695_s12 + $0x198] sm:$0xff] (%p6330_p5)  ;;  %v4020_v63 = vld [vmem:[%s6695_s12 + $0x1b0] sm:$0xff] (%p6330_p5) }
 0x9c8   : > { %v3880_v38 = vmul.f32 %v6222_v26, %v6218_v16  ;;  %v6224_v35 = vpop.eup %6223  ;;  %4009 = vst [vmem:[%s7842_s20 + $0x300] sm:$0xff] (%p6330_p5), %v4008_v56  ;;  %4011 = vst [vmem:[%s7842_s20 + $0x308] sm:$0xff] (%p6330_p5), %v4010_v53  ;;  %v4018_v16 = vld [vmem:[%s6695_s12 + $0x1a8] sm:$0xff] (%p6330_p5)  ;;  %v4022_v26 = vld [vmem:[%s6695_s12 + $0x1b8] sm:$0xff] (%p6330_p5) }
 0x9c9   : > { %4551 = vst [vmem:[%s6695_s12 + $0x1f0] sm:$0xff] %v3784_v21  ;;  %v6226_v42 = vpop.eup %6225  ;;  %4013 = vst [vmem:[%s7842_s20 + $0x320] sm:$0xff] (%p6330_p5), %v4012_v9 }
 0x9ca   : > { %4552 = vst [vmem:[%s6695_s12 + $0x1f8] sm:$0xff] %v3880_v38  ;;  %4015 = vst [vmem:[%s7842_s20 + $0x328] sm:$0xff] (%p6330_p5), %v4014_v52  ;;  %v4024_v21 = vld [vmem:[%s6695_s12 + $0x1c0] sm:$0xff] (%p6330_p5) }
 0x9cb   : > { %4017 = vst [vmem:[%s7842_s20 + $0x340] sm:$0xff] (%p6330_p5), %v4016_v12  ;;  %4019 = vst [vmem:[%s7842_s20 + $0x348] sm:$0xff] (%p6330_p5), %v4018_v16  ;;  %v4026_v38 = vld [vmem:[%s6695_s12 + $0x1c8] sm:$0xff] (%p6330_p5) }
 0x9cc   : > { %4021 = vst [vmem:[%s7842_s20 + $0x360] sm:$0xff] (%p6330_p5), %v4020_v63  ;;  %4023 = vst [vmem:[%s7842_s20 + $0x368] sm:$0xff] (%p6330_p5), %v4022_v26 }
 0x9cd   : > { %3896 = sbr.rel (!%p6330_p5) target bundleno = 2524 (0x9dc), region = 74  ;;  %4025 = vst [vmem:[%s7842_s20 + $0x380] sm:$0xff] (%p6330_p5), %v4024_v21  ;;  %4027 = vst [vmem:[%s7842_s20 + $0x388] sm:$0xff] (%p6330_p5), %v4026_v38 }
 0x9cf   : > { %v6228_v13 = vpop.eup %6227 }
 0x9d0   : > { %v6230_v37 = vpop.eup %6229  ;;  %v3782_v31 = vmul.f32 %v6228_v13, %v6224_v35  ;;  %v4032_v13 = vld [vmem:[%s6695_s12 + $0x1e0] sm:$0xff] (%p6330_p5) }
 0x9d1   : > { %v3878_v17 = vmul.f32 %v6230_v37, %v6226_v42  ;;  %v4034_v37 = vld [vmem:[%s6695_s12 + $0x1e8] sm:$0xff] (%p6330_p5)  ;;  %4033 = vst [vmem:[%s7842_s20 + $0x3c0] sm:$0xff] (%p6330_p5), %v4032_v13 }
 0x9d2   : > { %4547 = vst [vmem:[%s6695_s12 + $0x1d0] sm:$0xff] %v3782_v31  ;;  %v4036_v31 = vld [vmem:[%s6695_s12 + $0x1f0] sm:$0xff] (%p6330_p5)  ;;  %4035 = vst [vmem:[%s7842_s20 + $0x3c8] sm:$0xff] (%p6330_p5), %v4034_v37 }
 0x9d3   : > { %4548 = vst [vmem:[%s6695_s12 + $0x1d8] sm:$0xff] %v3878_v17  ;;  %4037 = vst [vmem:[%s7842_s20 + $0x3e0] sm:$0xff] (%p6330_p5), %v4036_v31  ;;  %v4038_v17 = vld [vmem:[%s6695_s12 + $0x1f8] sm:$0xff] (%p6330_p5) }
 0x9d4   : > { %4039 = vst [vmem:[%s7842_s20 + $0x3e8] sm:$0xff] %v4038_v17 }
 0x9d9   : > { %v4028_v35 = vld [vmem:[%s6695_s12 + $0x1d0] sm:$0xff] }
 0x9da   : > { %v4030_v42 = vld [vmem:[%s6695_s12 + $0x1d8] sm:$0xff]  ;;  %4029 = vst [vmem:[%s7842_s20 + $0x3a0] sm:$0xff] %v4028_v35 }
 0x9db   : > { %4031 = vst [vmem:[%s7842_s20 + $0x3a8] sm:$0xff] %v4030_v42 }
 0x9dc PF: > { %p10_p10 = scmp.ge.s32.totalorder %s6317_s16, 4   ;;  %s8008_s12 = smov %s6273_s13 }
 0x9dd   : > { %s8009_s13 = smov %s6328_s19  ;;  %s8010_s14 = smov %s6317_s16 }
 0x9de   :  { %12 = sbr.rel (!%p10_p10) target bundleno = 2 (0x2), region = 142 }

</bundles_post_ra>
